<compile_context>
chip_gen: v6e
topology: v6e:2x2x1
jax: 0.10.0
libtpu: 0.0.40
codegen_flags: <defaults>
</compile_context>

<pallas_src>
import functools

import jax
import jax.numpy as jnp
from jax.experimental import pallas as pl
from jax.experimental.pallas import tpu as pltpu

LANE = 128
SUBLANE = 8

_LAYER_ORDER = ("enc_1", "enc_2", "enc_3", "z_layer",
                "dec_1", "dec_2", "dec_3", "x_bar_layer")


def _round_up(x, m):
    return ((x + m - 1) // m) * m


def _pad_width(f, wide_align):
    """Lane padding: <=128 -> 128; wider dims align to the MXU width (256)."""
    if f <= LANE:
        return LANE
    return _round_up(f, wide_align)


# ---------------------------------------------------------------------------
# Fused Pallas kernel: whole AE forward for one batch tile.
# ---------------------------------------------------------------------------
def _ae_fused_kernel(x_ref,
                     w1_ref, b1_ref, w2_ref, b2_ref, w3_ref, b3_ref,
                     wz_ref, bz_ref,
                     wd1_ref, bd1_ref, wd2_ref, bd2_ref, wd3_ref, bd3_ref,
                     wxb_ref, bxb_ref,
                     xbar_ref, z_ref):
    def lin(h, w_ref, b_ref, relu):
        w = w_ref[...]
        y = jnp.dot(h.astype(w.dtype), w, preferred_element_type=jnp.float32)
        y = y + b_ref[...]                      # (1, out) broadcast over rows
        return jnp.maximum(y, 0.0) if relu else y

    h = x_ref[...]
    h = lin(h, w1_ref, b1_ref, True)            # enc_1 + relu
    h = lin(h, w2_ref, b2_ref, True)            # enc_2 + relu
    h = lin(h, w3_ref, b3_ref, True)            # enc_3 + relu
    z = lin(h, wz_ref, bz_ref, False)           # z_layer (lane-padded)
    z_ref[...] = z.astype(z_ref.dtype)
    h = lin(z, wd1_ref, bd1_ref, True)          # dec_1 + relu
    h = lin(h, wd2_ref, bd2_ref, True)          # dec_2 + relu
    h = lin(h, wd3_ref, bd3_ref, True)          # dec_3 + relu
    xbar_ref[...] = lin(h, wxb_ref, bxb_ref, False).astype(xbar_ref.dtype)


# ---------------------------------------------------------------------------
# Parameter construction (deterministic, PyTorch-Linear-style init).
# ---------------------------------------------------------------------------
def _init_linear(key, in_f, out_f):
    """torch.nn.Linear default init: U(-1/sqrt(in), 1/sqrt(in)); w is (out, in)."""
    kw, kb = jax.random.split(key)
    bound = 1.0 / jnp.sqrt(jnp.float32(in_f))
    w = jax.random.uniform(kw, (out_f, in_f), jnp.float32, -bound, bound)
    b = jax.random.uniform(kb, (out_f,), jnp.float32, -bound, bound)
    return w, b


def make_ae_params(key, n_enc_1, n_enc_2, n_enc_3,
                   n_dec_1, n_dec_2, n_dec_3, n_input, n_z):
    dims = [
        ("enc_1", n_input, n_enc_1),
        ("enc_2", n_enc_1, n_enc_2),
        ("enc_3", n_enc_2, n_enc_3),
        ("z_layer", n_enc_3, n_z),
        ("dec_1", n_z, n_dec_1),
        ("dec_2", n_dec_1, n_dec_2),
        ("dec_3", n_dec_2, n_dec_3),
        ("x_bar_layer", n_dec_3, n_input),
    ]
    params = {}
    for i, (name, in_f, out_f) in enumerate(dims):
        params[name] = _init_linear(jax.random.fold_in(key, i), in_f, out_f)
    return params


def prepare_ae_params(raw_params, *, use_bf16=False, wide_align=256):
    """One-time layout conversion: transpose weights to (in, out), biases to
    (1, out), and zero-pad every feature width (including n_input) to
    lane-dense multiples (128, or 256 for dims >= 128).

    Numerically exact: padded biases are 0, padded weight rows/cols are 0, and
    relu(0) = 0, so padded lanes carry zeros through the whole network.
    """
    n_z = int(raw_params["z_layer"][0].shape[0])
    n_input = int(raw_params["enc_1"][0].shape[1])
    in_pad0 = _pad_width(n_input, wide_align)
    w_dtype = jnp.bfloat16 if use_bf16 else jnp.float32

    layers = []
    prev_out_pad = in_pad0
    for name in _LAYER_ORDER:
        w, b = raw_params[name]                 # w: (out, in), b: (out,)
        out_f, in_f = w.shape
        in_pad = prev_out_pad
        out_pad = _pad_width(out_f, wide_align)
        wp = (jnp.zeros((in_pad, out_pad), jnp.float32)
              .at[:in_f, :out_f].set(w.T).astype(w_dtype))
        bp = jnp.zeros((1, out_pad), jnp.float32).at[:, :out_f].set(b)
        layers.append((wp, bp))
        prev_out_pad = out_pad

    return {
        "layers": tuple(layers),
        "n_z": n_z,
        "n_input": n_input,
        "in_pad": in_pad0,                      # padded n_input (x / x_bar width)
        "z_pad": layers[3][0].shape[1],         # padded n_z width
    }


# ---------------------------------------------------------------------------
# Tiling / VMEM budgeting helpers.
# ---------------------------------------------------------------------------
def _pick_tile_n(n, requested):
    """Sublane-multiple batch tile: never larger than padded N, and capped at
    ~N/2 so the parallel grid axis has >= 2 steps (both TCs on v7x)."""
    t = max(SUBLANE, (int(requested) // SUBLANE) * SUBLANE)
    t = min(t, _round_up(max(n, 1), SUBLANE))
    if n > 2 * SUBLANE:
        t = min(t, _round_up((n + 1) // 2, SUBLANE))
    return max(SUBLANE, t)


def _vmem_limit_bytes(layers, tile_n, in_pad, z_pad, weight_bufs):
    wbytes = sum(w.size * w.dtype.itemsize + b.size * b.dtype.itemsize
                 for (w, b) in layers) * weight_bufs
    io = 2 * tile_n * in_pad * 4          # x input (double-buffered)
    io += 2 * tile_n * in_pad * 4         # x_bar output (double-buffered)
    io += 2 * tile_n * z_pad * 4          # z output (double-buffered)
    max_w = max(w.shape[1] for (w, _) in layers)
    act = 4 * tile_n * max_w * 4          # live activations inside the body
    est = int(1.25 * (wbytes + io + act)) + (4 << 20)
    # Floor at the v6e/v7x default scoped limit, cap at v7x per-TC physical.
    return int(min(max(est, 32 << 20), 64 << 20))


# ---------------------------------------------------------------------------
# AE forward: one fused, batch-tiled pallas_call.
# ---------------------------------------------------------------------------
def ae_forward(kparams, x, *, tile_n=256, single_buffer_weights=True):
    layers = kparams["layers"]
    n_z = kparams["n_z"]
    n_input = kparams["n_input"]
    in_pad = kparams["in_pad"]
    z_pad = kparams["z_pad"]

    n, nf = x.shape
    assert nf == n_input, f"expected {n_input} input features, got {nf}"

    tile = _pick_tile_n(n, tile_n)
    n_pad = _round_up(n, tile)
    # Single fused pad of batch rows + feature lanes (exact: zeros propagate).
    if (n_pad, in_pad) != (n, n_input):
        x = jnp.pad(x, ((0, n_pad - n), (0, in_pad - n_input)))
    grid = (n_pad // tile,)

    flat_wb = [a for (w, b) in layers for a in (w, b)]

    # Weights/biases: full-array VMEM-resident blocks (same block every step).
    # Constant index_map -> single-buffer them to halve their VMEM footprint.
    if single_buffer_weights:
        param_specs = [pl.BlockSpec(a.shape, lambda i: (0, 0),
                                    pipeline_mode=pl.Buffered(1))
                       for a in flat_wb]
        weight_bufs = 1
    else:
        param_specs = [pl.BlockSpec(a.shape, lambda i: (0, 0)) for a in flat_wb]
        weight_bufs = 2

    in_specs = [pl.BlockSpec((tile, in_pad), lambda i: (i, 0))] + param_specs
    out_specs = [pl.BlockSpec((tile, in_pad), lambda i: (i, 0)),
                 pl.BlockSpec((tile, z_pad), lambda i: (i, 0))]

    vmem_limit = _vmem_limit_bytes(layers, tile, in_pad, z_pad, weight_bufs)

    x_bar_p, z_p = pl.pallas_call(
        _ae_fused_kernel,
        out_shape=(jax.ShapeDtypeStruct((n_pad, in_pad), jnp.float32),
                   jax.ShapeDtypeStruct((n_pad, z_pad), jnp.float32)),
        grid=grid,
        in_specs=in_specs,
        out_specs=out_specs,
        compiler_params=pltpu.CompilerParams(
            dimension_semantics=("parallel",),   # batch tiles shard on v7x's 2 TCs
            vmem_limit_bytes=vmem_limit),
    )(x, *flat_wb)

    return x_bar_p[:n, :n_input], z_p[:n, :n_z]


# ---------------------------------------------------------------------------
# Pure-JAX reference (PyTorch semantics) for correctness checking.
# ---------------------------------------------------------------------------
def ae_forward_ref(raw_params, x):
    def layer(name, h, relu):
        w, b = raw_params[name]
        y = jnp.dot(h, w.T, precision=jax.lax.Precision.HIGHEST) + b
        return jnp.maximum(y, 0.0) if relu else y

    h1 = layer("enc_1", x, True)
    h2 = layer("enc_2", h1, True)
    h3 = layer("enc_3", h2, True)
    z = layer("z_layer", h3, False)
    d1 = layer("dec_1", z, True)
    d2 = layer("dec_2", d1, True)
    d3 = layer("dec_3", d2, True)
    x_bar = layer("x_bar_layer", d3, False)
    return x_bar, z


if __name__ == "__main__":
    # Small, forward-consistent sizes (the SDCN script feeds x.transpose(),
    # i.e. rows = samples, cols = features).
    N = 200                      # deliberately not a multiple of the tile
    n_input = 32
    n_enc_1, n_enc_2, n_enc_3 = 64, 64, 16
    n_z = 8
    n_dec_1, n_dec_2, n_dec_3 = 16, 64, 64

    key = jax.random.PRNGKey(0)
    pkey, xkey = jax.random.split(key)
    raw_params = make_ae_params(pkey, n_enc_1, n_enc_2, n_enc_3,
                                n_dec_1, n_dec_2, n_dec_3, n_input, n_z)
    x = jax.random.normal(xkey, (N, n_input), jnp.float32)
    x_bar_ref, z_ref = ae_forward_ref(raw_params, x)

    def run(use_bf16, single_buffer):
        kp = prepare_ae_params(raw_params, use_bf16=use_bf16)
        fwd = jax.jit(functools.partial(ae_forward, kp, tile_n=256,
                                        single_buffer_weights=single_buffer))
        xb, z = fwd(x)
        return jax.block_until_ready(xb), jax.block_until_ready(z)

    # f32 path (bit-faithful vs. the PyTorch module, tight tolerance).
    try:
        x_bar, z = run(use_bf16=False, single_buffer=True)
    except Exception:
        # pl.Buffered(1) rejected on this jax version -> default buffering.
        x_bar, z = run(use_bf16=False, single_buffer=False)

    assert x_bar.shape == (N, n_input) and z.shape == (N, n_z)
    assert jnp.allclose(x_bar, x_bar_ref, atol=1e-4, rtol=1e-4)
    assert jnp.allclose(z, z_ref, atol=1e-4, rtol=1e-4)

    # bf16 MXU fast path (optional), checked at a looser tolerance.
    try:
        x_bar_bf, z_bf = run(use_bf16=True, single_buffer=True)
    except Exception:
        x_bar_bf, z_bf = run(use_bf16=True, single_buffer=False)
    assert jnp.allclose(x_bar_bf, x_bar_ref, atol=1e-1, rtol=1e-1)
    assert jnp.allclose(z_bf, z_ref, atol=1e-1, rtol=1e-1)

    print("KERNEL_OK")
</pallas_src>

<mosaic_0001>
module attributes {stable_mosaic.version = 11 : i64} {
  func.func @_ae_fused_kernel(%arg0: i32, %arg1: memref<104x128xf32, #tpu.memory_space<vmem>>, %arg2: memref<128x128xf32, #tpu.memory_space<vmem>>, %arg3: memref<1x128xf32, #tpu.memory_space<vmem>>, %arg4: memref<128x128xf32, #tpu.memory_space<vmem>>, %arg5: memref<1x128xf32, #tpu.memory_space<vmem>>, %arg6: memref<128x128xf32, #tpu.memory_space<vmem>>, %arg7: memref<1x128xf32, #tpu.memory_space<vmem>>, %arg8: memref<128x128xf32, #tpu.memory_space<vmem>>, %arg9: memref<1x128xf32, #tpu.memory_space<vmem>>, %arg10: memref<128x128xf32, #tpu.memory_space<vmem>>, %arg11: memref<1x128xf32, #tpu.memory_space<vmem>>, %arg12: memref<128x128xf32, #tpu.memory_space<vmem>>, %arg13: memref<1x128xf32, #tpu.memory_space<vmem>>, %arg14: memref<128x128xf32, #tpu.memory_space<vmem>>, %arg15: memref<1x128xf32, #tpu.memory_space<vmem>>, %arg16: memref<128x128xf32, #tpu.memory_space<vmem>>, %arg17: memref<1x128xf32, #tpu.memory_space<vmem>>, %arg18: memref<104x128xf32, #tpu.memory_space<vmem>>, %arg19: memref<104x128xf32, #tpu.memory_space<vmem>>) attributes {dimension_semantics = [#tpu.dimension_semantics<parallel>], iteration_bounds = array<i64: 2>, scalar_prefetch = 0 : i64, scratch_operands = 0 : i64, tpu.core_type = #tpu.core_type<tc>, window_params = [{transform_indices = @transform_0, window_bounds = array<i64: 104, 128>}, {pipeline_mode = #tpu.pipeline_mode<synchronous>, transform_indices = @transform_1, window_bounds = array<i64: 128, 128>}, {pipeline_mode = #tpu.pipeline_mode<synchronous>, transform_indices = @transform_2, window_bounds = array<i64: 1, 128>}, {pipeline_mode = #tpu.pipeline_mode<synchronous>, transform_indices = @transform_3, window_bounds = array<i64: 128, 128>}, {pipeline_mode = #tpu.pipeline_mode<synchronous>, transform_indices = @transform_4, window_bounds = array<i64: 1, 128>}, {pipeline_mode = #tpu.pipeline_mode<synchronous>, transform_indices = @transform_5, window_bounds = array<i64: 128, 128>}, {pipeline_mode = #tpu.pipeline_mode<synchronous>, transform_indices = @transform_6, window_bounds = array<i64: 1, 128>}, {pipeline_mode = #tpu.pipeline_mode<synchronous>, transform_indices = @transform_7, window_bounds = array<i64: 128, 128>}, {pipeline_mode = #tpu.pipeline_mode<synchronous>, transform_indices = @transform_8, window_bounds = array<i64: 1, 128>}, {pipeline_mode = #tpu.pipeline_mode<synchronous>, transform_indices = @transform_9, window_bounds = array<i64: 128, 128>}, {pipeline_mode = #tpu.pipeline_mode<synchronous>, transform_indices = @transform_10, window_bounds = array<i64: 1, 128>}, {pipeline_mode = #tpu.pipeline_mode<synchronous>, transform_indices = @transform_11, window_bounds = array<i64: 128, 128>}, {pipeline_mode = #tpu.pipeline_mode<synchronous>, transform_indices = @transform_12, window_bounds = array<i64: 1, 128>}, {pipeline_mode = #tpu.pipeline_mode<synchronous>, transform_indices = @transform_13, window_bounds = array<i64: 128, 128>}, {pipeline_mode = #tpu.pipeline_mode<synchronous>, transform_indices = @transform_14, window_bounds = array<i64: 1, 128>}, {pipeline_mode = #tpu.pipeline_mode<synchronous>, transform_indices = @transform_15, window_bounds = array<i64: 128, 128>}, {pipeline_mode = #tpu.pipeline_mode<synchronous>, transform_indices = @transform_16, window_bounds = array<i64: 1, 128>}, {transform_indices = @transform_17, window_bounds = array<i64: 104, 128>}, {transform_indices = @transform_18, window_bounds = array<i64: 104, 128>}]} {
    %c0 = arith.constant 0 : index
    %c0_0 = arith.constant 0 : index
    %0 = vector.load %arg1[%c0, %c0_0] : memref<104x128xf32, #tpu.memory_space<vmem>>, vector<104x128xf32>
    %c0_1 = arith.constant 0 : index
    %c0_2 = arith.constant 0 : index
    %1 = vector.load %arg2[%c0_1, %c0_2] : memref<128x128xf32, #tpu.memory_space<vmem>>, vector<128x128xf32>
    %cst = arith.constant dense<0.000000e+00> : vector<104x128xf32>
    %2 = tpu.matmul %0, %1, %cst {dimension_numbers = #tpu.dot_dimension_numbers<[1], [0], [0], [1], [0, 0, 1, 1], [], []>} : vector<104x128xf32>, vector<128x128xf32>, vector<104x128xf32> -> vector<104x128xf32>
    %c0_3 = arith.constant 0 : index
    %c0_4 = arith.constant 0 : index
    %3 = vector.load %arg3[%c0_3, %c0_4] : memref<1x128xf32, #tpu.memory_space<vmem>>, vector<1x128xf32>
    %4 = vector.broadcast %3 : vector<1x128xf32> to vector<104x128xf32>
    %5 = arith.addf %2, %4 : vector<104x128xf32>
    %cst_5 = arith.constant 0.000000e+00 : f32
    %6 = vector.broadcast %cst_5 : f32 to vector<104x128xf32>
    %7 = arith.maximumf %5, %6 : vector<104x128xf32>
    %c0_6 = arith.constant 0 : index
    %c0_7 = arith.constant 0 : index
    %8 = vector.load %arg4[%c0_6, %c0_7] : memref<128x128xf32, #tpu.memory_space<vmem>>, vector<128x128xf32>
    %cst_8 = arith.constant dense<0.000000e+00> : vector<104x128xf32>
    %9 = tpu.matmul %7, %8, %cst_8 {dimension_numbers = #tpu.dot_dimension_numbers<[1], [0], [0], [1], [0, 0, 1, 1], [], []>} : vector<104x128xf32>, vector<128x128xf32>, vector<104x128xf32> -> vector<104x128xf32>
    %c0_9 = arith.constant 0 : index
    %c0_10 = arith.constant 0 : index
    %10 = vector.load %arg5[%c0_9, %c0_10] : memref<1x128xf32, #tpu.memory_space<vmem>>, vector<1x128xf32>
    %11 = vector.broadcast %10 : vector<1x128xf32> to vector<104x128xf32>
    %12 = arith.addf %9, %11 : vector<104x128xf32>
    %cst_11 = arith.constant 0.000000e+00 : f32
    %13 = vector.broadcast %cst_11 : f32 to vector<104x128xf32>
    %14 = arith.maximumf %12, %13 : vector<104x128xf32>
    %c0_12 = arith.constant 0 : index
    %c0_13 = arith.constant 0 : index
    %15 = vector.load %arg6[%c0_12, %c0_13] : memref<128x128xf32, #tpu.memory_space<vmem>>, vector<128x128xf32>
    %cst_14 = arith.constant dense<0.000000e+00> : vector<104x128xf32>
    %16 = tpu.matmul %14, %15, %cst_14 {dimension_numbers = #tpu.dot_dimension_numbers<[1], [0], [0], [1], [0, 0, 1, 1], [], []>} : vector<104x128xf32>, vector<128x128xf32>, vector<104x128xf32> -> vector<104x128xf32>
    %c0_15 = arith.constant 0 : index
    %c0_16 = arith.constant 0 : index
    %17 = vector.load %arg7[%c0_15, %c0_16] : memref<1x128xf32, #tpu.memory_space<vmem>>, vector<1x128xf32>
    %18 = vector.broadcast %17 : vector<1x128xf32> to vector<104x128xf32>
    %19 = arith.addf %16, %18 : vector<104x128xf32>
    %cst_17 = arith.constant 0.000000e+00 : f32
    %20 = vector.broadcast %cst_17 : f32 to vector<104x128xf32>
    %21 = arith.maximumf %19, %20 : vector<104x128xf32>
    %c0_18 = arith.constant 0 : index
    %c0_19 = arith.constant 0 : index
    %22 = vector.load %arg8[%c0_18, %c0_19] : memref<128x128xf32, #tpu.memory_space<vmem>>, vector<128x128xf32>
    %cst_20 = arith.constant dense<0.000000e+00> : vector<104x128xf32>
    %23 = tpu.matmul %21, %22, %cst_20 {dimension_numbers = #tpu.dot_dimension_numbers<[1], [0], [0], [1], [0, 0, 1, 1], [], []>} : vector<104x128xf32>, vector<128x128xf32>, vector<104x128xf32> -> vector<104x128xf32>
    %c0_21 = arith.constant 0 : index
    %c0_22 = arith.constant 0 : index
    %24 = vector.load %arg9[%c0_21, %c0_22] : memref<1x128xf32, #tpu.memory_space<vmem>>, vector<1x128xf32>
    %25 = vector.broadcast %24 : vector<1x128xf32> to vector<104x128xf32>
    %26 = arith.addf %23, %25 : vector<104x128xf32>
    %c0_23 = arith.constant 0 : index
    %c0_24 = arith.constant 0 : index
    %27 = vector.load %arg19[%c0_23, %c0_24] : memref<104x128xf32, #tpu.memory_space<vmem>>, vector<104x128xf32>
    tpu.vector_store %arg19[%c0_23, %c0_24], %26 {strides = array<i32>} : memref<104x128xf32, #tpu.memory_space<vmem>>, vector<104x128xf32>,
    %c0_25 = arith.constant 0 : index
    %c0_26 = arith.constant 0 : index
    %28 = vector.load %arg10[%c0_25, %c0_26] : memref<128x128xf32, #tpu.memory_space<vmem>>, vector<128x128xf32>
    %cst_27 = arith.constant dense<0.000000e+00> : vector<104x128xf32>
    %29 = tpu.matmul %26, %28, %cst_27 {dimension_numbers = #tpu.dot_dimension_numbers<[1], [0], [0], [1], [0, 0, 1, 1], [], []>} : vector<104x128xf32>, vector<128x128xf32>, vector<104x128xf32> -> vector<104x128xf32>
    %c0_28 = arith.constant 0 : index
    %c0_29 = arith.constant 0 : index
    %30 = vector.load %arg11[%c0_28, %c0_29] : memref<1x128xf32, #tpu.memory_space<vmem>>, vector<1x128xf32>
    %31 = vector.broadcast %30 : vector<1x128xf32> to vector<104x128xf32>
    %32 = arith.addf %29, %31 : vector<104x128xf32>
    %cst_30 = arith.constant 0.000000e+00 : f32
    %33 = vector.broadcast %cst_30 : f32 to vector<104x128xf32>
    %34 = arith.maximumf %32, %33 : vector<104x128xf32>
    %c0_31 = arith.constant 0 : index
    %c0_32 = arith.constant 0 : index
    %35 = vector.load %arg12[%c0_31, %c0_32] : memref<128x128xf32, #tpu.memory_space<vmem>>, vector<128x128xf32>
    %cst_33 = arith.constant dense<0.000000e+00> : vector<104x128xf32>
    %36 = tpu.matmul %34, %35, %cst_33 {dimension_numbers = #tpu.dot_dimension_numbers<[1], [0], [0], [1], [0, 0, 1, 1], [], []>} : vector<104x128xf32>, vector<128x128xf32>, vector<104x128xf32> -> vector<104x128xf32>
    %c0_34 = arith.constant 0 : index
    %c0_35 = arith.constant 0 : index
    %37 = vector.load %arg13[%c0_34, %c0_35] : memref<1x128xf32, #tpu.memory_space<vmem>>, vector<1x128xf32>
    %38 = vector.broadcast %37 : vector<1x128xf32> to vector<104x128xf32>
    %39 = arith.addf %36, %38 : vector<104x128xf32>
    %cst_36 = arith.constant 0.000000e+00 : f32
    %40 = vector.broadcast %cst_36 : f32 to vector<104x128xf32>
    %41 = arith.maximumf %39, %40 : vector<104x128xf32>
    %c0_37 = arith.constant 0 : index
    %c0_38 = arith.constant 0 : index
    %42 = vector.load %arg14[%c0_37, %c0_38] : memref<128x128xf32, #tpu.memory_space<vmem>>, vector<128x128xf32>
    %cst_39 = arith.constant dense<0.000000e+00> : vector<104x128xf32>
    %43 = tpu.matmul %41, %42, %cst_39 {dimension_numbers = #tpu.dot_dimension_numbers<[1], [0], [0], [1], [0, 0, 1, 1], [], []>} : vector<104x128xf32>, vector<128x128xf32>, vector<104x128xf32> -> vector<104x128xf32>
    %c0_40 = arith.constant 0 : index
    %c0_41 = arith.constant 0 : index
    %44 = vector.load %arg15[%c0_40, %c0_41] : memref<1x128xf32, #tpu.memory_space<vmem>>, vector<1x128xf32>
    %45 = vector.broadcast %44 : vector<1x128xf32> to vector<104x128xf32>
    %46 = arith.addf %43, %45 : vector<104x128xf32>
    %cst_42 = arith.constant 0.000000e+00 : f32
    %47 = vector.broadcast %cst_42 : f32 to vector<104x128xf32>
    %48 = arith.maximumf %46, %47 : vector<104x128xf32>
    %c0_43 = arith.constant 0 : index
    %c0_44 = arith.constant 0 : index
    %49 = vector.load %arg16[%c0_43, %c0_44] : memref<128x128xf32, #tpu.memory_space<vmem>>, vector<128x128xf32>
    %cst_45 = arith.constant dense<0.000000e+00> : vector<104x128xf32>
    %50 = tpu.matmul %48, %49, %cst_45 {dimension_numbers = #tpu.dot_dimension_numbers<[1], [0], [0], [1], [0, 0, 1, 1], [], []>} : vector<104x128xf32>, vector<128x128xf32>, vector<104x128xf32> -> vector<104x128xf32>
    %c0_46 = arith.constant 0 : index
    %c0_47 = arith.constant 0 : index
    %51 = vector.load %arg17[%c0_46, %c0_47] : memref<1x128xf32, #tpu.memory_space<vmem>>, vector<1x128xf32>
    %52 = vector.broadcast %51 : vector<1x128xf32> to vector<104x128xf32>
    %53 = arith.addf %50, %52 : vector<104x128xf32>
    %c0_48 = arith.constant 0 : index
    %c0_49 = arith.constant 0 : index
    %54 = vector.load %arg18[%c0_48, %c0_49] : memref<104x128xf32, #tpu.memory_space<vmem>>, vector<104x128xf32>
    tpu.vector_store %arg18[%c0_48, %c0_49], %53 {strides = array<i32>} : memref<104x128xf32, #tpu.memory_space<vmem>>, vector<104x128xf32>,
    return
  }
  func.func @transform_0(%arg0: i32) -> (i32, i32) {
    %c0_i32 = arith.constant 0 : i32
    %c0_i32_0 = arith.constant 0 : i32
    return %arg0, %c0_i32 : i32, i32
  }
  func.func @transform_1(%arg0: i32) -> (i32, i32) {
    %c0_i32 = arith.constant 0 : i32
    %c0_i32_0 = arith.constant 0 : i32
    %c0_i32_1 = arith.constant 0 : i32
    return %c0_i32, %c0_i32_0 : i32, i32
  }
  func.func @transform_2(%arg0: i32) -> (i32, i32) {
    %c0_i32 = arith.constant 0 : i32
    %c0_i32_0 = arith.constant 0 : i32
    %c0_i32_1 = arith.constant 0 : i32
    return %c0_i32, %c0_i32_0 : i32, i32
  }
  func.func @transform_3(%arg0: i32) -> (i32, i32) {
    %c0_i32 = arith.constant 0 : i32
    %c0_i32_0 = arith.constant 0 : i32
    %c0_i32_1 = arith.constant 0 : i32
    return %c0_i32, %c0_i32_0 : i32, i32
  }
  func.func @transform_4(%arg0: i32) -> (i32, i32) {
    %c0_i32 = arith.constant 0 : i32
    %c0_i32_0 = arith.constant 0 : i32
    %c0_i32_1 = arith.constant 0 : i32
    return %c0_i32, %c0_i32_0 : i32, i32
  }
  func.func @transform_5(%arg0: i32) -> (i32, i32) {
    %c0_i32 = arith.constant 0 : i32
    %c0_i32_0 = arith.constant 0 : i32
    %c0_i32_1 = arith.constant 0 : i32
    return %c0_i32, %c0_i32_0 : i32, i32
  }
  func.func @transform_6(%arg0: i32) -> (i32, i32) {
    %c0_i32 = arith.constant 0 : i32
    %c0_i32_0 = arith.constant 0 : i32
    %c0_i32_1 = arith.constant 0 : i32
    return %c0_i32, %c0_i32_0 : i32, i32
  }
  func.func @transform_7(%arg0: i32) -> (i32, i32) {
    %c0_i32 = arith.constant 0 : i32
    %c0_i32_0 = arith.constant 0 : i32
    %c0_i32_1 = arith.constant 0 : i32
    return %c0_i32, %c0_i32_0 : i32, i32
  }
  func.func @transform_8(%arg0: i32) -> (i32, i32) {
    %c0_i32 = arith.constant 0 : i32
    %c0_i32_0 = arith.constant 0 : i32
    %c0_i32_1 = arith.constant 0 : i32
    return %c0_i32, %c0_i32_0 : i32, i32
  }
  func.func @transform_9(%arg0: i32) -> (i32, i32) {
    %c0_i32 = arith.constant 0 : i32
    %c0_i32_0 = arith.constant 0 : i32
    %c0_i32_1 = arith.constant 0 : i32
    return %c0_i32, %c0_i32_0 : i32, i32
  }
  func.func @transform_10(%arg0: i32) -> (i32, i32) {
    %c0_i32 = arith.constant 0 : i32
    %c0_i32_0 = arith.constant 0 : i32
    %c0_i32_1 = arith.constant 0 : i32
    return %c0_i32, %c0_i32_0 : i32, i32
  }
  func.func @transform_11(%arg0: i32) -> (i32, i32) {
    %c0_i32 = arith.constant 0 : i32
    %c0_i32_0 = arith.constant 0 : i32
    %c0_i32_1 = arith.constant 0 : i32
    return %c0_i32, %c0_i32_0 : i32, i32
  }
  func.func @transform_12(%arg0: i32) -> (i32, i32) {
    %c0_i32 = arith.constant 0 : i32
    %c0_i32_0 = arith.constant 0 : i32
    %c0_i32_1 = arith.constant 0 : i32
    return %c0_i32, %c0_i32_0 : i32, i32
  }
  func.func @transform_13(%arg0: i32) -> (i32, i32) {
    %c0_i32 = arith.constant 0 : i32
    %c0_i32_0 = arith.constant 0 : i32
    %c0_i32_1 = arith.constant 0 : i32
    return %c0_i32, %c0_i32_0 : i32, i32
  }
  func.func @transform_14(%arg0: i32) -> (i32, i32) {
    %c0_i32 = arith.constant 0 : i32
    %c0_i32_0 = arith.constant 0 : i32
    %c0_i32_1 = arith.constant 0 : i32
    return %c0_i32, %c0_i32_0 : i32, i32
  }
  func.func @transform_15(%arg0: i32) -> (i32, i32) {
    %c0_i32 = arith.constant 0 : i32
    %c0_i32_0 = arith.constant 0 : i32
    %c0_i32_1 = arith.constant 0 : i32
    return %c0_i32, %c0_i32_0 : i32, i32
  }
  func.func @transform_16(%arg0: i32) -> (i32, i32) {
    %c0_i32 = arith.constant 0 : i32
    %c0_i32_0 = arith.constant 0 : i32
    %c0_i32_1 = arith.constant 0 : i32
    return %c0_i32, %c0_i32_0 : i32, i32
  }
  func.func @transform_17(%arg0: i32) -> (i32, i32) {
    %c0_i32 = arith.constant 0 : i32
    %c0_i32_0 = arith.constant 0 : i32
    return %arg0, %c0_i32 : i32, i32
  }
  func.func @transform_18(%arg0: i32) -> (i32, i32) {
    %c0_i32 = arith.constant 0 : i32
    %c0_i32_0 = arith.constant 0 : i32
    return %arg0, %c0_i32 : i32, i32
  }
}

module attributes {stable_mosaic.version = 11 : i64} {
  func.func @_ae_fused_kernel(%arg0: i32, %arg1: memref<104x128xf32, #tpu.memory_space<vmem>>, %arg2: memref<128x128xf32, #tpu.memory_space<vmem>>, %arg3: memref<1x128xf32, #tpu.memory_space<vmem>>, %arg4: memref<128x128xf32, #tpu.memory_space<vmem>>, %arg5: memref<1x128xf32, #tpu.memory_space<vmem>>, %arg6: memref<128x128xf32, #tpu.memory_space<vmem>>, %arg7: memref<1x128xf32, #tpu.memory_space<vmem>>, %arg8: memref<128x128xf32, #tpu.memory_space<vmem>>, %arg9: memref<1x128xf32, #tpu.memory_space<vmem>>, %arg10: memref<128x128xf32, #tpu.memory_space<vmem>>, %arg11: memref<1x128xf32, #tpu.memory_space<vmem>>, %arg12: memref<128x128xf32, #tpu.memory_space<vmem>>, %arg13: memref<1x128xf32, #tpu.memory_space<vmem>>, %arg14: memref<128x128xf32, #tpu.memory_space<vmem>>, %arg15: memref<1x128xf32, #tpu.memory_space<vmem>>, %arg16: memref<128x128xf32, #tpu.memory_space<vmem>>, %arg17: memref<1x128xf32, #tpu.memory_space<vmem>>, %arg18: memref<104x128xf32, #tpu.memory_space<vmem>>, %arg19: memref<104x128xf32, #tpu.memory_space<vmem>>) attributes {dimension_semantics = [#tpu.dimension_semantics<parallel>], iteration_bounds = array<i64: 2>, scalar_prefetch = 0 : i64, scratch_operands = 0 : i64, tpu.core_type = #tpu.core_type<tc>, window_params = [{transform_indices = @transform_0, window_bounds = array<i64: 104, 128>}, {pipeline_mode = #tpu.pipeline_mode<synchronous>, transform_indices = @transform_1, window_bounds = array<i64: 128, 128>}, {pipeline_mode = #tpu.pipeline_mode<synchronous>, transform_indices = @transform_2, window_bounds = array<i64: 1, 128>}, {pipeline_mode = #tpu.pipeline_mode<synchronous>, transform_indices = @transform_3, window_bounds = array<i64: 128, 128>}, {pipeline_mode = #tpu.pipeline_mode<synchronous>, transform_indices = @transform_4, window_bounds = array<i64: 1, 128>}, {pipeline_mode = #tpu.pipeline_mode<synchronous>, transform_indices = @transform_5, window_bounds = array<i64: 128, 128>}, {pipeline_mode = #tpu.pipeline_mode<synchronous>, transform_indices = @transform_6, window_bounds = array<i64: 1, 128>}, {pipeline_mode = #tpu.pipeline_mode<synchronous>, transform_indices = @transform_7, window_bounds = array<i64: 128, 128>}, {pipeline_mode = #tpu.pipeline_mode<synchronous>, transform_indices = @transform_8, window_bounds = array<i64: 1, 128>}, {pipeline_mode = #tpu.pipeline_mode<synchronous>, transform_indices = @transform_9, window_bounds = array<i64: 128, 128>}, {pipeline_mode = #tpu.pipeline_mode<synchronous>, transform_indices = @transform_10, window_bounds = array<i64: 1, 128>}, {pipeline_mode = #tpu.pipeline_mode<synchronous>, transform_indices = @transform_11, window_bounds = array<i64: 128, 128>}, {pipeline_mode = #tpu.pipeline_mode<synchronous>, transform_indices = @transform_12, window_bounds = array<i64: 1, 128>}, {pipeline_mode = #tpu.pipeline_mode<synchronous>, transform_indices = @transform_13, window_bounds = array<i64: 128, 128>}, {pipeline_mode = #tpu.pipeline_mode<synchronous>, transform_indices = @transform_14, window_bounds = array<i64: 1, 128>}, {pipeline_mode = #tpu.pipeline_mode<synchronous>, transform_indices = @transform_15, window_bounds = array<i64: 128, 128>}, {pipeline_mode = #tpu.pipeline_mode<synchronous>, transform_indices = @transform_16, window_bounds = array<i64: 1, 128>}, {transform_indices = @transform_17, window_bounds = array<i64: 104, 128>}, {transform_indices = @transform_18, window_bounds = array<i64: 104, 128>}]} {
    %c0 = arith.constant 0 : index
    %c0_0 = arith.constant 0 : index
    %0 = vector.load %arg1[%c0, %c0_0] : memref<104x128xf32, #tpu.memory_space<vmem>>, vector<104x128xf32>
    %c0_1 = arith.constant 0 : index
    %c0_2 = arith.constant 0 : index
    %1 = vector.load %arg2[%c0_1, %c0_2] : memref<128x128xf32, #tpu.memory_space<vmem>>, vector<128x128xf32>
    %cst = arith.constant dense<0.000000e+00> : vector<104x128xf32>
    %2 = tpu.matmul %0, %1, %cst {dimension_numbers = #tpu.dot_dimension_numbers<[1], [0], [0], [1], [0, 0, 1, 1], [], []>} : vector<104x128xf32>, vector<128x128xf32>, vector<104x128xf32> -> vector<104x128xf32>
    %c0_3 = arith.constant 0 : index
    %c0_4 = arith.constant 0 : index
    %3 = vector.load %arg3[%c0_3, %c0_4] : memref<1x128xf32, #tpu.memory_space<vmem>>, vector<1x128xf32>
    %4 = vector.broadcast %3 : vector<1x128xf32> to vector<104x128xf32>
    %5 = arith.addf %2, %4 : vector<104x128xf32>
    %cst_5 = arith.constant 0.000000e+00 : f32
    %6 = vector.broadcast %cst_5 : f32 to vector<104x128xf32>
    %7 = arith.maximumf %5, %6 : vector<104x128xf32>
    %c0_6 = arith.constant 0 : index
    %c0_7 = arith.constant 0 : index
    %8 = vector.load %arg4[%c0_6, %c0_7] : memref<128x128xf32, #tpu.memory_space<vmem>>, vector<128x128xf32>
    %cst_8 = arith.constant dense<0.000000e+00> : vector<104x128xf32>
    %9 = tpu.matmul %7, %8, %cst_8 {dimension_numbers = #tpu.dot_dimension_numbers<[1], [0], [0], [1], [0, 0, 1, 1], [], []>} : vector<104x128xf32>, vector<128x128xf32>, vector<104x128xf32> -> vector<104x128xf32>
    %c0_9 = arith.constant 0 : index
    %c0_10 = arith.constant 0 : index
    %10 = vector.load %arg5[%c0_9, %c0_10] : memref<1x128xf32, #tpu.memory_space<vmem>>, vector<1x128xf32>
    %11 = vector.broadcast %10 : vector<1x128xf32> to vector<104x128xf32>
    %12 = arith.addf %9, %11 : vector<104x128xf32>
    %cst_11 = arith.constant 0.000000e+00 : f32
    %13 = vector.broadcast %cst_11 : f32 to vector<104x128xf32>
    %14 = arith.maximumf %12, %13 : vector<104x128xf32>
    %c0_12 = arith.constant 0 : index
    %c0_13 = arith.constant 0 : index
    %15 = vector.load %arg6[%c0_12, %c0_13] : memref<128x128xf32, #tpu.memory_space<vmem>>, vector<128x128xf32>
    %cst_14 = arith.constant dense<0.000000e+00> : vector<104x128xf32>
    %16 = tpu.matmul %14, %15, %cst_14 {dimension_numbers = #tpu.dot_dimension_numbers<[1], [0], [0], [1], [0, 0, 1, 1], [], []>} : vector<104x128xf32>, vector<128x128xf32>, vector<104x128xf32> -> vector<104x128xf32>
    %c0_15 = arith.constant 0 : index
    %c0_16 = arith.constant 0 : index
    %17 = vector.load %arg7[%c0_15, %c0_16] : memref<1x128xf32, #tpu.memory_space<vmem>>, vector<1x128xf32>
    %18 = vector.broadcast %17 : vector<1x128xf32> to vector<104x128xf32>
    %19 = arith.addf %16, %18 : vector<104x128xf32>
    %cst_17 = arith.constant 0.000000e+00 : f32
    %20 = vector.broadcast %cst_17 : f32 to vector<104x128xf32>
    %21 = arith.maximumf %19, %20 : vector<104x128xf32>
    %c0_18 = arith.constant 0 : index
    %c0_19 = arith.constant 0 : index
    %22 = vector.load %arg8[%c0_18, %c0_19] : memref<128x128xf32, #tpu.memory_space<vmem>>, vector<128x128xf32>
    %cst_20 = arith.constant dense<0.000000e+00> : vector<104x128xf32>
    %23 = tpu.matmul %21, %22, %cst_20 {dimension_numbers = #tpu.dot_dimension_numbers<[1], [0], [0], [1], [0, 0, 1, 1], [], []>} : vector<104x128xf32>, vector<128x128xf32>, vector<104x128xf32> -> vector<104x128xf32>
    %c0_21 = arith.constant 0 : index
    %c0_22 = arith.constant 0 : index
    %24 = vector.load %arg9[%c0_21, %c0_22] : memref<1x128xf32, #tpu.memory_space<vmem>>, vector<1x128xf32>
    %25 = vector.broadcast %24 : vector<1x128xf32> to vector<104x128xf32>
    %26 = arith.addf %23, %25 : vector<104x128xf32>
    %c0_23 = arith.constant 0 : index
    %c0_24 = arith.constant 0 : index
    %27 = vector.load %arg19[%c0_23, %c0_24] : memref<104x128xf32, #tpu.memory_space<vmem>>, vector<104x128xf32>
    tpu.vector_store %arg19[%c0_23, %c0_24], %26 {strides = array<i32>} : memref<104x128xf32, #tpu.memory_space<vmem>>, vector<104x128xf32>,
    %c0_25 = arith.constant 0 : index
    %c0_26 = arith.constant 0 : index
    %28 = vector.load %arg10[%c0_25, %c0_26] : memref<128x128xf32, #tpu.memory_space<vmem>>, vector<128x128xf32>
    %cst_27 = arith.constant dense<0.000000e+00> : vector<104x128xf32>
    %29 = tpu.matmul %26, %28, %cst_27 {dimension_numbers = #tpu.dot_dimension_numbers<[1], [0], [0], [1], [0, 0, 1, 1], [], []>} : vector<104x128xf32>, vector<128x128xf32>, vector<104x128xf32> -> vector<104x128xf32>
    %c0_28 = arith.constant 0 : index
    %c0_29 = arith.constant 0 : index
    %30 = vector.load %arg11[%c0_28, %c0_29] : memref<1x128xf32, #tpu.memory_space<vmem>>, vector<1x128xf32>
    %31 = vector.broadcast %30 : vector<1x128xf32> to vector<104x128xf32>
    %32 = arith.addf %29, %31 : vector<104x128xf32>
    %cst_30 = arith.constant 0.000000e+00 : f32
    %33 = vector.broadcast %cst_30 : f32 to vector<104x128xf32>
    %34 = arith.maximumf %32, %33 : vector<104x128xf32>
    %c0_31 = arith.constant 0 : index
    %c0_32 = arith.constant 0 : index
    %35 = vector.load %arg12[%c0_31, %c0_32] : memref<128x128xf32, #tpu.memory_space<vmem>>, vector<128x128xf32>
    %cst_33 = arith.constant dense<0.000000e+00> : vector<104x128xf32>
    %36 = tpu.matmul %34, %35, %cst_33 {dimension_numbers = #tpu.dot_dimension_numbers<[1], [0], [0], [1], [0, 0, 1, 1], [], []>} : vector<104x128xf32>, vector<128x128xf32>, vector<104x128xf32> -> vector<104x128xf32>
    %c0_34 = arith.constant 0 : index
    %c0_35 = arith.constant 0 : index
    %37 = vector.load %arg13[%c0_34, %c0_35] : memref<1x128xf32, #tpu.memory_space<vmem>>, vector<1x128xf32>
    %38 = vector.broadcast %37 : vector<1x128xf32> to vector<104x128xf32>
    %39 = arith.addf %36, %38 : vector<104x128xf32>
    %cst_36 = arith.constant 0.000000e+00 : f32
    %40 = vector.broadcast %cst_36 : f32 to vector<104x128xf32>
    %41 = arith.maximumf %39, %40 : vector<104x128xf32>
    %c0_37 = arith.constant 0 : index
    %c0_38 = arith.constant 0 : index
    %42 = vector.load %arg14[%c0_37, %c0_38] : memref<128x128xf32, #tpu.memory_space<vmem>>, vector<128x128xf32>
    %cst_39 = arith.constant dense<0.000000e+00> : vector<104x128xf32>
    %43 = tpu.matmul %41, %42, %cst_39 {dimension_numbers = #tpu.dot_dimension_numbers<[1], [0], [0], [1], [0, 0, 1, 1], [], []>} : vector<104x128xf32>, vector<128x128xf32>, vector<104x128xf32> -> vector<104x128xf32>
    %c0_40 = arith.constant 0 : index
    %c0_41 = arith.constant 0 : index
    %44 = vector.load %arg15[%c0_40, %c0_41] : memref<1x128xf32, #tpu.memory_space<vmem>>, vector<1x128xf32>
    %45 = vector.broadcast %44 : vector<1x128xf32> to vector<104x128xf32>
    %46 = arith.addf %43, %45 : vector<104x128xf32>
    %cst_42 = arith.constant 0.000000e+00 : f32
    %47 = vector.broadcast %cst_42 : f32 to vector<104x128xf32>
    %48 = arith.maximumf %46, %47 : vector<104x128xf32>
    %c0_43 = arith.constant 0 : index
    %c0_44 = arith.constant 0 : index
    %49 = vector.load %arg16[%c0_43, %c0_44] : memref<128x128xf32, #tpu.memory_space<vmem>>, vector<128x128xf32>
    %cst_45 = arith.constant dense<0.000000e+00> : vector<104x128xf32>
    %50 = tpu.matmul %48, %49, %cst_45 {dimension_numbers = #tpu.dot_dimension_numbers<[1], [0], [0], [1], [0, 0, 1, 1], [], []>} : vector<104x128xf32>, vector<128x128xf32>, vector<104x128xf32> -> vector<104x128xf32>
    %c0_46 = arith.constant 0 : index
    %c0_47 = arith.constant 0 : index
    %51 = vector.load %arg17[%c0_46, %c0_47] : memref<1x128xf32, #tpu.memory_space<vmem>>, vector<1x128xf32>
    %52 = vector.broadcast %51 : vector<1x128xf32> to vector<104x128xf32>
    %53 = arith.addf %50, %52 : vector<104x128xf32>
    %c0_48 = arith.constant 0 : index
    %c0_49 = arith.constant 0 : index
    %54 = vector.load %arg18[%c0_48, %c0_49] : memref<104x128xf32, #tpu.memory_space<vmem>>, vector<104x128xf32>
    tpu.vector_store %arg18[%c0_48, %c0_49], %53 {strides = array<i32>} : memref<104x128xf32, #tpu.memory_space<vmem>>, vector<104x128xf32>,
    return
  }
  func.func @transform_0(%arg0: i32) -> (i32, i32) {
    %c0_i32 = arith.constant 0 : i32
    %c0_i32_0 = arith.constant 0 : i32
    return %arg0, %c0_i32 : i32, i32
  }
  func.func @transform_1(%arg0: i32) -> (i32, i32) {
    %c0_i32 = arith.constant 0 : i32
    %c0_i32_0 = arith.constant 0 : i32
    %c0_i32_1 = arith.constant 0 : i32
    return %c0_i32, %c0_i32_0 : i32, i32
  }
  func.func @transform_2(%arg0: i32) -> (i32, i32) {
    %c0_i32 = arith.constant 0 : i32
    %c0_i32_0 = arith.constant 0 : i32
    %c0_i32_1 = arith.constant 0 : i32
    return %c0_i32, %c0_i32_0 : i32, i32
  }
  func.func @transform_3(%arg0: i32) -> (i32, i32) {
    %c0_i32 = arith.constant 0 : i32
    %c0_i32_0 = arith.constant 0 : i32
    %c0_i32_1 = arith.constant 0 : i32
    return %c0_i32, %c0_i32_0 : i32, i32
  }
  func.func @transform_4(%arg0: i32) -> (i32, i32) {
    %c0_i32 = arith.constant 0 : i32
    %c0_i32_0 = arith.constant 0 : i32
    %c0_i32_1 = arith.constant 0 : i32
    return %c0_i32, %c0_i32_0 : i32, i32
  }
  func.func @transform_5(%arg0: i32) -> (i32, i32) {
    %c0_i32 = arith.constant 0 : i32
    %c0_i32_0 = arith.constant 0 : i32
    %c0_i32_1 = arith.constant 0 : i32
    return %c0_i32, %c0_i32_0 : i32, i32
  }
  func.func @transform_6(%arg0: i32) -> (i32, i32) {
    %c0_i32 = arith.constant 0 : i32
    %c0_i32_0 = arith.constant 0 : i32
    %c0_i32_1 = arith.constant 0 : i32
    return %c0_i32, %c0_i32_0 : i32, i32
  }
  func.func @transform_7(%arg0: i32) -> (i32, i32) {
    %c0_i32 = arith.constant 0 : i32
    %c0_i32_0 = arith.constant 0 : i32
    %c0_i32_1 = arith.constant 0 : i32
    return %c0_i32, %c0_i32_0 : i32, i32
  }
  func.func @transform_8(%arg0: i32) -> (i32, i32) {
    %c0_i32 = arith.constant 0 : i32
    %c0_i32_0 = arith.constant 0 : i32
    %c0_i32_1 = arith.constant 0 : i32
    return %c0_i32, %c0_i32_0 : i32, i32
  }
  func.func @transform_9(%arg0: i32) -> (i32, i32) {
    %c0_i32 = arith.constant 0 : i32
    %c0_i32_0 = arith.constant 0 : i32
    %c0_i32_1 = arith.constant 0 : i32
    return %c0_i32, %c0_i32_0 : i32, i32
  }
  func.func @transform_10(%arg0: i32) -> (i32, i32) {
    %c0_i32 = arith.constant 0 : i32
    %c0_i32_0 = arith.constant 0 : i32
    %c0_i32_1 = arith.constant 0 : i32
    return %c0_i32, %c0_i32_0 : i32, i32
  }
  func.func @transform_11(%arg0: i32) -> (i32, i32) {
    %c0_i32 = arith.constant 0 : i32
    %c0_i32_0 = arith.constant 0 : i32
    %c0_i32_1 = arith.constant 0 : i32
    return %c0_i32, %c0_i32_0 : i32, i32
  }
  func.func @transform_12(%arg0: i32) -> (i32, i32) {
    %c0_i32 = arith.constant 0 : i32
    %c0_i32_0 = arith.constant 0 : i32
    %c0_i32_1 = arith.constant 0 : i32
    return %c0_i32, %c0_i32_0 : i32, i32
  }
  func.func @transform_13(%arg0: i32) -> (i32, i32) {
    %c0_i32 = arith.constant 0 : i32
    %c0_i32_0 = arith.constant 0 : i32
    %c0_i32_1 = arith.constant 0 : i32
    return %c0_i32, %c0_i32_0 : i32, i32
  }
  func.func @transform_14(%arg0: i32) -> (i32, i32) {
    %c0_i32 = arith.constant 0 : i32
    %c0_i32_0 = arith.constant 0 : i32
    %c0_i32_1 = arith.constant 0 : i32
    return %c0_i32, %c0_i32_0 : i32, i32
  }
  func.func @transform_15(%arg0: i32) -> (i32, i32) {
    %c0_i32 = arith.constant 0 : i32
    %c0_i32_0 = arith.constant 0 : i32
    %c0_i32_1 = arith.constant 0 : i32
    return %c0_i32, %c0_i32_0 : i32, i32
  }
  func.func @transform_16(%arg0: i32) -> (i32, i32) {
    %c0_i32 = arith.constant 0 : i32
    %c0_i32_0 = arith.constant 0 : i32
    %c0_i32_1 = arith.constant 0 : i32
    return %c0_i32, %c0_i32_0 : i32, i32
  }
  func.func @transform_17(%arg0: i32) -> (i32, i32) {
    %c0_i32 = arith.constant 0 : i32
    %c0_i32_0 = arith.constant 0 : i32
    return %arg0, %c0_i32 : i32, i32
  }
  func.func @transform_18(%arg0: i32) -> (i32, i32) {
    %c0_i32 = arith.constant 0 : i32
    %c0_i32_0 = arith.constant 0 : i32
    return %arg0, %c0_i32 : i32, i32
  }
}

</mosaic_0001>

<bundles_post_ra>
// kernel: ae_forward.1
= control target key start
LH: loop header
LB: loop body
LE: loop exit
PB: predicated region body
PF: predicated region fallthrough
CT: control target
= control target key end

     0   :  { %s4000_s0 = inlined_call_operand.vmem [shape: f32[208,128], index: 0, kind: input, shape index: {}]   ;;  %s4001_s1 = inlined_call_operand.hbm [shape: f32[128,128], index: 1, kind: input, shape index: {}]   ;;  %s4002_s2 = inlined_call_operand.vmem [shape: f32[1,128], index: 2, kind: input, shape index: {}]   ;;  %s4003_s3 = inlined_call_operand.hbm [shape: f32[128,128], index: 3, kind: input, shape index: {}]   ;;  %s4004_s4 = inlined_call_operand.vmem [shape: f32[1,128], index: 4, kind: input, shape index: {}]   ;;  %s4005_s5 = inlined_call_operand.hbm [shape: f32[128,128], index: 5, kind: input, shape index: {}]   ;;  %s4006_s6 = inlined_call_operand.vmem [shape: f32[1,128], index: 6, kind: input, shape index: {}]   ;;  %s4007_s7 = inlined_call_operand.vmem [shape: f32[128,128], index: 7, kind: input, shape index: {}]   ;;  %s4008_s8 = inlined_call_operand.vmem [shape: f32[1,128], index: 8, kind: input, shape index: {}]   ;;  %s4009_s9 = inlined_call_operand.vmem [shape: f32[128,128], index: 9, kind: input, shape index: {}]   ;;  %s4010_s10 = inlined_call_operand.vmem [shape: f32[1,128], index: 10, kind: input, shape index: {}]   ;;  %s4011_s11 = inlined_call_operand.vmem [shape: f32[128,128], index: 11, kind: input, shape index: {}]   ;;  %s4012_s12 = inlined_call_operand.vmem [shape: f32[1,128], index: 12, kind: input, shape index: {}]   ;;  %s4013_s13 = inlined_call_operand.vmem [shape: f32[128,128], index: 13, kind: input, shape index: {}]   ;;  %s4014_s14 = inlined_call_operand.vmem [shape: f32[1,128], index: 14, kind: input, shape index: {}]   ;;  %s4015_s15 = inlined_call_operand.vmem [shape: f32[128,128], index: 15, kind: input, shape index: {}]   ;;  %s4016_s16 = inlined_call_operand.vmem [shape: f32[1,128], index: 16, kind: input, shape index: {}]   ;;  %s4017_s17 = inlined_call_operand.vmem [shape: f32[208,128], index: 17, kind: output, shape index: {0}]   ;;  %s4018_s18 = inlined_call_operand.vmem [shape: f32[208,128], index: 18, kind: output, shape index: {1}]  }
   0x1   :  { %4020 = sst [smem:[#allocation9_spill]] %s4000_s0 }
   0x2   :  { %4021 = sst [smem:[#allocation10_spill]] %s4001_s1 }
   0x3   :  { %4022 = sst [smem:[#allocation11_spill]] %s4002_s2 }
   0x4   :  { %24 = vsyncpa [#allocation3], 0 }
   0x5   :  { %25 = vsyncpa [#allocation5], 0  ;;  %s3162_s27 = smov 0  }
   0x6 LB: > { %s4019_s28 = sadd.s32 4294967295, %s3058_s27   ;;  %p2101_p0 = scmp.ge.s32.totalorder %s3058_s27, 1  ;;  %s3058_s27 = sphi %s3162_s27, %s31_s27  }
   0x7   : > { %p450_p1 = scmp.lt.s32.totalorder %s3058_s27, 3  ;;  %p3172_p2 = scmp.eq.s32.totalorder %s4019_s28, 0 }
   0x8   : > { %s3060_s0 = smov [#allocation4]   ;;  %s3061_s1 = smov [#allocation2]  }
   0x9   : > { %p3176_p3 = pnand %p2101_p0, %p450_p1  ;;  %s478_s19 = sshll.u32 %s3060_s0, 4  ;;  %s479_s19 = int_to_ptr.vmem [resolvable:$true] %s478_s19 }
   0xa   : > { %s462_s20 = sshll.u32 %s3061_s1, 4  ;;  %s3062_s22 = smov [#allocation6]   ;;  %s463_s20 = int_to_ptr.vmem [resolvable:$true] %s462_s20 }
   0xb   : > { %p2935_p4 = pneg %p3176_p3  ;;  %s494_s2 = sshll.u32 %s3062_s22, 4  ;;  %s3188_s2 = int_to_ptr.vmem [resolvable:$true] %s494_s2 }
   0xc   : > { %s2977_s23 = scalar_lea.vmem %s479_s19, 2048  ;;  %p2985_p10 = scmp.lt.s32.totalorder %s479_s19, %s479_s19 }
   0xd   : > { %p3184_p5 = pnand %p3172_p2, %p2935_p4  ;;  %p2978_p7 = scmp.ne.s32.totalorder %s479_s19, %s2977_s23 }
   0xe   : > { %p2986_p11 = scmp.lt.s32.totalorder %s2977_s23, %s2977_s23 }
   0xf   : > { %p2968_p6 = pneg %p3184_p5 }
  0x10   : > { %p2987_p12 = por %p2986_p11, %p2985_p10 }
  0x11   : > { %p2980_p8 = pnand %p2978_p7, %p2968_p6 }
  0x13   : > { %p2981_p9 = pneg %p2980_p8 }
  0x15   : > { %p2988_p13 = pnand %p2987_p12, %p2981_p9 }
  0x17   : > { %2991 = shalt.err (!%p2988_p13)
}
  0x18   : > { %s3063_s24 = smov 128   ;;  %s3064_s25 = smov 8  }
  0x19   : > { %2941 = dma.hbm_to_vmem [thread:$0]  (!%p3184_p5), %s4003_s3, 2048, %s479_s19, [#allocation5], %s3063_s24, %s3063_s24, %s3064_s25  }
  0x1a   : > { %s3003_s1 = scalar_lea.vmem %s463_s20, 2048  ;;  %p3011_p7 = scmp.lt.s32.totalorder %s463_s20, %s463_s20 }
  0x1b   : > { %p3004_p0 = scmp.ne.s32.totalorder %s463_s20, %s3003_s1  ;;  %p3012_p8 = scmp.lt.s32.totalorder %s3003_s1, %s3003_s1 }
  0x1d   : > { %p3006_p1 = pnand %p3004_p0, %p2968_p6  ;;  %p3013_p10 = por %p3012_p8, %p3011_p7 }
  0x1f   : > { %p3007_p4 = pneg %p3006_p1 }
  0x21   : > { %p3014_p9 = pnand %p3013_p10, %p3007_p4 }
  0x23   : > { %3017 = shalt.err (!%p3014_p9)
}
  0x24   : > { %s4026_s28 = sld [smem:[#allocation10_spill]]  ;;  %s3029_s19 = scalar_lea.vmem %s3188_s2, 2048 }
  0x25   : > { %p3030_p11 = scmp.ne.s32.totalorder %s3188_s2, %s3029_s19  ;;  %p3037_p0 = scmp.lt.s32.totalorder %s3188_s2, %s3188_s2 }
  0x26   : > { %p3038_p1 = scmp.lt.s32.totalorder %s3029_s19, %s3029_s19 }
  0x27   : > { %p3032_p12 = pnand %p3030_p11, %p2968_p6 }
  0x28   : > { %p3039_p4 = por %p3038_p1, %p3037_p0 }
  0x29   : > { %p3033_p13 = pneg %p3032_p12 }
  0x2a   : > { %2938 = dma.hbm_to_vmem [thread:$0]  (!%p3184_p5), %s4026_s28, 2048, %s463_s20, [#allocation3], %s3063_s24, %s3063_s24, %s3064_s25  }
  0x2b   : > { %p3040_p7 = pnand %p3039_p4, %p3033_p13 }
  0x2d   : > { %3043 = shalt.err (!%p3040_p7)
}
  0x2e   : > { %2944 = dma.hbm_to_vmem [thread:$0]  (!%p3184_p5), %s4005_s5, 2048, %s3188_s2, [#allocation5], %s3063_s24, %s3063_s24, %s3064_s25  }
  0x2f   : > { %552 = sbr.rel (%p3176_p3) target bundleno = 1710 (0x6ae), region = 88 }
  0x34   : > { %3049 = dma.done.wait (%p3172_p2), [#allocation3], 2048  }
  0x35   : > { %3051 = vsyncadd (%p3172_p2), [#allocation3], 4294965248 }
  0x36   : > { %3053 = dma.done.wait (%p3172_p2), [#allocation5], 4096  }
  0x37   : > { %3055 = vsyncadd (%p3172_p2), [#allocation5], 4294963200  ;;  %v3065_v0 = vmov 0.0   ;;  %vm3066_vm0 = vmmov 0   ;;  %v665_v1 = vld [vmem:[#allocation2 + $0x78] sm:$0xff]  ;;  %v664_v2 = vld [vmem:[#allocation2 + $0x70] sm:$0xff] }
  0x38   : > { %2355 = vmatprep.subr.mxu0 %v3065_v0  ;;  %2387 = vmatprep.mubr.msk.f32.mxu0 %vm3066_vm0, %v3065_v0  ;;  %v663_v3 = vld [vmem:[#allocation2 + $0x68] sm:$0xff]  ;;  %v662_v4 = vld [vmem:[#allocation2 + $0x60] sm:$0xff]  ;;  %v661_v5 = vld [vmem:[#allocation2 + $0x58] sm:$0xff]  ;;  %s4027_s28 = sadd.s32 4294967295, %s3058_s27   ;;  %s4028_s2 = sld [smem:[#allocation9_spill]] }
  0x39   : > { %2426 = vmatprep.subr.mxu1 %v3065_v0  ;;  %2458 = vmatprep.mubr.msk.f32.mxu1 %vm3066_vm0, %v3065_v0  ;;  %v660_v6 = vld [vmem:[#allocation2 + $0x50] sm:$0xff]  ;;  %v831_v7 = vld [vmem:[#allocation4 + $0x78] sm:$0xff]  ;;  %v659_v8 = vld [vmem:[#allocation2 + $0x48] sm:$0xff]  ;;  %s619_s29 = smul.u32 13, %s4027_s28  ;;  %s4029_s22 = sld [smem:[#allocation11_spill]] }
  0x3a   : > { %2356 = vmatpush3.msra.mxu0 %v665_v1  ;;  %2427 = vmatpush3.msra.mxu1 %v831_v7  ;;  %v830_v9 = vld [vmem:[#allocation4 + $0x70] sm:$0xff]  ;;  %v829_v10 = vld [vmem:[#allocation4 + $0x68] sm:$0xff]  ;;  %v658_v11 = vld [vmem:[#allocation2 + $0x40] sm:$0xff] }
  0x3b   : > { %2357 = vmatprep.subr.mxu0 %v3065_v0  ;;  %2428 = vmatprep.subr.mxu1 %v3065_v0  ;;  %v828_v12 = vld [vmem:[#allocation4 + $0x60] sm:$0xff]  ;;  %v657_v13 = vld [vmem:[#allocation2 + $0x38] sm:$0xff]  ;;  %p620_p2 = scmp.lt.s32.totalorder %s619_s29, 25  ;;  %v656_v15 = vld [vmem:[#allocation2 + $0x30] sm:$0xff] }
  0x3c   : > { %2358 = vmatpush3.msra.mxu0 %v664_v2  ;;  %2429 = vmatpush3.msra.mxu1 %v830_v9  ;;  %v827_v14 = vld [vmem:[#allocation4 + $0x58] sm:$0xff]  ;;  %v826_v16 = vld [vmem:[#allocation4 + $0x50] sm:$0xff]  ;;  %v655_v17 = vld [vmem:[#allocation2 + $0x28] sm:$0xff] }
  0x3d   : > { %2359 = vmatprep.subr.mxu0 %v3065_v0  ;;  %2430 = vmatprep.subr.mxu1 %v3065_v0  ;;  %s4031_s29 = smov (!%p620_p2, %s619_s29), 25  ;;  %v825_v18 = vld [vmem:[#allocation4 + $0x48] sm:$0xff]  ;;  %v654_v19 = vld [vmem:[#allocation2 + $0x20] sm:$0xff]  ;;  %v653_v21 = vld [vmem:[#allocation2 + $0x18] sm:$0xff] }
  0x3e   : > { %2360 = vmatpush3.msra.mxu0 %v663_v3  ;;  %2431 = vmatpush3.msra.mxu1 %v829_v10  ;;  %v824_v20 = vld [vmem:[#allocation4 + $0x40] sm:$0xff]  ;;  %s3256_s30 = sshll.u32 %s4031_s29, 3  ;;  %v823_v22 = vld [vmem:[#allocation4 + $0x38] sm:$0xff]  ;;  %v652_v23 = vld [vmem:[#allocation2 + $0x10] sm:$0xff] }
  0x3f   : > { %2361 = vmatprep.subr.mxu0 %v3065_v0  ;;  %2432 = vmatprep.subr.mxu1 %v3065_v0  ;;  %v822_v24 = vld [vmem:[#allocation4 + $0x30] sm:$0xff]  ;;  %v651_v25 = vld [vmem:[#allocation2 + $0x8] sm:$0xff]  ;;  %s3266_s24 = scalar_lea.vmem %s4028_s2, %s3256_s30  ;;  %v650_v27 = vld [vmem:[#allocation2] sm:$0xff]  ;;  %s3663_s1 = scalar_lea.vmem %s4018_s18, %s3256_s30 }
  0x40   : > { %2362 = vmatpush3.msra.mxu0 %v662_v4  ;;  %2433 = vmatpush3.msra.mxu1 %v828_v12  ;;  %v821_v26 = vld [vmem:[#allocation4 + $0x28] sm:$0xff]  ;;  %v637_v28 = vld [vmem:[%s3266_s24] sm:$0xff]  ;;  %v819_v30 = vld [vmem:[#allocation4 + $0x18] sm:$0xff]  ;;  %s3982_s25 = scalar_lea.vmem %s4017_s17, %s3256_s30 }
  0x41   : > { %2363 = vmatprep.subr.mxu0 %v3065_v0  ;;  %2434 = vmatprep.subr.mxu1 %v3065_v0  ;;  %v820_v29 = vld [vmem:[#allocation4 + $0x20] sm:$0xff]  ;;  %v638_v31 = vld [vmem:[%s3266_s24 + $0x8] sm:$0xff]  ;;  %v639_v32 = vld [vmem:[%s3266_s24 + $0x10] sm:$0xff] }
  0x42   : > { %2364 = vmatpush3.msra.mxu0 %v661_v5  ;;  %2435 = vmatpush3.msra.mxu1 %v827_v14  ;;  %v640_v33 = vld [vmem:[%s3266_s24 + $0x18] sm:$0xff]  ;;  %v641_v34 = vld [vmem:[%s3266_s24 + $0x20] sm:$0xff]  ;;  %v642_v35 = vld [vmem:[%s3266_s24 + $0x28] sm:$0xff] }
  0x43   : > { %2365 = vmatprep.subr.mxu0 %v3065_v0  ;;  %2436 = vmatprep.subr.mxu1 %v3065_v0  ;;  %v643_v36 = vld [vmem:[%s3266_s24 + $0x30] sm:$0xff]  ;;  %v644_v37 = vld [vmem:[%s3266_s24 + $0x38] sm:$0xff]  ;;  %v645_v38 = vld [vmem:[%s3266_s24 + $0x40] sm:$0xff] }
  0x44   : > { %2366 = vmatpush3.msra.mxu0 %v660_v6  ;;  %2437 = vmatpush3.msra.mxu1 %v826_v16  ;;  %v646_v39 = vld [vmem:[%s3266_s24 + $0x48] sm:$0xff]  ;;  %v647_v40 = vld [vmem:[%s3266_s24 + $0x50] sm:$0xff]  ;;  %v648_v41 = vld [vmem:[%s3266_s24 + $0x58] sm:$0xff] }
  0x45   : > { %2367 = vmatprep.subr.mxu0 %v3065_v0  ;;  %2438 = vmatprep.subr.mxu1 %v3065_v0  ;;  %v649_v42 = vld [vmem:[%s3266_s24 + $0x60] sm:$0xff]  ;;  %v818_v43 = vld [vmem:[#allocation4 + $0x10] sm:$0xff]  ;;  %v817_v44 = vld [vmem:[#allocation4 + $0x8] sm:$0xff] }
  0x46   : > { %2368 = vmatpush3.msra.mxu0 %v659_v8  ;;  %2439 = vmatpush3.msra.mxu1 %v825_v18  ;;  %v816_v45 = vld [vmem:[#allocation4] sm:$0xff]  ;;  %v997_v46 = vld [vmem:[#allocation6 + $0x78] sm:$0xff]  ;;  %v996_v47 = vld [vmem:[#allocation6 + $0x70] sm:$0xff] }
  0x47   : > { %2369 = vmatprep.subr.mxu0 %v3065_v0  ;;  %2440 = vmatprep.subr.mxu1 %v3065_v0  ;;  %v995_v48 = vld [vmem:[#allocation6 + $0x68] sm:$0xff]  ;;  %v994_v49 = vld [vmem:[#allocation6 + $0x60] sm:$0xff]  ;;  %v993_v50 = vld [vmem:[#allocation6 + $0x58] sm:$0xff] }
  0x48   : > { %2370 = vmatpush3.msra.mxu0 %v658_v11  ;;  %2441 = vmatpush3.msra.mxu1 %v824_v20  ;;  %v992_v51 = vld [vmem:[#allocation6 + $0x50] sm:$0xff]  ;;  %v991_v52 = vld [vmem:[#allocation6 + $0x48] sm:$0xff]  ;;  %v990_v53 = vld [vmem:[#allocation6 + $0x40] sm:$0xff] }
  0x49   : > { %2371 = vmatprep.subr.mxu0 %v3065_v0  ;;  %2442 = vmatprep.subr.mxu1 %v3065_v0  ;;  %v989_v54 = vld [vmem:[#allocation6 + $0x38] sm:$0xff]  ;;  %v988_v55 = vld [vmem:[#allocation6 + $0x30] sm:$0xff]  ;;  %v987_v56 = vld [vmem:[#allocation6 + $0x28] sm:$0xff] }
  0x4a   : > { %2372 = vmatpush3.msra.mxu0 %v657_v13  ;;  %2443 = vmatpush3.msra.mxu1 %v823_v22  ;;  %v986_v57 = vld [vmem:[#allocation6 + $0x20] sm:$0xff]  ;;  %v985_v58 = vld [vmem:[#allocation6 + $0x18] sm:$0xff]  ;;  %v984_v59 = vld [vmem:[#allocation6 + $0x10] sm:$0xff] }
  0x4b   : > { %2373 = vmatprep.subr.mxu0 %v3065_v0  ;;  %2444 = vmatprep.subr.mxu1 %v3065_v0  ;;  %v983_v60 = vld [vmem:[#allocation6 + $0x8] sm:$0xff]  ;;  %v3336_v61 = vld [vmem:[%s4029_s22] ss:$0 sm:$0xff] }
  0x4c   : > { %2374 = vmatpush3.msra.mxu0 %v656_v15  ;;  %2445 = vmatpush3.msra.mxu1 %v822_v24 }
  0x4d   : > { %2375 = vmatprep.subr.mxu0 %v3065_v0  ;;  %2446 = vmatprep.subr.mxu1 %v3065_v0 }
  0x4e   : > { %2376 = vmatpush3.msra.mxu0 %v655_v17  ;;  %2447 = vmatpush3.msra.mxu1 %v821_v26 }
  0x4f   : > { %2377 = vmatprep.subr.mxu0 %v3065_v0  ;;  %2448 = vmatprep.subr.mxu1 %v3065_v0 }
  0x50   : > { %2378 = vmatpush3.msra.mxu0 %v654_v19  ;;  %2449 = vmatpush3.msra.mxu1 %v820_v29 }
  0x51   : > { %2379 = vmatprep.subr.mxu0 %v3065_v0  ;;  %2450 = vmatprep.subr.mxu1 %v3065_v0 }
  0x52   : > { %2380 = vmatpush3.msra.mxu0 %v653_v21  ;;  %2451 = vmatpush3.msra.mxu1 %v819_v30 }
  0x53   : > { %2381 = vmatprep.subr.mxu0 %v3065_v0  ;;  %2452 = vmatprep.subr.mxu1 %v3065_v0 }
  0x54   : > { %2382 = vmatpush3.msra.mxu0 %v652_v23  ;;  %2453 = vmatpush3.msra.mxu1 %v818_v43 }
  0x55   : > { %2383 = vmatprep.subr.mxu0 %v3065_v0  ;;  %2454 = vmatprep.subr.mxu1 %v3065_v0 }
  0x56   : > { %2384 = vmatpush3.msra.mxu0 %v651_v25  ;;  %2455 = vmatpush3.msra.mxu1 %v817_v44 }
  0x57   : > { %2385 = vmatprep.subr.mxu0 %v3065_v0  ;;  %2456 = vmatprep.subr.mxu1 %v3065_v0 }
  0x58   : > { %2386 = vmatpush3.msra.mxu0 %v650_v27  ;;  %2457 = vmatpush3.msra.mxu1 %v816_v45 }
  0x59   : > { %2388 = vmatmul.mubr.f32.vlgmr.msra.gmra.mxu0 %v637_v28  ;;  %2497 = vmatprep.subr.mxu0 %v3065_v0 }
  0x5a   : > { %2390 = vmatprep.mubr.msk.f32.mxu0 %vm3066_vm0, %v3065_v0  ;;  %2568 = vmatprep.subr.mxu1 %v3065_v0 }
  0x5b   : > { %2498 = vmatpush3.msra.mxu0 %v997_v46 }
  0x5c   : > { %2499 = vmatprep.subr.mxu0 %v3065_v0 }
  0x5d   : > { %2391 = vmatmul.mubr.f32.gmra.mxu0 %v638_v31 }
  0x5e   : > { %2393 = vmatprep.mubr.msk.f32.mxu0 %vm3066_vm0, %v3065_v0  ;;  %2500 = vmatpush3.msra.mxu0 %v996_v47 }
  0x5f   : > { %2501 = vmatprep.subr.mxu0 %v3065_v0 }
  0x60   : > { %2502 = vmatpush3.msra.mxu0 %v995_v48 }
  0x61   : > { %2394 = vmatmul.mubr.f32.gmra.mxu0 %v639_v32  ;;  %2503 = vmatprep.subr.mxu0 %v3065_v0 }
  0x62   : > { %2396 = vmatprep.mubr.msk.f32.mxu0 %vm3066_vm0, %v3065_v0  ;;  %2504 = vmatpush3.msra.mxu0 %v994_v49 }
  0x63   : > { %2505 = vmatprep.subr.mxu0 %v3065_v0 }
  0x64   : > { %2506 = vmatpush3.msra.mxu0 %v993_v50 }
  0x65   : > { %2397 = vmatmul.mubr.f32.gmra.mxu0 %v640_v33  ;;  %2507 = vmatprep.subr.mxu0 %v3065_v0 }
  0x66   : > { %2399 = vmatprep.mubr.msk.f32.mxu0 %vm3066_vm0, %v3065_v0  ;;  %2508 = vmatpush3.msra.mxu0 %v992_v51  ;;  %v982_v51 = vld [vmem:[#allocation6] sm:$0xff] }
  0x67   : > { %2509 = vmatprep.subr.mxu0 %v3065_v0 }
  0x68   : > { %2510 = vmatpush3.msra.mxu0 %v991_v52  ;;  %v1163_v52 = vld [vmem:[%s4007_s7 + $0x78] sm:$0xff] }
  0x69   : > { %2400 = vmatmul.mubr.f32.gmra.mxu0 %v641_v34  ;;  %2511 = vmatprep.subr.mxu0 %v3065_v0 }
  0x6a   : > { %2402 = vmatprep.mubr.msk.f32.mxu0 %vm3066_vm0, %v3065_v0  ;;  %2512 = vmatpush3.msra.mxu0 %v990_v53  ;;  %v1162_v53 = vld [vmem:[%s4007_s7 + $0x70] sm:$0xff] }
  0x6b   : > { %2513 = vmatprep.subr.mxu0 %v3065_v0 }
  0x6c   : > { %2514 = vmatpush3.msra.mxu0 %v989_v54  ;;  %v1161_v54 = vld [vmem:[%s4007_s7 + $0x68] sm:$0xff] }
  0x6d   : > { %2403 = vmatmul.mubr.f32.gmra.mxu0 %v642_v35  ;;  %2515 = vmatprep.subr.mxu0 %v3065_v0 }
  0x6e   : > { %2405 = vmatprep.mubr.msk.f32.mxu0 %vm3066_vm0, %v3065_v0  ;;  %2516 = vmatpush3.msra.mxu0 %v988_v55  ;;  %v1160_v55 = vld [vmem:[%s4007_s7 + $0x60] sm:$0xff] }
  0x6f   : > { %2517 = vmatprep.subr.mxu0 %v3065_v0 }
  0x70   : > { %2518 = vmatpush3.msra.mxu0 %v987_v56  ;;  %v1159_v56 = vld [vmem:[%s4007_s7 + $0x58] sm:$0xff] }
  0x71   : > { %2406 = vmatmul.mubr.f32.gmra.mxu0 %v643_v36  ;;  %2519 = vmatprep.subr.mxu0 %v3065_v0 }
  0x72   : > { %2408 = vmatprep.mubr.msk.f32.mxu0 %vm3066_vm0, %v3065_v0  ;;  %2520 = vmatpush3.msra.mxu0 %v986_v57  ;;  %v1158_v57 = vld [vmem:[%s4007_s7 + $0x50] sm:$0xff] }
  0x73   : > { %2521 = vmatprep.subr.mxu0 %v3065_v0 }
  0x74   : > { %2522 = vmatpush3.msra.mxu0 %v985_v58  ;;  %v1157_v58 = vld [vmem:[%s4007_s7 + $0x48] sm:$0xff] }
  0x75   : > { %2409 = vmatmul.mubr.f32.gmra.mxu0 %v644_v37  ;;  %2523 = vmatprep.subr.mxu0 %v3065_v0 }
  0x76   : > { %2411 = vmatprep.mubr.msk.f32.mxu0 %vm3066_vm0, %v3065_v0  ;;  %2524 = vmatpush3.msra.mxu0 %v984_v59  ;;  %v1156_v59 = vld [vmem:[%s4007_s7 + $0x40] sm:$0xff] }
  0x77   : > { %2525 = vmatprep.subr.mxu0 %v3065_v0 }
  0x78   : > { %2526 = vmatpush3.msra.mxu0 %v983_v60  ;;  %v1155_v60 = vld [vmem:[%s4007_s7 + $0x38] sm:$0xff] }
  0x79   : > { %2412 = vmatmul.mubr.f32.gmra.mxu0 %v645_v38  ;;  %2527 = vmatprep.subr.mxu0 %v3065_v0 }
  0x7a   : > { %2414 = vmatprep.mubr.msk.f32.mxu0 %vm3066_vm0, %v3065_v0  ;;  %2528 = vmatpush3.msra.mxu0 %v982_v51 }
  0x7b   : > { %2639 = vmatprep.subr.mxu0 %v3065_v0 }
  0x7d   : > { %2415 = vmatmul.mubr.f32.gmra.mxu0 %v646_v39 }
  0x7e   : > { %2417 = vmatprep.mubr.msk.f32.mxu0 %vm3066_vm0, %v3065_v0 }
  0x81   : > { %2418 = vmatmul.mubr.f32.gmra.mxu0 %v647_v40 }
  0x82   : > { %2420 = vmatprep.mubr.msk.f32.mxu0 %vm3066_vm0, %v3065_v0 }
  0x85   : > { %2421 = vmatmul.mubr.f32.gmra.mxu0 %v648_v41 }
  0x86   : > { %2423 = vmatprep.mubr.msk.f32.mxu0 %vm3066_vm0, %v3065_v0 }
  0x89   : > { %2424 = vmatmul.mubr.f32.gmra.mxu0 %v649_v42 }
  0x8a   : > { %2529 = vmatprep.mubr.msk.f32.mxu0 %vm3066_vm0, %v3065_v0 }
 0x119   : > { %v739_v62 = vpop.f32.mrf.mxu0 }
 0x11a   : > { %v740_v63 = vadd.f32 %v3336_v61, %v739_v62  ;;  %v1153_v62 = vld [vmem:[%s4007_s7 + $0x28] sm:$0xff] }
 0x11b   : > { %v2389_v1 = vpop.f32.mrf.mxu0 }
 0x11c   : > { %v803_v2 = vmax.f32 %v740_v63, 0.0  ;;  %v1152_v63 = vld [vmem:[%s4007_s7 + $0x20] sm:$0xff]  ;;  %v1151_v1 = vld [vmem:[%s4007_s7 + $0x18] sm:$0xff] }
 0x11d   : > { %v744_v3 = vpop.f32.mrf.mxu0 }
 0x11e   : > { %v745_v4 = vadd.f32 %v3336_v61, %v744_v3  ;;  %2459 = vmatmul.mubr.f32.vlgmr.msra.gmra.mxu1 %v803_v2  ;;  %v1150_v2 = vld [vmem:[%s4007_s7 + $0x10] sm:$0xff]  ;;  %v1149_v3 = vld [vmem:[%s4007_s7 + $0x8] sm:$0xff] }
 0x11f   : > { %v2392_v5 = vpop.f32.mrf.mxu0  ;;  %2461 = vmatprep.mubr.msk.f32.mxu1 %vm3066_vm0, %v3065_v0  ;;  %2569 = vmatpush3.msra.mxu1 %v1163_v52 }
 0x120   : > { %v804_v6 = vmax.f32 %v745_v4, 0.0  ;;  %2570 = vmatprep.subr.mxu1 %v3065_v0  ;;  %v3441_v4 = vld [vmem:[%s4004_s4] ss:$0 sm:$0xff] }
 0x121   : > { %v749_v7 = vpop.f32.mrf.mxu0  ;;  %2571 = vmatpush3.msra.mxu1 %v1162_v53 }
 0x122   : > { %v750_v8 = vadd.f32 %v3336_v61, %v749_v7  ;;  %2462 = vmatmul.mubr.f32.gmra.mxu1 %v804_v6  ;;  %2572 = vmatprep.subr.mxu1 %v3065_v0 }
 0x123   : > { %v2395_v9 = vpop.f32.mrf.mxu0  ;;  %2464 = vmatprep.mubr.msk.f32.mxu1 %vm3066_vm0, %v3065_v0  ;;  %2573 = vmatpush3.msra.mxu1 %v1161_v54 }
 0x124   : > { %v805_v10 = vmax.f32 %v750_v8, 0.0  ;;  %2574 = vmatprep.subr.mxu1 %v3065_v0 }
 0x125   : > { %v754_v11 = vpop.f32.mrf.mxu0  ;;  %2575 = vmatpush3.msra.mxu1 %v1160_v55 }
 0x126   : > { %v755_v12 = vadd.f32 %v3336_v61, %v754_v11  ;;  %2465 = vmatmul.mubr.f32.gmra.mxu1 %v805_v10  ;;  %2576 = vmatprep.subr.mxu1 %v3065_v0 }
 0x127   : > { %v2398_v13 = vpop.f32.mrf.mxu0  ;;  %2467 = vmatprep.mubr.msk.f32.mxu1 %vm3066_vm0, %v3065_v0  ;;  %2577 = vmatpush3.msra.mxu1 %v1159_v56 }
 0x128   : > { %v806_v14 = vmax.f32 %v755_v12, 0.0  ;;  %2578 = vmatprep.subr.mxu1 %v3065_v0 }
 0x129   : > { %v759_v15 = vpop.f32.mrf.mxu0  ;;  %2579 = vmatpush3.msra.mxu1 %v1158_v57  ;;  %v1148_v57 = vld [vmem:[%s4007_s7] sm:$0xff] }
 0x12a   : > { %v760_v16 = vadd.f32 %v3336_v61, %v759_v15  ;;  %2468 = vmatmul.mubr.f32.gmra.mxu1 %v806_v14  ;;  %2580 = vmatprep.subr.mxu1 %v3065_v0 }
 0x12b   : > { %v2401_v17 = vpop.f32.mrf.mxu0  ;;  %2470 = vmatprep.mubr.msk.f32.mxu1 %vm3066_vm0, %v3065_v0  ;;  %2581 = vmatpush3.msra.mxu1 %v1157_v58  ;;  %v1329_v58 = vld [vmem:[%s4009_s9 + $0x78] sm:$0xff] }
 0x12c   : > { %v807_v18 = vmax.f32 %v760_v16, 0.0  ;;  %2582 = vmatprep.subr.mxu1 %v3065_v0 }
 0x12d   : > { %v764_v19 = vpop.f32.mrf.mxu0  ;;  %2583 = vmatpush3.msra.mxu1 %v1156_v59  ;;  %v1328_v59 = vld [vmem:[%s4009_s9 + $0x70] sm:$0xff] }
 0x12e   : > { %v765_v20 = vadd.f32 %v3336_v61, %v764_v19  ;;  %2471 = vmatmul.mubr.f32.gmra.mxu1 %v807_v18  ;;  %2584 = vmatprep.subr.mxu1 %v3065_v0 }
 0x12f   : > { %v2404_v21 = vpop.f32.mrf.mxu0  ;;  %2473 = vmatprep.mubr.msk.f32.mxu1 %vm3066_vm0, %v3065_v0  ;;  %2585 = vmatpush3.msra.mxu1 %v1155_v60  ;;  %v1327_v60 = vld [vmem:[%s4009_s9 + $0x68] sm:$0xff] }
 0x130   : > { %v808_v22 = vmax.f32 %v765_v20, 0.0  ;;  %2586 = vmatprep.subr.mxu1 %v3065_v0 }
 0x131   : > { %v769_v23 = vpop.f32.mrf.mxu0 }
 0x132   : > { %v770_v24 = vadd.f32 %v3336_v61, %v769_v23  ;;  %2474 = vmatmul.mubr.f32.gmra.mxu1 %v808_v22 }
 0x133   : > { %v2407_v25 = vpop.f32.mrf.mxu0  ;;  %2476 = vmatprep.mubr.msk.f32.mxu1 %vm3066_vm0, %v3065_v0 }
 0x134   : > { %v809_v26 = vmax.f32 %v770_v24, 0.0 }
 0x135   : > { %v774_v27 = vpop.f32.mrf.mxu0 }
 0x136   : > { %v775_v28 = vadd.f32 %v3336_v61, %v774_v27  ;;  %2477 = vmatmul.mubr.f32.gmra.mxu1 %v809_v26 }
 0x137   : > { %v2410_v29 = vpop.f32.mrf.mxu0  ;;  %2479 = vmatprep.mubr.msk.f32.mxu1 %vm3066_vm0, %v3065_v0 }
 0x138   : > { %v810_v30 = vmax.f32 %v775_v28, 0.0 }
 0x139   : > { %v779_v31 = vpop.f32.mrf.mxu0 }
 0x13a   : > { %v780_v32 = vadd.f32 %v3336_v61, %v779_v31  ;;  %2480 = vmatmul.mubr.f32.gmra.mxu1 %v810_v30 }
 0x13b   : > { %v2413_v33 = vpop.f32.mrf.mxu0  ;;  %2482 = vmatprep.mubr.msk.f32.mxu1 %vm3066_vm0, %v3065_v0 }
 0x13c   : > { %v811_v34 = vmax.f32 %v780_v32, 0.0 }
 0x13d   : > { %v784_v35 = vpop.f32.mrf.mxu0 }
 0x13e   : > { %v785_v36 = vadd.f32 %v3336_v61, %v784_v35  ;;  %2483 = vmatmul.mubr.f32.gmra.mxu1 %v811_v34 }
 0x13f   : > { %v2416_v37 = vpop.f32.mrf.mxu0  ;;  %2485 = vmatprep.mubr.msk.f32.mxu1 %vm3066_vm0, %v3065_v0 }
 0x140   : > { %v812_v38 = vmax.f32 %v785_v36, 0.0 }
 0x141   : > { %v789_v39 = vpop.f32.mrf.mxu0 }
 0x142   : > { %v790_v40 = vadd.f32 %v3336_v61, %v789_v39  ;;  %2486 = vmatmul.mubr.f32.gmra.mxu1 %v812_v38 }
 0x143   : > { %v2419_v41 = vpop.f32.mrf.mxu0  ;;  %2488 = vmatprep.mubr.msk.f32.mxu1 %vm3066_vm0, %v3065_v0 }
 0x144   : > { %v813_v42 = vmax.f32 %v790_v40, 0.0 }
 0x145   : > { %v794_v43 = vpop.f32.mrf.mxu0 }
 0x146   : > { %v795_v44 = vadd.f32 %v3336_v61, %v794_v43  ;;  %2489 = vmatmul.mubr.f32.gmra.mxu1 %v813_v42 }
 0x147   : > { %v2422_v45 = vpop.f32.mrf.mxu0  ;;  %2491 = vmatprep.mubr.msk.f32.mxu1 %vm3066_vm0, %v3065_v0 }
 0x148   : > { %v814_v46 = vmax.f32 %v795_v44, 0.0 }
 0x149   : > { %v799_v47 = vpop.f32.mrf.mxu0 }
 0x14a   : > { %v800_v48 = vadd.f32 %v3336_v61, %v799_v47  ;;  %2492 = vmatmul.mubr.f32.gmra.mxu1 %v814_v46  ;;  %v1154_v61 = vld [vmem:[%s4007_s7 + $0x30] sm:$0xff] }
 0x14b   : > { %v2425_v49 = vpop.f32.mrf.mxu0  ;;  %2494 = vmatprep.mubr.msk.f32.mxu1 %vm3066_vm0, %v3065_v0  ;;  %2587 = vmatpush3.msra.mxu1 %v1154_v61  ;;  %v1326_v61 = vld [vmem:[%s4009_s9 + $0x60] sm:$0xff] }
 0x14c   : > { %v815_v50 = vmax.f32 %v800_v48, 0.0  ;;  %2588 = vmatprep.subr.mxu1 %v3065_v0 }
 0x14d   : > { %2589 = vmatpush3.msra.mxu1 %v1153_v62  ;;  %v1325_v62 = vld [vmem:[%s4009_s9 + $0x58] sm:$0xff] }
 0x14e   : > { %2495 = vmatmul.mubr.f32.gmra.mxu1 %v815_v50  ;;  %2590 = vmatprep.subr.mxu1 %v3065_v0 }
 0x14f   : > { %2600 = vmatprep.mubr.msk.f32.mxu1 %vm3066_vm0, %v3065_v0  ;;  %2591 = vmatpush3.msra.mxu1 %v1152_v63  ;;  %v1324_v63 = vld [vmem:[%s4009_s9 + $0x50] sm:$0xff] }
 0x150   : > { %2592 = vmatprep.subr.mxu1 %v3065_v0 }
 0x151   : > { %2593 = vmatpush3.msra.mxu1 %v1151_v1  ;;  %v1323_v1 = vld [vmem:[%s4009_s9 + $0x48] sm:$0xff] }
 0x152   : > { %2594 = vmatprep.subr.mxu1 %v3065_v0 }
 0x153   : > { %2595 = vmatpush3.msra.mxu1 %v1150_v2  ;;  %v1322_v2 = vld [vmem:[%s4009_s9 + $0x40] sm:$0xff] }
 0x154   : > { %2596 = vmatprep.subr.mxu1 %v3065_v0 }
 0x155   : > { %2597 = vmatpush3.msra.mxu1 %v1149_v3  ;;  %v1321_v3 = vld [vmem:[%s4009_s9 + $0x38] sm:$0xff] }
 0x156   : > { %2598 = vmatprep.subr.mxu1 %v3065_v0 }
 0x157   : > { %2599 = vmatpush3.msra.mxu1 %v1148_v57 }
 0x158   : > { %2710 = vmatprep.subr.mxu1 %v3065_v0 }
 0x1de   : > { %v905_v5 = vpop.f32.mrf.mxu1 }
 0x1df   : > { %v906_v6 = vadd.f32 %v3441_v4, %v905_v5  ;;  %v1319_v5 = vld [vmem:[%s4009_s9 + $0x28] sm:$0xff] }
 0x1e0   : > { %v2460_v7 = vpop.f32.mrf.mxu1 }
 0x1e1   : > { %v969_v8 = vmax.f32 %v906_v6, 0.0  ;;  %v1318_v6 = vld [vmem:[%s4009_s9 + $0x20] sm:$0xff]  ;;  %v1317_v7 = vld [vmem:[%s4009_s9 + $0x18] sm:$0xff] }
 0x1e2   : > { %v910_v9 = vpop.f32.mrf.mxu1 }
 0x1e3   : > { %v911_v10 = vadd.f32 %v3441_v4, %v910_v9  ;;  %2530 = vmatmul.mubr.f32.vlgmr.msra.gmra.mxu0 %v969_v8  ;;  %v1316_v8 = vld [vmem:[%s4009_s9 + $0x10] sm:$0xff]  ;;  %v1315_v9 = vld [vmem:[%s4009_s9 + $0x8] sm:$0xff] }
 0x1e4   : > { %v2463_v11 = vpop.f32.mrf.mxu1  ;;  %2532 = vmatprep.mubr.msk.f32.mxu0 %vm3066_vm0, %v3065_v0  ;;  %2640 = vmatpush3.msra.mxu0 %v1329_v58 }
 0x1e5   : > { %v970_v12 = vmax.f32 %v911_v10, 0.0  ;;  %2641 = vmatprep.subr.mxu0 %v3065_v0  ;;  %v3549_v10 = vld [vmem:[%s4006_s6] ss:$0 sm:$0xff] }
 0x1e6   : > { %v915_v13 = vpop.f32.mrf.mxu1  ;;  %2642 = vmatpush3.msra.mxu0 %v1328_v59 }
 0x1e7   : > { %v916_v14 = vadd.f32 %v3441_v4, %v915_v13  ;;  %2533 = vmatmul.mubr.f32.gmra.mxu0 %v970_v12  ;;  %2643 = vmatprep.subr.mxu0 %v3065_v0 }
 0x1e8   : > { %v2466_v15 = vpop.f32.mrf.mxu1  ;;  %2535 = vmatprep.mubr.msk.f32.mxu0 %vm3066_vm0, %v3065_v0  ;;  %2644 = vmatpush3.msra.mxu0 %v1327_v60 }
 0x1e9   : > { %v971_v16 = vmax.f32 %v916_v14, 0.0  ;;  %2645 = vmatprep.subr.mxu0 %v3065_v0 }
 0x1ea   : > { %v920_v17 = vpop.f32.mrf.mxu1  ;;  %2646 = vmatpush3.msra.mxu0 %v1326_v61 }
 0x1eb   : > { %v921_v18 = vadd.f32 %v3441_v4, %v920_v17  ;;  %2536 = vmatmul.mubr.f32.gmra.mxu0 %v971_v16  ;;  %2647 = vmatprep.subr.mxu0 %v3065_v0 }
 0x1ec   : > { %v2469_v19 = vpop.f32.mrf.mxu1  ;;  %2538 = vmatprep.mubr.msk.f32.mxu0 %vm3066_vm0, %v3065_v0  ;;  %2648 = vmatpush3.msra.mxu0 %v1325_v62 }
 0x1ed   : > { %v972_v20 = vmax.f32 %v921_v18, 0.0  ;;  %2649 = vmatprep.subr.mxu0 %v3065_v0 }
 0x1ee   : > { %v925_v21 = vpop.f32.mrf.mxu1  ;;  %2650 = vmatpush3.msra.mxu0 %v1324_v63  ;;  %v1314_v63 = vld [vmem:[%s4009_s9] sm:$0xff] }
 0x1ef   : > { %v926_v22 = vadd.f32 %v3441_v4, %v925_v21  ;;  %2539 = vmatmul.mubr.f32.gmra.mxu0 %v972_v20  ;;  %2651 = vmatprep.subr.mxu0 %v3065_v0 }
 0x1f0   : > { %v2472_v23 = vpop.f32.mrf.mxu1  ;;  %2541 = vmatprep.mubr.msk.f32.mxu0 %vm3066_vm0, %v3065_v0  ;;  %2652 = vmatpush3.msra.mxu0 %v1323_v1  ;;  %v1495_v1 = vld [vmem:[%s4011_s11 + $0x78] sm:$0xff] }
 0x1f1   : > { %v973_v24 = vmax.f32 %v926_v22, 0.0  ;;  %2653 = vmatprep.subr.mxu0 %v3065_v0 }
 0x1f2   : > { %v930_v25 = vpop.f32.mrf.mxu1  ;;  %2654 = vmatpush3.msra.mxu0 %v1322_v2  ;;  %v1494_v2 = vld [vmem:[%s4011_s11 + $0x70] sm:$0xff] }
 0x1f3   : > { %v931_v26 = vadd.f32 %v3441_v4, %v930_v25  ;;  %2542 = vmatmul.mubr.f32.gmra.mxu0 %v973_v24  ;;  %2655 = vmatprep.subr.mxu0 %v3065_v0 }
 0x1f4   : > { %v2475_v27 = vpop.f32.mrf.mxu1  ;;  %2544 = vmatprep.mubr.msk.f32.mxu0 %vm3066_vm0, %v3065_v0  ;;  %2656 = vmatpush3.msra.mxu0 %v1321_v3  ;;  %v1493_v3 = vld [vmem:[%s4011_s11 + $0x68] sm:$0xff] }
 0x1f5   : > { %v974_v28 = vmax.f32 %v931_v26, 0.0  ;;  %2657 = vmatprep.subr.mxu0 %v3065_v0 }
 0x1f6   : > { %v935_v29 = vpop.f32.mrf.mxu1 }
 0x1f7   : > { %v936_v30 = vadd.f32 %v3441_v4, %v935_v29  ;;  %2545 = vmatmul.mubr.f32.gmra.mxu0 %v974_v28 }
 0x1f8   : > { %v2478_v31 = vpop.f32.mrf.mxu1  ;;  %2547 = vmatprep.mubr.msk.f32.mxu0 %vm3066_vm0, %v3065_v0 }
 0x1f9   : > { %v975_v32 = vmax.f32 %v936_v30, 0.0 }
 0x1fa   : > { %v940_v33 = vpop.f32.mrf.mxu1 }
 0x1fb   : > { %v941_v34 = vadd.f32 %v3441_v4, %v940_v33  ;;  %2548 = vmatmul.mubr.f32.gmra.mxu0 %v975_v32 }
 0x1fc   : > { %v2481_v35 = vpop.f32.mrf.mxu1  ;;  %2550 = vmatprep.mubr.msk.f32.mxu0 %vm3066_vm0, %v3065_v0 }
 0x1fd   : > { %v976_v36 = vmax.f32 %v941_v34, 0.0 }
 0x1fe   : > { %v945_v37 = vpop.f32.mrf.mxu1 }
 0x1ff   : > { %v946_v38 = vadd.f32 %v3441_v4, %v945_v37  ;;  %2551 = vmatmul.mubr.f32.gmra.mxu0 %v976_v36 }
 0x200   : > { %v2484_v39 = vpop.f32.mrf.mxu1  ;;  %2553 = vmatprep.mubr.msk.f32.mxu0 %vm3066_vm0, %v3065_v0 }
 0x201   : > { %v977_v40 = vmax.f32 %v946_v38, 0.0 }
 0x202   : > { %v950_v41 = vpop.f32.mrf.mxu1 }
 0x203   : > { %v951_v42 = vadd.f32 %v3441_v4, %v950_v41  ;;  %2554 = vmatmul.mubr.f32.gmra.mxu0 %v977_v40 }
 0x204   : > { %v2487_v43 = vpop.f32.mrf.mxu1  ;;  %2556 = vmatprep.mubr.msk.f32.mxu0 %vm3066_vm0, %v3065_v0 }
 0x205   : > { %v978_v44 = vmax.f32 %v951_v42, 0.0 }
 0x206   : > { %v955_v45 = vpop.f32.mrf.mxu1 }
 0x207   : > { %v956_v46 = vadd.f32 %v3441_v4, %v955_v45  ;;  %2557 = vmatmul.mubr.f32.gmra.mxu0 %v978_v44 }
 0x208   : > { %v2490_v47 = vpop.f32.mrf.mxu1  ;;  %2559 = vmatprep.mubr.msk.f32.mxu0 %vm3066_vm0, %v3065_v0 }
 0x209   : > { %v979_v48 = vmax.f32 %v956_v46, 0.0 }
 0x20a   : > { %v960_v49 = vpop.f32.mrf.mxu1 }
 0x20b   : > { %v961_v50 = vadd.f32 %v3441_v4, %v960_v49  ;;  %2560 = vmatmul.mubr.f32.gmra.mxu0 %v979_v48 }
 0x20c   : > { %v2493_v51 = vpop.f32.mrf.mxu1  ;;  %2562 = vmatprep.mubr.msk.f32.mxu0 %vm3066_vm0, %v3065_v0 }
 0x20d   : > { %v980_v52 = vmax.f32 %v961_v50, 0.0 }
 0x20e   : > { %v965_v53 = vpop.f32.mrf.mxu1 }
 0x20f   : > { %v966_v54 = vadd.f32 %v3441_v4, %v965_v53  ;;  %2563 = vmatmul.mubr.f32.gmra.mxu0 %v980_v52  ;;  %v1320_v4 = vld [vmem:[%s4009_s9 + $0x30] sm:$0xff] }
 0x210   : > { %v2496_v55 = vpop.f32.mrf.mxu1  ;;  %2565 = vmatprep.mubr.msk.f32.mxu0 %vm3066_vm0, %v3065_v0  ;;  %2658 = vmatpush3.msra.mxu0 %v1320_v4  ;;  %v1492_v4 = vld [vmem:[%s4011_s11 + $0x60] sm:$0xff] }
 0x211   : > { %v981_v56 = vmax.f32 %v966_v54, 0.0  ;;  %2659 = vmatprep.subr.mxu0 %v3065_v0 }
 0x212   : > { %2660 = vmatpush3.msra.mxu0 %v1319_v5  ;;  %v1491_v5 = vld [vmem:[%s4011_s11 + $0x58] sm:$0xff] }
 0x213   : > { %2566 = vmatmul.mubr.f32.gmra.mxu0 %v981_v56  ;;  %2661 = vmatprep.subr.mxu0 %v3065_v0 }
 0x214   : > { %2671 = vmatprep.mubr.msk.f32.mxu0 %vm3066_vm0, %v3065_v0  ;;  %2662 = vmatpush3.msra.mxu0 %v1318_v6  ;;  %v1490_v6 = vld [vmem:[%s4011_s11 + $0x50] sm:$0xff] }
 0x215   : > { %2663 = vmatprep.subr.mxu0 %v3065_v0 }
 0x216   : > { %2664 = vmatpush3.msra.mxu0 %v1317_v7  ;;  %v1489_v7 = vld [vmem:[%s4011_s11 + $0x48] sm:$0xff] }
 0x217   : > { %2665 = vmatprep.subr.mxu0 %v3065_v0 }
 0x218   : > { %2666 = vmatpush3.msra.mxu0 %v1316_v8  ;;  %v1488_v8 = vld [vmem:[%s4011_s11 + $0x40] sm:$0xff] }
 0x219   : > { %2667 = vmatprep.subr.mxu0 %v3065_v0 }
 0x21a   : > { %2668 = vmatpush3.msra.mxu0 %v1315_v9  ;;  %v1487_v9 = vld [vmem:[%s4011_s11 + $0x38] sm:$0xff] }
 0x21b   : > { %2669 = vmatprep.subr.mxu0 %v3065_v0 }
 0x21c   : > { %2670 = vmatpush3.msra.mxu0 %v1314_v63  ;;  %v1655_v63 = vld [vmem:[%s4013_s13 + $0x48] sm:$0xff] }
 0x21d   : > { %2781 = vmatprep.subr.mxu0 %v3065_v0 }
 0x2a3   : > { %v1071_v11 = vpop.f32.mrf.mxu0 }
 0x2a4   : > { %v1072_v12 = vadd.f32 %v3549_v10, %v1071_v11  ;;  %v1485_v11 = vld [vmem:[%s4011_s11 + $0x28] sm:$0xff] }
 0x2a5   : > { %v2531_v13 = vpop.f32.mrf.mxu0 }
 0x2a6   : > { %v1135_v14 = vmax.f32 %v1072_v12, 0.0  ;;  %v1484_v12 = vld [vmem:[%s4011_s11 + $0x20] sm:$0xff]  ;;  %v1483_v13 = vld [vmem:[%s4011_s11 + $0x18] sm:$0xff] }
 0x2a7   : > { %v1076_v15 = vpop.f32.mrf.mxu0 }
 0x2a8   : > { %v1077_v16 = vadd.f32 %v3549_v10, %v1076_v15  ;;  %2601 = vmatmul.mubr.f32.vlgmr.msra.gmra.mxu1 %v1135_v14  ;;  %v1482_v14 = vld [vmem:[%s4011_s11 + $0x10] sm:$0xff]  ;;  %v1481_v15 = vld [vmem:[%s4011_s11 + $0x8] sm:$0xff] }
 0x2a9   : > { %v2534_v17 = vpop.f32.mrf.mxu0  ;;  %2603 = vmatprep.mubr.msk.f32.mxu1 %vm3066_vm0, %v3065_v0  ;;  %2711 = vmatpush3.msra.mxu1 %v1495_v1  ;;  %v1654_v1 = vld [vmem:[%s4013_s13 + $0x40] sm:$0xff] }
 0x2aa   : > { %v1136_v18 = vmax.f32 %v1077_v16, 0.0  ;;  %2712 = vmatprep.subr.mxu1 %v3065_v0  ;;  %v3657_v16 = vld [vmem:[%s4008_s8] ss:$0 sm:$0xff] }
 0x2ab   : > { %v1081_v19 = vpop.f32.mrf.mxu0  ;;  %2713 = vmatpush3.msra.mxu1 %v1494_v2  ;;  %v1653_v2 = vld [vmem:[%s4013_s13 + $0x38] sm:$0xff] }
 0x2ac   : > { %v1082_v20 = vadd.f32 %v3549_v10, %v1081_v19  ;;  %2604 = vmatmul.mubr.f32.gmra.mxu1 %v1136_v18  ;;  %2714 = vmatprep.subr.mxu1 %v3065_v0 }
 0x2ad   : > { %v2537_v21 = vpop.f32.mrf.mxu0  ;;  %2606 = vmatprep.mubr.msk.f32.mxu1 %vm3066_vm0, %v3065_v0  ;;  %2715 = vmatpush3.msra.mxu1 %v1493_v3  ;;  %v1652_v3 = vld [vmem:[%s4013_s13 + $0x30] sm:$0xff] }
 0x2ae   : > { %v1137_v22 = vmax.f32 %v1082_v20, 0.0  ;;  %2716 = vmatprep.subr.mxu1 %v3065_v0 }
 0x2af   : > { %v1086_v23 = vpop.f32.mrf.mxu0  ;;  %2717 = vmatpush3.msra.mxu1 %v1492_v4  ;;  %v1651_v4 = vld [vmem:[%s4013_s13 + $0x28] sm:$0xff] }
 0x2b0   : > { %v1087_v24 = vadd.f32 %v3549_v10, %v1086_v23  ;;  %2607 = vmatmul.mubr.f32.gmra.mxu1 %v1137_v22  ;;  %2718 = vmatprep.subr.mxu1 %v3065_v0 }
 0x2b1   : > { %v2540_v25 = vpop.f32.mrf.mxu0  ;;  %2609 = vmatprep.mubr.msk.f32.mxu1 %vm3066_vm0, %v3065_v0  ;;  %2719 = vmatpush3.msra.mxu1 %v1491_v5  ;;  %v1650_v5 = vld [vmem:[%s4013_s13 + $0x20] sm:$0xff] }
 0x2b2   : > { %v1138_v26 = vmax.f32 %v1087_v24, 0.0  ;;  %2720 = vmatprep.subr.mxu1 %v3065_v0 }
 0x2b3   : > { %v1091_v27 = vpop.f32.mrf.mxu0  ;;  %2721 = vmatpush3.msra.mxu1 %v1490_v6  ;;  %v1649_v6 = vld [vmem:[%s4013_s13 + $0x18] sm:$0xff] }
 0x2b4   : > { %v1092_v28 = vadd.f32 %v3549_v10, %v1091_v27  ;;  %2610 = vmatmul.mubr.f32.gmra.mxu1 %v1138_v26  ;;  %2722 = vmatprep.subr.mxu1 %v3065_v0 }
 0x2b5   : > { %v2543_v29 = vpop.f32.mrf.mxu0  ;;  %2612 = vmatprep.mubr.msk.f32.mxu1 %vm3066_vm0, %v3065_v0  ;;  %2723 = vmatpush3.msra.mxu1 %v1489_v7  ;;  %v1648_v7 = vld [vmem:[%s4013_s13 + $0x10] sm:$0xff] }
 0x2b6   : > { %v1139_v30 = vmax.f32 %v1092_v28, 0.0  ;;  %2724 = vmatprep.subr.mxu1 %v3065_v0 }
 0x2b7   : > { %v1096_v31 = vpop.f32.mrf.mxu0  ;;  %2725 = vmatpush3.msra.mxu1 %v1488_v8  ;;  %v1647_v8 = vld [vmem:[%s4013_s13 + $0x8] sm:$0xff] }
 0x2b8   : > { %v1097_v32 = vadd.f32 %v3549_v10, %v1096_v31  ;;  %2613 = vmatmul.mubr.f32.gmra.mxu1 %v1139_v30  ;;  %2726 = vmatprep.subr.mxu1 %v3065_v0 }
 0x2b9   : > { %v2546_v33 = vpop.f32.mrf.mxu0  ;;  %2615 = vmatprep.mubr.msk.f32.mxu1 %vm3066_vm0, %v3065_v0  ;;  %2727 = vmatpush3.msra.mxu1 %v1487_v9  ;;  %v3784_v9 = vld [vmem:[%s4010_s10] ss:$0 sm:$0xff] }
 0x2ba   : > { %v1140_v34 = vmax.f32 %v1097_v32, 0.0  ;;  %2728 = vmatprep.subr.mxu1 %v3065_v0 }
 0x2bb   : > { %v1101_v35 = vpop.f32.mrf.mxu0 }
 0x2bc   : > { %v1102_v36 = vadd.f32 %v3549_v10, %v1101_v35  ;;  %2616 = vmatmul.mubr.f32.gmra.mxu1 %v1140_v34 }
 0x2bd   : > { %v2549_v37 = vpop.f32.mrf.mxu0  ;;  %2618 = vmatprep.mubr.msk.f32.mxu1 %vm3066_vm0, %v3065_v0 }
 0x2be   : > { %v1141_v38 = vmax.f32 %v1102_v36, 0.0 }
 0x2bf   : > { %v1106_v39 = vpop.f32.mrf.mxu0 }
 0x2c0   : > { %v1107_v40 = vadd.f32 %v3549_v10, %v1106_v39  ;;  %2619 = vmatmul.mubr.f32.gmra.mxu1 %v1141_v38 }
 0x2c1   : > { %v2552_v41 = vpop.f32.mrf.mxu0  ;;  %2621 = vmatprep.mubr.msk.f32.mxu1 %vm3066_vm0, %v3065_v0 }
 0x2c2   : > { %v1142_v42 = vmax.f32 %v1107_v40, 0.0 }
 0x2c3   : > { %v1111_v43 = vpop.f32.mrf.mxu0 }
 0x2c4   : > { %v1112_v44 = vadd.f32 %v3549_v10, %v1111_v43  ;;  %2622 = vmatmul.mubr.f32.gmra.mxu1 %v1142_v42 }
 0x2c5   : > { %v2555_v45 = vpop.f32.mrf.mxu0  ;;  %2624 = vmatprep.mubr.msk.f32.mxu1 %vm3066_vm0, %v3065_v0 }
 0x2c6   : > { %v1143_v46 = vmax.f32 %v1112_v44, 0.0 }
 0x2c7   : > { %v1116_v47 = vpop.f32.mrf.mxu0 }
 0x2c8   : > { %v1117_v48 = vadd.f32 %v3549_v10, %v1116_v47  ;;  %2625 = vmatmul.mubr.f32.gmra.mxu1 %v1143_v46 }
 0x2c9   : > { %v2558_v49 = vpop.f32.mrf.mxu0  ;;  %2627 = vmatprep.mubr.msk.f32.mxu1 %vm3066_vm0, %v3065_v0 }
 0x2ca   : > { %v1144_v50 = vmax.f32 %v1117_v48, 0.0 }
 0x2cb   : > { %v1121_v51 = vpop.f32.mrf.mxu0 }
 0x2cc   : > { %v1122_v52 = vadd.f32 %v3549_v10, %v1121_v51  ;;  %2628 = vmatmul.mubr.f32.gmra.mxu1 %v1144_v50 }
 0x2cd   : > { %v2561_v53 = vpop.f32.mrf.mxu0  ;;  %2630 = vmatprep.mubr.msk.f32.mxu1 %vm3066_vm0, %v3065_v0 }
 0x2ce   : > { %v1145_v54 = vmax.f32 %v1122_v52, 0.0 }
 0x2cf   : > { %v1126_v55 = vpop.f32.mrf.mxu0 }
 0x2d0   : > { %v1127_v56 = vadd.f32 %v3549_v10, %v1126_v55  ;;  %2631 = vmatmul.mubr.f32.gmra.mxu1 %v1145_v54 }
 0x2d1   : > { %v2564_v57 = vpop.f32.mrf.mxu0  ;;  %2633 = vmatprep.mubr.msk.f32.mxu1 %vm3066_vm0, %v3065_v0 }
 0x2d2   : > { %v1146_v58 = vmax.f32 %v1127_v56, 0.0  ;;  %v1480_v56 = vld [vmem:[%s4011_s11] sm:$0xff]  ;;  %v1661_v57 = vld [vmem:[%s4013_s13 + $0x78] sm:$0xff] }
 0x2d3   : > { %v1131_v59 = vpop.f32.mrf.mxu0 }
 0x2d4   : > { %v1132_v60 = vadd.f32 %v3549_v10, %v1131_v59  ;;  %2634 = vmatmul.mubr.f32.gmra.mxu1 %v1146_v58  ;;  %v1486_v10 = vld [vmem:[%s4011_s11 + $0x30] sm:$0xff]  ;;  %v1659_v59 = vld [vmem:[%s4013_s13 + $0x68] sm:$0xff] }
 0x2d5   : > { %v2567_v61 = vpop.f32.mrf.mxu0  ;;  %2636 = vmatprep.mubr.msk.f32.mxu1 %vm3066_vm0, %v3065_v0  ;;  %2729 = vmatpush3.msra.mxu1 %v1486_v10  ;;  %v1660_v58 = vld [vmem:[%s4013_s13 + $0x70] sm:$0xff] }
 0x2d6   : > { %v1147_v62 = vmax.f32 %v1132_v60, 0.0  ;;  %2730 = vmatprep.subr.mxu1 %v3065_v0  ;;  %v1658_v60 = vld [vmem:[%s4013_s13 + $0x60] sm:$0xff]  ;;  %v1657_v61 = vld [vmem:[%s4013_s13 + $0x58] sm:$0xff] }
 0x2d7   : > { %2731 = vmatpush3.msra.mxu1 %v1485_v11 }
 0x2d8   : > { %2637 = vmatmul.mubr.f32.gmra.mxu1 %v1147_v62  ;;  %2732 = vmatprep.subr.mxu1 %v3065_v0  ;;  %v1656_v62 = vld [vmem:[%s4013_s13 + $0x50] sm:$0xff] }
 0x2d9   : > { %2742 = vmatprep.mubr.msk.f32.mxu1 %vm3066_vm0, %v3065_v0  ;;  %2733 = vmatpush3.msra.mxu1 %v1484_v12 }
 0x2da   : > { %2734 = vmatprep.subr.mxu1 %v3065_v0 }
 0x2db   : > { %2735 = vmatpush3.msra.mxu1 %v1483_v13 }
 0x2dc   : > { %2736 = vmatprep.subr.mxu1 %v3065_v0 }
 0x2dd   : > { %2737 = vmatpush3.msra.mxu1 %v1482_v14 }
 0x2de   : > { %2738 = vmatprep.subr.mxu1 %v3065_v0 }
 0x2df   : > { %2739 = vmatpush3.msra.mxu1 %v1481_v15 }
 0x2e0   : > { %2740 = vmatprep.subr.mxu1 %v3065_v0 }
 0x2e1   : > { %2741 = vmatpush3.msra.mxu1 %v1480_v56 }
 0x2e2   : > { %2852 = vmatprep.subr.mxu1 %v3065_v0 }
 0x368   : > { %v1237_v17 = vpop.f32.mrf.mxu1 }
 0x369   : > { %v1238_v18 = vadd.f32 %v3657_v16, %v1237_v17 }
 0x36a   : > { %v2602_v19 = vpop.f32.mrf.mxu1 }
 0x36b   : > { %1301 = vst [vmem:[%s3663_s1] sm:$0xff] %v1238_v18  ;;  %2672 = vmatmul.mubr.f32.vlgmr.msra.gmra.mxu0 %v1238_v18 }
 0x36c   : > { %v1242_v20 = vpop.f32.mrf.mxu1  ;;  %2674 = vmatprep.mubr.msk.f32.mxu0 %vm3066_vm0, %v3065_v0  ;;  %2782 = vmatpush3.msra.mxu0 %v1661_v57 }
 0x36d   : > { %v1243_v21 = vadd.f32 %v3657_v16, %v1242_v20  ;;  %2783 = vmatprep.subr.mxu0 %v3065_v0 }
 0x36e   : > { %v2605_v22 = vpop.f32.mrf.mxu1  ;;  %2784 = vmatpush3.msra.mxu0 %v1660_v58 }
 0x36f   : > { %1302 = vst [vmem:[%s3663_s1 + $0x8] sm:$0xff] %v1243_v21  ;;  %2675 = vmatmul.mubr.f32.gmra.mxu0 %v1243_v21  ;;  %2785 = vmatprep.subr.mxu0 %v3065_v0 }
 0x370   : > { %v1247_v23 = vpop.f32.mrf.mxu1  ;;  %2677 = vmatprep.mubr.msk.f32.mxu0 %vm3066_vm0, %v3065_v0  ;;  %2786 = vmatpush3.msra.mxu0 %v1659_v59 }
 0x371   : > { %v1248_v24 = vadd.f32 %v3657_v16, %v1247_v23  ;;  %2787 = vmatprep.subr.mxu0 %v3065_v0 }
 0x372   : > { %v2608_v25 = vpop.f32.mrf.mxu1  ;;  %2788 = vmatpush3.msra.mxu0 %v1658_v60 }
 0x373   : > { %1303 = vst [vmem:[%s3663_s1 + $0x10] sm:$0xff] %v1248_v24  ;;  %2678 = vmatmul.mubr.f32.gmra.mxu0 %v1248_v24  ;;  %2789 = vmatprep.subr.mxu0 %v3065_v0 }
 0x374   : > { %v1252_v26 = vpop.f32.mrf.mxu1  ;;  %2680 = vmatprep.mubr.msk.f32.mxu0 %vm3066_vm0, %v3065_v0  ;;  %2790 = vmatpush3.msra.mxu0 %v1657_v61 }
 0x375   : > { %v1253_v27 = vadd.f32 %v3657_v16, %v1252_v26  ;;  %2791 = vmatprep.subr.mxu0 %v3065_v0 }
 0x376   : > { %v2611_v28 = vpop.f32.mrf.mxu1  ;;  %2792 = vmatpush3.msra.mxu0 %v1656_v62  ;;  %v1646_v62 = vld [vmem:[%s4013_s13] sm:$0xff] }
 0x377   : > { %1304 = vst [vmem:[%s3663_s1 + $0x18] sm:$0xff] %v1253_v27  ;;  %2681 = vmatmul.mubr.f32.gmra.mxu0 %v1253_v27  ;;  %2793 = vmatprep.subr.mxu0 %v3065_v0 }
 0x378   : > { %v1257_v29 = vpop.f32.mrf.mxu1  ;;  %2683 = vmatprep.mubr.msk.f32.mxu0 %vm3066_vm0, %v3065_v0  ;;  %2794 = vmatpush3.msra.mxu0 %v1655_v63  ;;  %v1827_v63 = vld [vmem:[%s4015_s15 + $0x78] sm:$0xff] }
 0x379   : > { %v1258_v30 = vadd.f32 %v3657_v16, %v1257_v29  ;;  %2795 = vmatprep.subr.mxu0 %v3065_v0 }
 0x37a   : > { %v2614_v31 = vpop.f32.mrf.mxu1  ;;  %2796 = vmatpush3.msra.mxu0 %v1654_v1  ;;  %v1826_v1 = vld [vmem:[%s4015_s15 + $0x70] sm:$0xff] }
 0x37b   : > { %1305 = vst [vmem:[%s3663_s1 + $0x20] sm:$0xff] %v1258_v30  ;;  %2684 = vmatmul.mubr.f32.gmra.mxu0 %v1258_v30  ;;  %2797 = vmatprep.subr.mxu0 %v3065_v0 }
 0x37c   : > { %v1262_v32 = vpop.f32.mrf.mxu1  ;;  %2686 = vmatprep.mubr.msk.f32.mxu0 %vm3066_vm0, %v3065_v0  ;;  %2798 = vmatpush3.msra.mxu0 %v1653_v2  ;;  %v1825_v2 = vld [vmem:[%s4015_s15 + $0x68] sm:$0xff] }
 0x37d   : > { %v1263_v33 = vadd.f32 %v3657_v16, %v1262_v32  ;;  %2799 = vmatprep.subr.mxu0 %v3065_v0 }
 0x37e   : > { %v2617_v34 = vpop.f32.mrf.mxu1  ;;  %2800 = vmatpush3.msra.mxu0 %v1652_v3  ;;  %v1824_v3 = vld [vmem:[%s4015_s15 + $0x60] sm:$0xff] }
 0x37f   : > { %1306 = vst [vmem:[%s3663_s1 + $0x28] sm:$0xff] %v1263_v33  ;;  %2687 = vmatmul.mubr.f32.gmra.mxu0 %v1263_v33  ;;  %2801 = vmatprep.subr.mxu0 %v3065_v0 }
 0x380   : > { %v1267_v35 = vpop.f32.mrf.mxu1  ;;  %2689 = vmatprep.mubr.msk.f32.mxu0 %vm3066_vm0, %v3065_v0  ;;  %2802 = vmatpush3.msra.mxu0 %v1651_v4  ;;  %v1823_v4 = vld [vmem:[%s4015_s15 + $0x58] sm:$0xff] }
 0x381   : > { %v1268_v36 = vadd.f32 %v3657_v16, %v1267_v35  ;;  %2803 = vmatprep.subr.mxu0 %v3065_v0 }
 0x382   : > { %v2620_v37 = vpop.f32.mrf.mxu1  ;;  %2804 = vmatpush3.msra.mxu0 %v1650_v5  ;;  %v1822_v5 = vld [vmem:[%s4015_s15 + $0x50] sm:$0xff] }
 0x383   : > { %1307 = vst [vmem:[%s3663_s1 + $0x30] sm:$0xff] %v1268_v36  ;;  %2690 = vmatmul.mubr.f32.gmra.mxu0 %v1268_v36  ;;  %2805 = vmatprep.subr.mxu0 %v3065_v0 }
 0x384   : > { %v1272_v38 = vpop.f32.mrf.mxu1  ;;  %2692 = vmatprep.mubr.msk.f32.mxu0 %vm3066_vm0, %v3065_v0  ;;  %2806 = vmatpush3.msra.mxu0 %v1649_v6  ;;  %v1821_v6 = vld [vmem:[%s4015_s15 + $0x48] sm:$0xff] }
 0x385   : > { %v1273_v39 = vadd.f32 %v3657_v16, %v1272_v38  ;;  %2807 = vmatprep.subr.mxu0 %v3065_v0 }
 0x386   : > { %v2623_v40 = vpop.f32.mrf.mxu1  ;;  %2808 = vmatpush3.msra.mxu0 %v1648_v7  ;;  %v1820_v7 = vld [vmem:[%s4015_s15 + $0x40] sm:$0xff] }
 0x387   : > { %1308 = vst [vmem:[%s3663_s1 + $0x38] sm:$0xff] %v1273_v39  ;;  %2693 = vmatmul.mubr.f32.gmra.mxu0 %v1273_v39  ;;  %2809 = vmatprep.subr.mxu0 %v3065_v0 }
 0x388   : > { %v1277_v41 = vpop.f32.mrf.mxu1  ;;  %2695 = vmatprep.mubr.msk.f32.mxu0 %vm3066_vm0, %v3065_v0  ;;  %2810 = vmatpush3.msra.mxu0 %v1647_v8  ;;  %v1819_v8 = vld [vmem:[%s4015_s15 + $0x38] sm:$0xff] }
 0x389   : > { %v1278_v42 = vadd.f32 %v3657_v16, %v1277_v41  ;;  %2811 = vmatprep.subr.mxu0 %v3065_v0 }
 0x38a   : > { %v2626_v43 = vpop.f32.mrf.mxu1  ;;  %2812 = vmatpush3.msra.mxu0 %v1646_v62 }
 0x38b   : > { %1309 = vst [vmem:[%s3663_s1 + $0x40] sm:$0xff] %v1278_v42  ;;  %2696 = vmatmul.mubr.f32.gmra.mxu0 %v1278_v42 }
 0x38c   : > { %v1282_v44 = vpop.f32.mrf.mxu1  ;;  %2698 = vmatprep.mubr.msk.f32.mxu0 %vm3066_vm0, %v3065_v0 }
 0x38d   : > { %v1283_v45 = vadd.f32 %v3657_v16, %v1282_v44 }
 0x38e   : > { %v2629_v46 = vpop.f32.mrf.mxu1 }
 0x38f   : > { %1310 = vst [vmem:[%s3663_s1 + $0x48] sm:$0xff] %v1283_v45  ;;  %2699 = vmatmul.mubr.f32.gmra.mxu0 %v1283_v45 }
 0x390   : > { %v1287_v47 = vpop.f32.mrf.mxu1  ;;  %2701 = vmatprep.mubr.msk.f32.mxu0 %vm3066_vm0, %v3065_v0 }
 0x391   : > { %v1288_v48 = vadd.f32 %v3657_v16, %v1287_v47 }
 0x392   : > { %v2632_v49 = vpop.f32.mrf.mxu1 }
 0x393   : > { %1311 = vst [vmem:[%s3663_s1 + $0x50] sm:$0xff] %v1288_v48  ;;  %2702 = vmatmul.mubr.f32.gmra.mxu0 %v1288_v48 }
 0x394   : > { %v1292_v50 = vpop.f32.mrf.mxu1  ;;  %2704 = vmatprep.mubr.msk.f32.mxu0 %vm3066_vm0, %v3065_v0 }
 0x395   : > { %v1293_v51 = vadd.f32 %v3657_v16, %v1292_v50 }
 0x396   : > { %v2635_v52 = vpop.f32.mrf.mxu1 }
 0x397   : > { %1312 = vst [vmem:[%s3663_s1 + $0x58] sm:$0xff] %v1293_v51  ;;  %2705 = vmatmul.mubr.f32.gmra.mxu0 %v1293_v51 }
 0x398   : > { %v1297_v53 = vpop.f32.mrf.mxu1  ;;  %2707 = vmatprep.mubr.msk.f32.mxu0 %vm3066_vm0, %v3065_v0 }
 0x399   : > { %v1298_v54 = vadd.f32 %v3657_v16, %v1297_v53 }
 0x39a   : > { %v2638_v55 = vpop.f32.mrf.mxu1 }
 0x39b   : > { %1313 = vst [vmem:[%s3663_s1 + $0x60] sm:$0xff] %v1298_v54  ;;  %2708 = vmatmul.mubr.f32.gmra.mxu0 %v1298_v54 }
 0x39c   : > { %2813 = vmatprep.mubr.msk.f32.mxu0 %vm3066_vm0, %v3065_v0 }
 0x42b   : > { %v1403_v10 = vpop.f32.mrf.mxu0 }
 0x42c   : > { %v1404_v11 = vadd.f32 %v3784_v9, %v1403_v10  ;;  %v1817_v10 = vld [vmem:[%s4015_s15 + $0x28] sm:$0xff] }
 0x42d   : > { %v2673_v12 = vpop.f32.mrf.mxu0 }
 0x42e   : > { %v1467_v13 = vmax.f32 %v1404_v11, 0.0  ;;  %v1816_v11 = vld [vmem:[%s4015_s15 + $0x20] sm:$0xff]  ;;  %v1815_v12 = vld [vmem:[%s4015_s15 + $0x18] sm:$0xff] }
 0x42f   : > { %v1408_v14 = vpop.f32.mrf.mxu0 }
 0x430   : > { %v1409_v15 = vadd.f32 %v3784_v9, %v1408_v14  ;;  %2743 = vmatmul.mubr.f32.vlgmr.msra.gmra.mxu1 %v1467_v13  ;;  %v1814_v13 = vld [vmem:[%s4015_s15 + $0x10] sm:$0xff]  ;;  %v1813_v14 = vld [vmem:[%s4015_s15 + $0x8] sm:$0xff] }
 0x431   : > { %v2676_v16 = vpop.f32.mrf.mxu0  ;;  %2745 = vmatprep.mubr.msk.f32.mxu1 %vm3066_vm0, %v3065_v0  ;;  %2853 = vmatpush3.msra.mxu1 %v1827_v63 }
 0x432   : > { %v1468_v17 = vmax.f32 %v1409_v15, 0.0  ;;  %2854 = vmatprep.subr.mxu1 %v3065_v0  ;;  %v3891_v15 = vld [vmem:[%s4012_s12] ss:$0 sm:$0xff] }
 0x433   : > { %v1413_v18 = vpop.f32.mrf.mxu0  ;;  %2855 = vmatpush3.msra.mxu1 %v1826_v1 }
 0x434   : > { %v1414_v19 = vadd.f32 %v3784_v9, %v1413_v18  ;;  %2746 = vmatmul.mubr.f32.gmra.mxu1 %v1468_v17  ;;  %2856 = vmatprep.subr.mxu1 %v3065_v0 }
 0x435   : > { %v2679_v20 = vpop.f32.mrf.mxu0  ;;  %2748 = vmatprep.mubr.msk.f32.mxu1 %vm3066_vm0, %v3065_v0  ;;  %2857 = vmatpush3.msra.mxu1 %v1825_v2 }
 0x436   : > { %v1469_v21 = vmax.f32 %v1414_v19, 0.0  ;;  %2858 = vmatprep.subr.mxu1 %v3065_v0 }
 0x437   : > { %v1418_v22 = vpop.f32.mrf.mxu0  ;;  %2859 = vmatpush3.msra.mxu1 %v1824_v3 }
 0x438   : > { %v1419_v23 = vadd.f32 %v3784_v9, %v1418_v22  ;;  %2749 = vmatmul.mubr.f32.gmra.mxu1 %v1469_v21  ;;  %2860 = vmatprep.subr.mxu1 %v3065_v0 }
 0x439   : > { %v2682_v24 = vpop.f32.mrf.mxu0  ;;  %2751 = vmatprep.mubr.msk.f32.mxu1 %vm3066_vm0, %v3065_v0  ;;  %2861 = vmatpush3.msra.mxu1 %v1823_v4 }
 0x43a   : > { %v1470_v25 = vmax.f32 %v1419_v23, 0.0  ;;  %2862 = vmatprep.subr.mxu1 %v3065_v0 }
 0x43b   : > { %v1423_v26 = vpop.f32.mrf.mxu0  ;;  %2863 = vmatpush3.msra.mxu1 %v1822_v5  ;;  %v1812_v5 = vld [vmem:[%s4015_s15] sm:$0xff] }
 0x43c   : > { %v1424_v27 = vadd.f32 %v3784_v9, %v1423_v26  ;;  %2752 = vmatmul.mubr.f32.gmra.mxu1 %v1470_v25  ;;  %2864 = vmatprep.subr.mxu1 %v3065_v0 }
 0x43d   : > { %v2685_v28 = vpop.f32.mrf.mxu0  ;;  %2754 = vmatprep.mubr.msk.f32.mxu1 %vm3066_vm0, %v3065_v0  ;;  %2865 = vmatpush3.msra.mxu1 %v1821_v6  ;;  %v3936_v6 = vld [vmem:[%s4014_s14] ss:$0 sm:$0xff] }
 0x43e   : > { %v1471_v29 = vmax.f32 %v1424_v27, 0.0  ;;  %2866 = vmatprep.subr.mxu1 %v3065_v0 }
 0x43f   : > { %v1428_v30 = vpop.f32.mrf.mxu0  ;;  %2867 = vmatpush3.msra.mxu1 %v1820_v7 }
 0x440   : > { %v1429_v31 = vadd.f32 %v3784_v9, %v1428_v30  ;;  %2755 = vmatmul.mubr.f32.gmra.mxu1 %v1471_v29  ;;  %2868 = vmatprep.subr.mxu1 %v3065_v0 }
 0x441   : > { %v2688_v32 = vpop.f32.mrf.mxu0  ;;  %2757 = vmatprep.mubr.msk.f32.mxu1 %vm3066_vm0, %v3065_v0  ;;  %2869 = vmatpush3.msra.mxu1 %v1819_v8 }
 0x442   : > { %v1472_v33 = vmax.f32 %v1429_v31, 0.0  ;;  %2870 = vmatprep.subr.mxu1 %v3065_v0 }
 0x443   : > { %v1433_v34 = vpop.f32.mrf.mxu0 }
 0x444   : > { %v1434_v35 = vadd.f32 %v3784_v9, %v1433_v34  ;;  %2758 = vmatmul.mubr.f32.gmra.mxu1 %v1472_v33 }
 0x445   : > { %v2691_v36 = vpop.f32.mrf.mxu0  ;;  %2760 = vmatprep.mubr.msk.f32.mxu1 %vm3066_vm0, %v3065_v0 }
 0x446   : > { %v1473_v37 = vmax.f32 %v1434_v35, 0.0 }
 0x447   : > { %v1438_v38 = vpop.f32.mrf.mxu0 }
 0x448   : > { %v1439_v39 = vadd.f32 %v3784_v9, %v1438_v38  ;;  %2761 = vmatmul.mubr.f32.gmra.mxu1 %v1473_v37 }
 0x449   : > { %v2694_v40 = vpop.f32.mrf.mxu0  ;;  %2763 = vmatprep.mubr.msk.f32.mxu1 %vm3066_vm0, %v3065_v0 }
 0x44a   : > { %v1474_v41 = vmax.f32 %v1439_v39, 0.0 }
 0x44b   : > { %v1443_v42 = vpop.f32.mrf.mxu0 }
 0x44c   : > { %v1444_v43 = vadd.f32 %v3784_v9, %v1443_v42  ;;  %2764 = vmatmul.mubr.f32.gmra.mxu1 %v1474_v41 }
 0x44d   : > { %v2697_v44 = vpop.f32.mrf.mxu0  ;;  %2766 = vmatprep.mubr.msk.f32.mxu1 %vm3066_vm0, %v3065_v0 }
 0x44e   : > { %v1475_v45 = vmax.f32 %v1444_v43, 0.0 }
 0x44f   : > { %v1448_v46 = vpop.f32.mrf.mxu0 }
 0x450   : > { %v1449_v47 = vadd.f32 %v3784_v9, %v1448_v46  ;;  %2767 = vmatmul.mubr.f32.gmra.mxu1 %v1475_v45 }
 0x451   : > { %v2700_v48 = vpop.f32.mrf.mxu0  ;;  %2769 = vmatprep.mubr.msk.f32.mxu1 %vm3066_vm0, %v3065_v0 }
 0x452   : > { %v1476_v49 = vmax.f32 %v1449_v47, 0.0 }
 0x453   : > { %v1453_v50 = vpop.f32.mrf.mxu0 }
 0x454   : > { %v1454_v51 = vadd.f32 %v3784_v9, %v1453_v50  ;;  %2770 = vmatmul.mubr.f32.gmra.mxu1 %v1476_v49 }
 0x455   : > { %v2703_v52 = vpop.f32.mrf.mxu0  ;;  %2772 = vmatprep.mubr.msk.f32.mxu1 %vm3066_vm0, %v3065_v0 }
 0x456   : > { %v1477_v53 = vmax.f32 %v1454_v51, 0.0 }
 0x457   : > { %v1458_v54 = vpop.f32.mrf.mxu0 }
 0x458   : > { %v1459_v55 = vadd.f32 %v3784_v9, %v1458_v54  ;;  %2773 = vmatmul.mubr.f32.gmra.mxu1 %v1477_v53 }
 0x459   : > { %v2706_v56 = vpop.f32.mrf.mxu0  ;;  %2775 = vmatprep.mubr.msk.f32.mxu1 %vm3066_vm0, %v3065_v0 }
 0x45a   : > { %v1478_v57 = vmax.f32 %v1459_v55, 0.0 }
 0x45b   : > { %v1463_v58 = vpop.f32.mrf.mxu0 }
 0x45c   : > { %v1464_v59 = vadd.f32 %v3784_v9, %v1463_v58  ;;  %2776 = vmatmul.mubr.f32.gmra.mxu1 %v1478_v57  ;;  %v1818_v9 = vld [vmem:[%s4015_s15 + $0x30] sm:$0xff] }
 0x45d   : > { %v2709_v60 = vpop.f32.mrf.mxu0  ;;  %2778 = vmatprep.mubr.msk.f32.mxu1 %vm3066_vm0, %v3065_v0  ;;  %2871 = vmatpush3.msra.mxu1 %v1818_v9 }
 0x45e   : > { %v1479_v61 = vmax.f32 %v1464_v59, 0.0  ;;  %2872 = vmatprep.subr.mxu1 %v3065_v0 }
 0x45f   : > { %2873 = vmatpush3.msra.mxu1 %v1817_v10 }
 0x460   : > { %2779 = vmatmul.mubr.f32.gmra.mxu1 %v1479_v61  ;;  %2874 = vmatprep.subr.mxu1 %v3065_v0 }
 0x461   : > { %2884 = vmatprep.mubr.msk.f32.mxu1 %vm3066_vm0, %v3065_v0  ;;  %2875 = vmatpush3.msra.mxu1 %v1816_v11 }
 0x462   : > { %2876 = vmatprep.subr.mxu1 %v3065_v0 }
 0x463   : > { %2877 = vmatpush3.msra.mxu1 %v1815_v12 }
 0x464   : > { %2878 = vmatprep.subr.mxu1 %v3065_v0 }
 0x465   : > { %2879 = vmatpush3.msra.mxu1 %v1814_v13 }
 0x466   : > { %2880 = vmatprep.subr.mxu1 %v3065_v0 }
 0x467   : > { %2881 = vmatpush3.msra.mxu1 %v1813_v14 }
 0x468   : > { %2882 = vmatprep.subr.mxu1 %v3065_v0 }
 0x469   : > { %2883 = vmatpush3.msra.mxu1 %v1812_v5 }
 0x4f0   : > { %v1569_v16 = vpop.f32.mrf.mxu1 }
 0x4f1   : > { %v1570_v17 = vadd.f32 %v3891_v15, %v1569_v16 }
 0x4f2   : > { %v2744_v18 = vpop.f32.mrf.mxu1 }
 0x4f3   : > { %v1633_v19 = vmax.f32 %v1570_v17, 0.0 }
 0x4f4   : > { %v1574_v20 = vpop.f32.mrf.mxu1 }
 0x4f5   : > { %v1575_v21 = vadd.f32 %v3891_v15, %v1574_v20  ;;  %2814 = vmatmul.mubr.f32.vlgmr.msra.gmra.mxu0 %v1633_v19 }
 0x4f6   : > { %v2747_v22 = vpop.f32.mrf.mxu1  ;;  %2816 = vmatprep.mubr.msk.f32.mxu0 %vm3066_vm0, %v3065_v0 }
 0x4f7   : > { %v1634_v23 = vmax.f32 %v1575_v21, 0.0 }
 0x4f8   : > { %v1579_v24 = vpop.f32.mrf.mxu1 }
 0x4f9   : > { %v1580_v25 = vadd.f32 %v3891_v15, %v1579_v24  ;;  %2817 = vmatmul.mubr.f32.gmra.mxu0 %v1634_v23 }
 0x4fa   : > { %v2750_v26 = vpop.f32.mrf.mxu1  ;;  %2819 = vmatprep.mubr.msk.f32.mxu0 %vm3066_vm0, %v3065_v0 }
 0x4fb   : > { %v1635_v27 = vmax.f32 %v1580_v25, 0.0 }
 0x4fc   : > { %v1584_v28 = vpop.f32.mrf.mxu1 }
 0x4fd   : > { %v1585_v29 = vadd.f32 %v3891_v15, %v1584_v28  ;;  %2820 = vmatmul.mubr.f32.gmra.mxu0 %v1635_v27 }
 0x4fe   : > { %v2753_v30 = vpop.f32.mrf.mxu1  ;;  %2822 = vmatprep.mubr.msk.f32.mxu0 %vm3066_vm0, %v3065_v0 }
 0x4ff   : > { %v1636_v31 = vmax.f32 %v1585_v29, 0.0 }
 0x500   : > { %v1589_v32 = vpop.f32.mrf.mxu1 }
 0x501   : > { %v1590_v33 = vadd.f32 %v3891_v15, %v1589_v32  ;;  %2823 = vmatmul.mubr.f32.gmra.mxu0 %v1636_v31 }
 0x502   : > { %v2756_v34 = vpop.f32.mrf.mxu1  ;;  %2825 = vmatprep.mubr.msk.f32.mxu0 %vm3066_vm0, %v3065_v0 }
 0x503   : > { %v1637_v35 = vmax.f32 %v1590_v33, 0.0 }
 0x504   : > { %v1594_v36 = vpop.f32.mrf.mxu1 }
 0x505   : > { %v1595_v37 = vadd.f32 %v3891_v15, %v1594_v36  ;;  %2826 = vmatmul.mubr.f32.gmra.mxu0 %v1637_v35 }
 0x506   : > { %v2759_v38 = vpop.f32.mrf.mxu1  ;;  %2828 = vmatprep.mubr.msk.f32.mxu0 %vm3066_vm0, %v3065_v0 }
 0x507   : > { %v1638_v39 = vmax.f32 %v1595_v37, 0.0 }
 0x508   : > { %v1599_v40 = vpop.f32.mrf.mxu1 }
 0x509   : > { %v1600_v41 = vadd.f32 %v3891_v15, %v1599_v40  ;;  %2829 = vmatmul.mubr.f32.gmra.mxu0 %v1638_v39 }
 0x50a   : > { %v2762_v42 = vpop.f32.mrf.mxu1  ;;  %2831 = vmatprep.mubr.msk.f32.mxu0 %vm3066_vm0, %v3065_v0 }
 0x50b   : > { %v1639_v43 = vmax.f32 %v1600_v41, 0.0 }
 0x50c   : > { %v1604_v44 = vpop.f32.mrf.mxu1 }
 0x50d   : > { %v1605_v45 = vadd.f32 %v3891_v15, %v1604_v44  ;;  %2832 = vmatmul.mubr.f32.gmra.mxu0 %v1639_v43 }
 0x50e   : > { %v2765_v46 = vpop.f32.mrf.mxu1  ;;  %2834 = vmatprep.mubr.msk.f32.mxu0 %vm3066_vm0, %v3065_v0 }
 0x50f   : > { %v1640_v47 = vmax.f32 %v1605_v45, 0.0 }
 0x510   : > { %v1609_v48 = vpop.f32.mrf.mxu1 }
 0x511   : > { %v1610_v49 = vadd.f32 %v3891_v15, %v1609_v48  ;;  %2835 = vmatmul.mubr.f32.gmra.mxu0 %v1640_v47 }
 0x512   : > { %v2768_v50 = vpop.f32.mrf.mxu1  ;;  %2837 = vmatprep.mubr.msk.f32.mxu0 %vm3066_vm0, %v3065_v0 }
 0x513   : > { %v1641_v51 = vmax.f32 %v1610_v49, 0.0 }
 0x514   : > { %v1614_v52 = vpop.f32.mrf.mxu1 }
 0x515   : > { %v1615_v53 = vadd.f32 %v3891_v15, %v1614_v52  ;;  %2838 = vmatmul.mubr.f32.gmra.mxu0 %v1641_v51 }
 0x516   : > { %v2771_v54 = vpop.f32.mrf.mxu1  ;;  %2840 = vmatprep.mubr.msk.f32.mxu0 %vm3066_vm0, %v3065_v0 }
 0x517   : > { %v1642_v55 = vmax.f32 %v1615_v53, 0.0 }
 0x518   : > { %v1619_v56 = vpop.f32.mrf.mxu1 }
 0x519   : > { %v1620_v57 = vadd.f32 %v3891_v15, %v1619_v56  ;;  %2841 = vmatmul.mubr.f32.gmra.mxu0 %v1642_v55 }
 0x51a   : > { %v2774_v58 = vpop.f32.mrf.mxu1  ;;  %2843 = vmatprep.mubr.msk.f32.mxu0 %vm3066_vm0, %v3065_v0 }
 0x51b   : > { %v1643_v59 = vmax.f32 %v1620_v57, 0.0 }
 0x51c   : > { %v1624_v60 = vpop.f32.mrf.mxu1 }
 0x51d   : > { %v1625_v61 = vadd.f32 %v3891_v15, %v1624_v60  ;;  %2844 = vmatmul.mubr.f32.gmra.mxu0 %v1643_v59  ;;  %v2120_v59 = vld [vmem:[%s4016_s16] ss:$0 sm:$0xff] }
 0x51e   : > { %v2777_v62 = vpop.f32.mrf.mxu1  ;;  %2846 = vmatprep.mubr.msk.f32.mxu0 %vm3066_vm0, %v3065_v0 }
 0x51f   : > { %v1644_v63 = vmax.f32 %v1625_v61, 0.0 }
 0x520   : > { %v1629_v1 = vpop.f32.mrf.mxu1 }
 0x521   : > { %v1630_v2 = vadd.f32 %v3891_v15, %v1629_v1  ;;  %2847 = vmatmul.mubr.f32.gmra.mxu0 %v1644_v63 }
 0x522   : > { %v2780_v3 = vpop.f32.mrf.mxu1  ;;  %2849 = vmatprep.mubr.msk.f32.mxu0 %vm3066_vm0, %v3065_v0 }
 0x523   : > { %v1645_v4 = vmax.f32 %v1630_v2, 0.0 }
 0x525   : > { %2850 = vmatmul.mubr.f32.gmra.mxu0 %v1645_v4 }
 0x5b5   : > { %v1735_v7 = vpop.f32.mrf.mxu0 }
 0x5b6   : > { %v1736_v8 = vadd.f32 %v3936_v6, %v1735_v7 }
 0x5b7   : > { %v2815_v9 = vpop.f32.mrf.mxu0 }
 0x5b8   : > { %v1799_v10 = vmax.f32 %v1736_v8, 0.0 }
 0x5b9   : > { %v1740_v11 = vpop.f32.mrf.mxu0 }
 0x5ba   : > { %v1741_v12 = vadd.f32 %v3936_v6, %v1740_v11  ;;  %2885 = vmatmul.mubr.f32.vlgmr.msra.gmra.mxu1 %v1799_v10 }
 0x5bb   : > { %v2818_v13 = vpop.f32.mrf.mxu0  ;;  %2887 = vmatprep.mubr.msk.f32.mxu1 %vm3066_vm0, %v3065_v0 }
 0x5bc   : > { %v1800_v14 = vmax.f32 %v1741_v12, 0.0 }
 0x5bd   : > { %v1745_v15 = vpop.f32.mrf.mxu0 }
 0x5be   : > { %v1746_v16 = vadd.f32 %v3936_v6, %v1745_v15  ;;  %2888 = vmatmul.mubr.f32.gmra.mxu1 %v1800_v14 }
 0x5bf   : > { %v2821_v17 = vpop.f32.mrf.mxu0  ;;  %2890 = vmatprep.mubr.msk.f32.mxu1 %vm3066_vm0, %v3065_v0 }
 0x5c0   : > { %v1801_v18 = vmax.f32 %v1746_v16, 0.0 }
 0x5c1   : > { %v1750_v19 = vpop.f32.mrf.mxu0 }
 0x5c2   : > { %v1751_v20 = vadd.f32 %v3936_v6, %v1750_v19  ;;  %2891 = vmatmul.mubr.f32.gmra.mxu1 %v1801_v18 }
 0x5c3   : > { %v2824_v21 = vpop.f32.mrf.mxu0  ;;  %2893 = vmatprep.mubr.msk.f32.mxu1 %vm3066_vm0, %v3065_v0 }
 0x5c4   : > { %v1802_v22 = vmax.f32 %v1751_v20, 0.0 }
 0x5c5   : > { %v1755_v23 = vpop.f32.mrf.mxu0 }
 0x5c6   : > { %v1756_v24 = vadd.f32 %v3936_v6, %v1755_v23  ;;  %2894 = vmatmul.mubr.f32.gmra.mxu1 %v1802_v22 }
 0x5c7   : > { %v2827_v25 = vpop.f32.mrf.mxu0  ;;  %2896 = vmatprep.mubr.msk.f32.mxu1 %vm3066_vm0, %v3065_v0 }
 0x5c8   : > { %v1803_v26 = vmax.f32 %v1756_v24, 0.0 }
 0x5c9   : > { %v1760_v27 = vpop.f32.mrf.mxu0 }
 0x5ca   : > { %v1761_v28 = vadd.f32 %v3936_v6, %v1760_v27  ;;  %2897 = vmatmul.mubr.f32.gmra.mxu1 %v1803_v26 }
 0x5cb   : > { %v2830_v29 = vpop.f32.mrf.mxu0  ;;  %2899 = vmatprep.mubr.msk.f32.mxu1 %vm3066_vm0, %v3065_v0 }
 0x5cc   : > { %v1804_v30 = vmax.f32 %v1761_v28, 0.0 }
 0x5cd   : > { %v1765_v31 = vpop.f32.mrf.mxu0 }
 0x5ce   : > { %v1766_v32 = vadd.f32 %v3936_v6, %v1765_v31  ;;  %2900 = vmatmul.mubr.f32.gmra.mxu1 %v1804_v30 }
 0x5cf   : > { %v2833_v33 = vpop.f32.mrf.mxu0  ;;  %2902 = vmatprep.mubr.msk.f32.mxu1 %vm3066_vm0, %v3065_v0 }
 0x5d0   : > { %v1805_v34 = vmax.f32 %v1766_v32, 0.0 }
 0x5d1   : > { %v1770_v35 = vpop.f32.mrf.mxu0 }
 0x5d2   : > { %v1771_v36 = vadd.f32 %v3936_v6, %v1770_v35  ;;  %2903 = vmatmul.mubr.f32.gmra.mxu1 %v1805_v34 }
 0x5d3   : > { %v2836_v37 = vpop.f32.mrf.mxu0  ;;  %2905 = vmatprep.mubr.msk.f32.mxu1 %vm3066_vm0, %v3065_v0 }
 0x5d4   : > { %v1806_v38 = vmax.f32 %v1771_v36, 0.0 }
 0x5d5   : > { %v1775_v39 = vpop.f32.mrf.mxu0 }
 0x5d6   : > { %v1776_v40 = vadd.f32 %v3936_v6, %v1775_v39  ;;  %2906 = vmatmul.mubr.f32.gmra.mxu1 %v1806_v38 }
 0x5d7   : > { %v2839_v41 = vpop.f32.mrf.mxu0  ;;  %2908 = vmatprep.mubr.msk.f32.mxu1 %vm3066_vm0, %v3065_v0 }
 0x5d8   : > { %v1807_v42 = vmax.f32 %v1776_v40, 0.0 }
 0x5d9   : > { %v1780_v43 = vpop.f32.mrf.mxu0 }
 0x5da   : > { %v1781_v44 = vadd.f32 %v3936_v6, %v1780_v43  ;;  %2909 = vmatmul.mubr.f32.gmra.mxu1 %v1807_v42 }
 0x5db   : > { %v2842_v45 = vpop.f32.mrf.mxu0  ;;  %2911 = vmatprep.mubr.msk.f32.mxu1 %vm3066_vm0, %v3065_v0 }
 0x5dc   : > { %v1808_v46 = vmax.f32 %v1781_v44, 0.0 }
 0x5dd   : > { %v1785_v47 = vpop.f32.mrf.mxu0 }
 0x5de   : > { %v1786_v48 = vadd.f32 %v3936_v6, %v1785_v47  ;;  %2912 = vmatmul.mubr.f32.gmra.mxu1 %v1808_v46 }
 0x5df   : > { %v2845_v49 = vpop.f32.mrf.mxu0  ;;  %2914 = vmatprep.mubr.msk.f32.mxu1 %vm3066_vm0, %v3065_v0 }
 0x5e0   : > { %v1809_v50 = vmax.f32 %v1786_v48, 0.0 }
 0x5e1   : > { %v1790_v51 = vpop.f32.mrf.mxu0 }
 0x5e2   : > { %v1791_v52 = vadd.f32 %v3936_v6, %v1790_v51  ;;  %2915 = vmatmul.mubr.f32.gmra.mxu1 %v1809_v50 }
 0x5e3   : > { %v2848_v53 = vpop.f32.mrf.mxu0  ;;  %2917 = vmatprep.mubr.msk.f32.mxu1 %vm3066_vm0, %v3065_v0 }
 0x5e4   : > { %v1810_v54 = vmax.f32 %v1791_v52, 0.0 }
 0x5e5   : > { %v1795_v55 = vpop.f32.mrf.mxu0 }
 0x5e6   : > { %v1796_v56 = vadd.f32 %v3936_v6, %v1795_v55  ;;  %2918 = vmatmul.mubr.f32.gmra.mxu1 %v1810_v54 }
 0x5e7   : > { %v2851_v57 = vpop.f32.mrf.mxu0  ;;  %2920 = vmatprep.mubr.msk.f32.mxu1 %vm3066_vm0, %v3065_v0 }
 0x5e8   : > { %v1811_v58 = vmax.f32 %v1796_v56, 0.0 }
 0x5ea   : > { %2921 = vmatmul.mubr.f32.gmra.mxu1 %v1811_v58 }
 0x67a   : > { %v1901_v60 = vpop.f32.mrf.mxu1 }
 0x67b   : > { %v1902_v61 = vadd.f32 %v2120_v59, %v1901_v60 }
 0x67c   : > { %v2886_v62 = vpop.f32.mrf.mxu1 }
 0x67d   : > { %1965 = vst [vmem:[%s3982_s25] sm:$0xff] %v1902_v61 }
 0x67e   : > { %v1906_v0 = vpop.f32.mrf.mxu1 }
 0x67f   : > { %v1907_v63 = vadd.f32 %v2120_v59, %v1906_v0 }
 0x680   : > { %v2889_v1 = vpop.f32.mrf.mxu1 }
 0x681   : > { %1966 = vst [vmem:[%s3982_s25 + $0x8] sm:$0xff] %v1907_v63 }
 0x682   : > { %v1911_v2 = vpop.f32.mrf.mxu1 }
 0x683   : > { %v1912_v3 = vadd.f32 %v2120_v59, %v1911_v2 }
 0x684   : > { %v2892_v4 = vpop.f32.mrf.mxu1 }
 0x685   : > { %1967 = vst [vmem:[%s3982_s25 + $0x10] sm:$0xff] %v1912_v3 }
 0x686   : > { %v1916_v5 = vpop.f32.mrf.mxu1 }
 0x687   : > { %v1917_v6 = vadd.f32 %v2120_v59, %v1916_v5 }
 0x688   : > { %v2895_v7 = vpop.f32.mrf.mxu1 }
 0x689   : > { %1968 = vst [vmem:[%s3982_s25 + $0x18] sm:$0xff] %v1917_v6 }
 0x68a   : > { %v1921_v8 = vpop.f32.mrf.mxu1 }
 0x68b   : > { %v1922_v9 = vadd.f32 %v2120_v59, %v1921_v8 }
 0x68c   : > { %v2898_v10 = vpop.f32.mrf.mxu1 }
 0x68d   : > { %1969 = vst [vmem:[%s3982_s25 + $0x20] sm:$0xff] %v1922_v9 }
 0x68e   : > { %v1926_v11 = vpop.f32.mrf.mxu1 }
 0x68f   : > { %v1927_v12 = vadd.f32 %v2120_v59, %v1926_v11 }
 0x690   : > { %v2901_v13 = vpop.f32.mrf.mxu1 }
 0x691   : > { %1970 = vst [vmem:[%s3982_s25 + $0x28] sm:$0xff] %v1927_v12 }
 0x692   : > { %v1931_v14 = vpop.f32.mrf.mxu1 }
 0x693   : > { %v1932_v15 = vadd.f32 %v2120_v59, %v1931_v14 }
 0x694   : > { %v2904_v16 = vpop.f32.mrf.mxu1 }
 0x695   : > { %1971 = vst [vmem:[%s3982_s25 + $0x30] sm:$0xff] %v1932_v15 }
 0x696   : > { %v1936_v17 = vpop.f32.mrf.mxu1 }
 0x697   : > { %v1937_v18 = vadd.f32 %v2120_v59, %v1936_v17 }
 0x698   : > { %v2907_v19 = vpop.f32.mrf.mxu1 }
 0x699   : > { %1972 = vst [vmem:[%s3982_s25 + $0x38] sm:$0xff] %v1937_v18 }
 0x69a   : > { %v1941_v20 = vpop.f32.mrf.mxu1 }
 0x69b   : > { %v1942_v21 = vadd.f32 %v2120_v59, %v1941_v20 }
 0x69c   : > { %v2910_v22 = vpop.f32.mrf.mxu1 }
 0x69d   : > { %1973 = vst [vmem:[%s3982_s25 + $0x40] sm:$0xff] %v1942_v21 }
 0x69e   : > { %v1946_v23 = vpop.f32.mrf.mxu1 }
 0x69f   : > { %v1947_v24 = vadd.f32 %v2120_v59, %v1946_v23 }
 0x6a0   : > { %v2913_v25 = vpop.f32.mrf.mxu1 }
 0x6a1   : > { %1974 = vst [vmem:[%s3982_s25 + $0x48] sm:$0xff] %v1947_v24 }
 0x6a2   : > { %v1951_v26 = vpop.f32.mrf.mxu1 }
 0x6a3   : > { %v1952_v27 = vadd.f32 %v2120_v59, %v1951_v26 }
 0x6a4   : > { %v2916_v28 = vpop.f32.mrf.mxu1 }
 0x6a5   : > { %1975 = vst [vmem:[%s3982_s25 + $0x50] sm:$0xff] %v1952_v27 }
 0x6a6   : > { %v1956_v29 = vpop.f32.mrf.mxu1 }
 0x6a7   : > { %v1957_v30 = vadd.f32 %v2120_v59, %v1956_v29 }
 0x6a8   : > { %v2919_v31 = vpop.f32.mrf.mxu1 }
 0x6a9   : > { %1976 = vst [vmem:[%s3982_s25 + $0x58] sm:$0xff] %v1957_v30 }
 0x6aa   : > { %v1961_v32 = vpop.f32.mrf.mxu1 }
 0x6ab   : > { %v1962_v33 = vadd.f32 %v2120_v59, %v1961_v32 }
 0x6ac   : > { %v2922_v34 = vpop.f32.mrf.mxu1 }
 0x6ad   : > { %1977 = vst [vmem:[%s3982_s25 + $0x60] sm:$0xff] %v1962_v33 }
 0x6ae PF: > { %s31_s27 = sadd.s32 1, %s3058_s27  }
 0x6af   : > { %p28_p3 = scmp.ge.s32.totalorder %s31_s27, 4  }
 0x6b1   :  { %30 = sbr.rel (!%p28_p3) target bundleno = 6 (0x6), region = 143 }
 0x6b6   :  { %2017 = vsyncpa [#allocation3], 1 }
 0x6b7   :  { %2019 = vsyncpa [#allocation3 + $0x1], 1 }
 0x6b8   :  { %2020 = vsyncpa [#allocation5], 1 }

// kernel: ae_forward.1
= control target key start
LH: loop header
LB: loop body
LE: loop exit
PB: predicated region body
PF: predicated region fallthrough
CT: control target
= control target key end

     0   :  { %s4000_s0 = inlined_call_operand.vmem [shape: f32[208,128], index: 0, kind: input, shape index: {}]   ;;  %s4001_s1 = inlined_call_operand.hbm [shape: f32[128,128], index: 1, kind: input, shape index: {}]   ;;  %s4002_s2 = inlined_call_operand.vmem [shape: f32[1,128], index: 2, kind: input, shape index: {}]   ;;  %s4003_s3 = inlined_call_operand.hbm [shape: f32[128,128], index: 3, kind: input, shape index: {}]   ;;  %s4004_s4 = inlined_call_operand.vmem [shape: f32[1,128], index: 4, kind: input, shape index: {}]   ;;  %s4005_s5 = inlined_call_operand.hbm [shape: f32[128,128], index: 5, kind: input, shape index: {}]   ;;  %s4006_s6 = inlined_call_operand.vmem [shape: f32[1,128], index: 6, kind: input, shape index: {}]   ;;  %s4007_s7 = inlined_call_operand.vmem [shape: f32[128,128], index: 7, kind: input, shape index: {}]   ;;  %s4008_s8 = inlined_call_operand.vmem [shape: f32[1,128], index: 8, kind: input, shape index: {}]   ;;  %s4009_s9 = inlined_call_operand.vmem [shape: f32[128,128], index: 9, kind: input, shape index: {}]   ;;  %s4010_s10 = inlined_call_operand.vmem [shape: f32[1,128], index: 10, kind: input, shape index: {}]   ;;  %s4011_s11 = inlined_call_operand.vmem [shape: f32[128,128], index: 11, kind: input, shape index: {}]   ;;  %s4012_s12 = inlined_call_operand.vmem [shape: f32[1,128], index: 12, kind: input, shape index: {}]   ;;  %s4013_s13 = inlined_call_operand.vmem [shape: f32[128,128], index: 13, kind: input, shape index: {}]   ;;  %s4014_s14 = inlined_call_operand.vmem [shape: f32[1,128], index: 14, kind: input, shape index: {}]   ;;  %s4015_s15 = inlined_call_operand.vmem [shape: f32[128,128], index: 15, kind: input, shape index: {}]   ;;  %s4016_s16 = inlined_call_operand.vmem [shape: f32[1,128], index: 16, kind: input, shape index: {}]   ;;  %s4017_s17 = inlined_call_operand.vmem [shape: f32[208,128], index: 17, kind: output, shape index: {0}]   ;;  %s4018_s18 = inlined_call_operand.vmem [shape: f32[208,128], index: 18, kind: output, shape index: {1}]  }
   0x1   :  { %4020 = sst [smem:[#allocation9_spill]] %s4000_s0 }
   0x2   :  { %4021 = sst [smem:[#allocation10_spill]] %s4001_s1 }
   0x3   :  { %4022 = sst [smem:[#allocation11_spill]] %s4002_s2 }
   0x4   :  { %24 = vsyncpa [#allocation3], 0 }
   0x5   :  { %25 = vsyncpa [#allocation5], 0  ;;  %s3162_s27 = smov 0  }
   0x6 LB: > { %s4019_s28 = sadd.s32 4294967295, %s3058_s27   ;;  %p2101_p0 = scmp.ge.s32.totalorder %s3058_s27, 1  ;;  %s3058_s27 = sphi %s3162_s27, %s31_s27  }
   0x7   : > { %p450_p1 = scmp.lt.s32.totalorder %s3058_s27, 3  ;;  %p3172_p2 = scmp.eq.s32.totalorder %s4019_s28, 0 }
   0x8   : > { %s3060_s0 = smov [#allocation4]   ;;  %s3061_s1 = smov [#allocation2]  }
   0x9   : > { %p3176_p3 = pnand %p2101_p0, %p450_p1  ;;  %s478_s19 = sshll.u32 %s3060_s0, 4  ;;  %s479_s19 = int_to_ptr.vmem [resolvable:$true] %s478_s19 }
   0xa   : > { %s462_s20 = sshll.u32 %s3061_s1, 4  ;;  %s3062_s22 = smov [#allocation6]   ;;  %s463_s20 = int_to_ptr.vmem [resolvable:$true] %s462_s20 }
   0xb   : > { %p2935_p4 = pneg %p3176_p3  ;;  %s494_s2 = sshll.u32 %s3062_s22, 4  ;;  %s3188_s2 = int_to_ptr.vmem [resolvable:$true] %s494_s2 }
   0xc   : > { %s2977_s23 = scalar_lea.vmem %s479_s19, 2048  ;;  %p2985_p10 = scmp.lt.s32.totalorder %s479_s19, %s479_s19 }
   0xd   : > { %p3184_p5 = pnand %p3172_p2, %p2935_p4  ;;  %p2978_p7 = scmp.ne.s32.totalorder %s479_s19, %s2977_s23 }
   0xe   : > { %p2986_p11 = scmp.lt.s32.totalorder %s2977_s23, %s2977_s23 }
   0xf   : > { %p2968_p6 = pneg %p3184_p5 }
  0x10   : > { %p2987_p12 = por %p2986_p11, %p2985_p10 }
  0x11   : > { %p2980_p8 = pnand %p2978_p7, %p2968_p6 }
  0x13   : > { %p2981_p9 = pneg %p2980_p8 }
  0x15   : > { %p2988_p13 = pnand %p2987_p12, %p2981_p9 }
  0x17   : > { %2991 = shalt.err (!%p2988_p13)
}
  0x18   : > { %s3063_s24 = smov 128   ;;  %s3064_s25 = smov 8  }
  0x19   : > { %2941 = dma.hbm_to_vmem [thread:$0]  (!%p3184_p5), %s4003_s3, 2048, %s479_s19, [#allocation5], %s3063_s24, %s3063_s24, %s3064_s25  }
  0x1a   : > { %s3003_s1 = scalar_lea.vmem %s463_s20, 2048  ;;  %p3011_p7 = scmp.lt.s32.totalorder %s463_s20, %s463_s20 }
  0x1b   : > { %p3004_p0 = scmp.ne.s32.totalorder %s463_s20, %s3003_s1  ;;  %p3012_p8 = scmp.lt.s32.totalorder %s3003_s1, %s3003_s1 }
  0x1d   : > { %p3006_p1 = pnand %p3004_p0, %p2968_p6  ;;  %p3013_p10 = por %p3012_p8, %p3011_p7 }
  0x1f   : > { %p3007_p4 = pneg %p3006_p1 }
  0x21   : > { %p3014_p9 = pnand %p3013_p10, %p3007_p4 }
  0x23   : > { %3017 = shalt.err (!%p3014_p9)
}
  0x24   : > { %s4026_s28 = sld [smem:[#allocation10_spill]]  ;;  %s3029_s19 = scalar_lea.vmem %s3188_s2, 2048 }
  0x25   : > { %p3030_p11 = scmp.ne.s32.totalorder %s3188_s2, %s3029_s19  ;;  %p3037_p0 = scmp.lt.s32.totalorder %s3188_s2, %s3188_s2 }
  0x26   : > { %p3038_p1 = scmp.lt.s32.totalorder %s3029_s19, %s3029_s19 }
  0x27   : > { %p3032_p12 = pnand %p3030_p11, %p2968_p6 }
  0x28   : > { %p3039_p4 = por %p3038_p1, %p3037_p0 }
  0x29   : > { %p3033_p13 = pneg %p3032_p12 }
  0x2a   : > { %2938 = dma.hbm_to_vmem [thread:$0]  (!%p3184_p5), %s4026_s28, 2048, %s463_s20, [#allocation3], %s3063_s24, %s3063_s24, %s3064_s25  }
  0x2b   : > { %p3040_p7 = pnand %p3039_p4, %p3033_p13 }
  0x2d   : > { %3043 = shalt.err (!%p3040_p7)
}
  0x2e   : > { %2944 = dma.hbm_to_vmem [thread:$0]  (!%p3184_p5), %s4005_s5, 2048, %s3188_s2, [#allocation5], %s3063_s24, %s3063_s24, %s3064_s25  }
  0x2f   : > { %552 = sbr.rel (%p3176_p3) target bundleno = 1710 (0x6ae), region = 88 }
  0x34   : > { %3049 = dma.done.wait (%p3172_p2), [#allocation3], 2048  }
  0x35   : > { %3051 = vsyncadd (%p3172_p2), [#allocation3], 4294965248 }
  0x36   : > { %3053 = dma.done.wait (%p3172_p2), [#allocation5], 4096  }
  0x37   : > { %3055 = vsyncadd (%p3172_p2), [#allocation5], 4294963200  ;;  %v3065_v0 = vmov 0.0   ;;  %vm3066_vm0 = vmmov 0   ;;  %v665_v1 = vld [vmem:[#allocation2 + $0x78] sm:$0xff]  ;;  %v664_v2 = vld [vmem:[#allocation2 + $0x70] sm:$0xff] }
  0x38   : > { %2355 = vmatprep.subr.mxu0 %v3065_v0  ;;  %2387 = vmatprep.mubr.msk.f32.mxu0 %vm3066_vm0, %v3065_v0  ;;  %v663_v3 = vld [vmem:[#allocation2 + $0x68] sm:$0xff]  ;;  %v662_v4 = vld [vmem:[#allocation2 + $0x60] sm:$0xff]  ;;  %v661_v5 = vld [vmem:[#allocation2 + $0x58] sm:$0xff]  ;;  %s4027_s28 = sadd.s32 4294967295, %s3058_s27   ;;  %s4028_s2 = sld [smem:[#allocation9_spill]] }
  0x39   : > { %2426 = vmatprep.subr.mxu1 %v3065_v0  ;;  %2458 = vmatprep.mubr.msk.f32.mxu1 %vm3066_vm0, %v3065_v0  ;;  %v660_v6 = vld [vmem:[#allocation2 + $0x50] sm:$0xff]  ;;  %v831_v7 = vld [vmem:[#allocation4 + $0x78] sm:$0xff]  ;;  %v659_v8 = vld [vmem:[#allocation2 + $0x48] sm:$0xff]  ;;  %s619_s29 = smul.u32 13, %s4027_s28  ;;  %s4029_s22 = sld [smem:[#allocation11_spill]] }
  0x3a   : > { %2356 = vmatpush3.msra.mxu0 %v665_v1  ;;  %2427 = vmatpush3.msra.mxu1 %v831_v7  ;;  %v830_v9 = vld [vmem:[#allocation4 + $0x70] sm:$0xff]  ;;  %v829_v10 = vld [vmem:[#allocation4 + $0x68] sm:$0xff]  ;;  %v658_v11 = vld [vmem:[#allocation2 + $0x40] sm:$0xff] }
  0x3b   : > { %2357 = vmatprep.subr.mxu0 %v3065_v0  ;;  %2428 = vmatprep.subr.mxu1 %v3065_v0  ;;  %v828_v12 = vld [vmem:[#allocation4 + $0x60] sm:$0xff]  ;;  %v657_v13 = vld [vmem:[#allocation2 + $0x38] sm:$0xff]  ;;  %p620_p2 = scmp.lt.s32.totalorder %s619_s29, 25  ;;  %v656_v15 = vld [vmem:[#allocation2 + $0x30] sm:$0xff] }
  0x3c   : > { %2358 = vmatpush3.msra.mxu0 %v664_v2  ;;  %2429 = vmatpush3.msra.mxu1 %v830_v9  ;;  %v827_v14 = vld [vmem:[#allocation4 + $0x58] sm:$0xff]  ;;  %v826_v16 = vld [vmem:[#allocation4 + $0x50] sm:$0xff]  ;;  %v655_v17 = vld [vmem:[#allocation2 + $0x28] sm:$0xff] }
  0x3d   : > { %2359 = vmatprep.subr.mxu0 %v3065_v0  ;;  %2430 = vmatprep.subr.mxu1 %v3065_v0  ;;  %s4031_s29 = smov (!%p620_p2, %s619_s29), 25  ;;  %v825_v18 = vld [vmem:[#allocation4 + $0x48] sm:$0xff]  ;;  %v654_v19 = vld [vmem:[#allocation2 + $0x20] sm:$0xff]  ;;  %v653_v21 = vld [vmem:[#allocation2 + $0x18] sm:$0xff] }
  0x3e   : > { %2360 = vmatpush3.msra.mxu0 %v663_v3  ;;  %2431 = vmatpush3.msra.mxu1 %v829_v10  ;;  %v824_v20 = vld [vmem:[#allocation4 + $0x40] sm:$0xff]  ;;  %s3256_s30 = sshll.u32 %s4031_s29, 3  ;;  %v823_v22 = vld [vmem:[#allocation4 + $0x38] sm:$0xff]  ;;  %v652_v23 = vld [vmem:[#allocation2 + $0x10] sm:$0xff] }
  0x3f   : > { %2361 = vmatprep.subr.mxu0 %v3065_v0  ;;  %2432 = vmatprep.subr.mxu1 %v3065_v0  ;;  %v822_v24 = vld [vmem:[#allocation4 + $0x30] sm:$0xff]  ;;  %v651_v25 = vld [vmem:[#allocation2 + $0x8] sm:$0xff]  ;;  %s3266_s24 = scalar_lea.vmem %s4028_s2, %s3256_s30  ;;  %v650_v27 = vld [vmem:[#allocation2] sm:$0xff]  ;;  %s3663_s1 = scalar_lea.vmem %s4018_s18, %s3256_s30 }
  0x40   : > { %2362 = vmatpush3.msra.mxu0 %v662_v4  ;;  %2433 = vmatpush3.msra.mxu1 %v828_v12  ;;  %v821_v26 = vld [vmem:[#allocation4 + $0x28] sm:$0xff]  ;;  %v637_v28 = vld [vmem:[%s3266_s24] sm:$0xff]  ;;  %v819_v30 = vld [vmem:[#allocation4 + $0x18] sm:$0xff]  ;;  %s3982_s25 = scalar_lea.vmem %s4017_s17, %s3256_s30 }
  0x41   : > { %2363 = vmatprep.subr.mxu0 %v3065_v0  ;;  %2434 = vmatprep.subr.mxu1 %v3065_v0  ;;  %v820_v29 = vld [vmem:[#allocation4 + $0x20] sm:$0xff]  ;;  %v638_v31 = vld [vmem:[%s3266_s24 + $0x8] sm:$0xff]  ;;  %v639_v32 = vld [vmem:[%s3266_s24 + $0x10] sm:$0xff] }
  0x42   : > { %2364 = vmatpush3.msra.mxu0 %v661_v5  ;;  %2435 = vmatpush3.msra.mxu1 %v827_v14  ;;  %v640_v33 = vld [vmem:[%s3266_s24 + $0x18] sm:$0xff]  ;;  %v641_v34 = vld [vmem:[%s3266_s24 + $0x20] sm:$0xff]  ;;  %v642_v35 = vld [vmem:[%s3266_s24 + $0x28] sm:$0xff] }
  0x43   : > { %2365 = vmatprep.subr.mxu0 %v3065_v0  ;;  %2436 = vmatprep.subr.mxu1 %v3065_v0  ;;  %v643_v36 = vld [vmem:[%s3266_s24 + $0x30] sm:$0xff]  ;;  %v644_v37 = vld [vmem:[%s3266_s24 + $0x38] sm:$0xff]  ;;  %v645_v38 = vld [vmem:[%s3266_s24 + $0x40] sm:$0xff] }
  0x44   : > { %2366 = vmatpush3.msra.mxu0 %v660_v6  ;;  %2437 = vmatpush3.msra.mxu1 %v826_v16  ;;  %v646_v39 = vld [vmem:[%s3266_s24 + $0x48] sm:$0xff]  ;;  %v647_v40 = vld [vmem:[%s3266_s24 + $0x50] sm:$0xff]  ;;  %v648_v41 = vld [vmem:[%s3266_s24 + $0x58] sm:$0xff] }
  0x45   : > { %2367 = vmatprep.subr.mxu0 %v3065_v0  ;;  %2438 = vmatprep.subr.mxu1 %v3065_v0  ;;  %v649_v42 = vld [vmem:[%s3266_s24 + $0x60] sm:$0xff]  ;;  %v818_v43 = vld [vmem:[#allocation4 + $0x10] sm:$0xff]  ;;  %v817_v44 = vld [vmem:[#allocation4 + $0x8] sm:$0xff] }
  0x46   : > { %2368 = vmatpush3.msra.mxu0 %v659_v8  ;;  %2439 = vmatpush3.msra.mxu1 %v825_v18  ;;  %v816_v45 = vld [vmem:[#allocation4] sm:$0xff]  ;;  %v997_v46 = vld [vmem:[#allocation6 + $0x78] sm:$0xff]  ;;  %v996_v47 = vld [vmem:[#allocation6 + $0x70] sm:$0xff] }
  0x47   : > { %2369 = vmatprep.subr.mxu0 %v3065_v0  ;;  %2440 = vmatprep.subr.mxu1 %v3065_v0  ;;  %v995_v48 = vld [vmem:[#allocation6 + $0x68] sm:$0xff]  ;;  %v994_v49 = vld [vmem:[#allocation6 + $0x60] sm:$0xff]  ;;  %v993_v50 = vld [vmem:[#allocation6 + $0x58] sm:$0xff] }
  0x48   : > { %2370 = vmatpush3.msra.mxu0 %v658_v11  ;;  %2441 = vmatpush3.msra.mxu1 %v824_v20  ;;  %v992_v51 = vld [vmem:[#allocation6 + $0x50] sm:$0xff]  ;;  %v991_v52 = vld [vmem:[#allocation6 + $0x48] sm:$0xff]  ;;  %v990_v53 = vld [vmem:[#allocation6 + $0x40] sm:$0xff] }
  0x49   : > { %2371 = vmatprep.subr.mxu0 %v3065_v0  ;;  %2442 = vmatprep.subr.mxu1 %v3065_v0  ;;  %v989_v54 = vld [vmem:[#allocation6 + $0x38] sm:$0xff]  ;;  %v988_v55 = vld [vmem:[#allocation6 + $0x30] sm:$0xff]  ;;  %v987_v56 = vld [vmem:[#allocation6 + $0x28] sm:$0xff] }
  0x4a   : > { %2372 = vmatpush3.msra.mxu0 %v657_v13  ;;  %2443 = vmatpush3.msra.mxu1 %v823_v22  ;;  %v986_v57 = vld [vmem:[#allocation6 + $0x20] sm:$0xff]  ;;  %v985_v58 = vld [vmem:[#allocation6 + $0x18] sm:$0xff]  ;;  %v984_v59 = vld [vmem:[#allocation6 + $0x10] sm:$0xff] }
  0x4b   : > { %2373 = vmatprep.subr.mxu0 %v3065_v0  ;;  %2444 = vmatprep.subr.mxu1 %v3065_v0  ;;  %v983_v60 = vld [vmem:[#allocation6 + $0x8] sm:$0xff]  ;;  %v3336_v61 = vld [vmem:[%s4029_s22] ss:$0 sm:$0xff] }
  0x4c   : > { %2374 = vmatpush3.msra.mxu0 %v656_v15  ;;  %2445 = vmatpush3.msra.mxu1 %v822_v24 }
  0x4d   : > { %2375 = vmatprep.subr.mxu0 %v3065_v0  ;;  %2446 = vmatprep.subr.mxu1 %v3065_v0 }
  0x4e   : > { %2376 = vmatpush3.msra.mxu0 %v655_v17  ;;  %2447 = vmatpush3.msra.mxu1 %v821_v26 }
  0x4f   : > { %2377 = vmatprep.subr.mxu0 %v3065_v0  ;;  %2448 = vmatprep.subr.mxu1 %v3065_v0 }
  0x50   : > { %2378 = vmatpush3.msra.mxu0 %v654_v19  ;;  %2449 = vmatpush3.msra.mxu1 %v820_v29 }
  0x51   : > { %2379 = vmatprep.subr.mxu0 %v3065_v0  ;;  %2450 = vmatprep.subr.mxu1 %v3065_v0 }
  0x52   : > { %2380 = vmatpush3.msra.mxu0 %v653_v21  ;;  %2451 = vmatpush3.msra.mxu1 %v819_v30 }
  0x53   : > { %2381 = vmatprep.subr.mxu0 %v3065_v0  ;;  %2452 = vmatprep.subr.mxu1 %v3065_v0 }
  0x54   : > { %2382 = vmatpush3.msra.mxu0 %v652_v23  ;;  %2453 = vmatpush3.msra.mxu1 %v818_v43 }
  0x55   : > { %2383 = vmatprep.subr.mxu0 %v3065_v0  ;;  %2454 = vmatprep.subr.mxu1 %v3065_v0 }
  0x56   : > { %2384 = vmatpush3.msra.mxu0 %v651_v25  ;;  %2455 = vmatpush3.msra.mxu1 %v817_v44 }
  0x57   : > { %2385 = vmatprep.subr.mxu0 %v3065_v0  ;;  %2456 = vmatprep.subr.mxu1 %v3065_v0 }
  0x58   : > { %2386 = vmatpush3.msra.mxu0 %v650_v27  ;;  %2457 = vmatpush3.msra.mxu1 %v816_v45 }
  0x59   : > { %2388 = vmatmul.mubr.f32.vlgmr.msra.gmra.mxu0 %v637_v28  ;;  %2497 = vmatprep.subr.mxu0 %v3065_v0 }
  0x5a   : > { %2390 = vmatprep.mubr.msk.f32.mxu0 %vm3066_vm0, %v3065_v0  ;;  %2568 = vmatprep.subr.mxu1 %v3065_v0 }
  0x5b   : > { %2498 = vmatpush3.msra.mxu0 %v997_v46 }
  0x5c   : > { %2499 = vmatprep.subr.mxu0 %v3065_v0 }
  0x5d   : > { %2391 = vmatmul.mubr.f32.gmra.mxu0 %v638_v31 }
  0x5e   : > { %2393 = vmatprep.mubr.msk.f32.mxu0 %vm3066_vm0, %v3065_v0  ;;  %2500 = vmatpush3.msra.mxu0 %v996_v47 }
  0x5f   : > { %2501 = vmatprep.subr.mxu0 %v3065_v0 }
  0x60   : > { %2502 = vmatpush3.msra.mxu0 %v995_v48 }
  0x61   : > { %2394 = vmatmul.mubr.f32.gmra.mxu0 %v639_v32  ;;  %2503 = vmatprep.subr.mxu0 %v3065_v0 }
  0x62   : > { %2396 = vmatprep.mubr.msk.f32.mxu0 %vm3066_vm0, %v3065_v0  ;;  %2504 = vmatpush3.msra.mxu0 %v994_v49 }
  0x63   : > { %2505 = vmatprep.subr.mxu0 %v3065_v0 }
  0x64   : > { %2506 = vmatpush3.msra.mxu0 %v993_v50 }
  0x65   : > { %2397 = vmatmul.mubr.f32.gmra.mxu0 %v640_v33  ;;  %2507 = vmatprep.subr.mxu0 %v3065_v0 }
  0x66   : > { %2399 = vmatprep.mubr.msk.f32.mxu0 %vm3066_vm0, %v3065_v0  ;;  %2508 = vmatpush3.msra.mxu0 %v992_v51  ;;  %v982_v51 = vld [vmem:[#allocation6] sm:$0xff] }
  0x67   : > { %2509 = vmatprep.subr.mxu0 %v3065_v0 }
  0x68   : > { %2510 = vmatpush3.msra.mxu0 %v991_v52  ;;  %v1163_v52 = vld [vmem:[%s4007_s7 + $0x78] sm:$0xff] }
  0x69   : > { %2400 = vmatmul.mubr.f32.gmra.mxu0 %v641_v34  ;;  %2511 = vmatprep.subr.mxu0 %v3065_v0 }
  0x6a   : > { %2402 = vmatprep.mubr.msk.f32.mxu0 %vm3066_vm0, %v3065_v0  ;;  %2512 = vmatpush3.msra.mxu0 %v990_v53  ;;  %v1162_v53 = vld [vmem:[%s4007_s7 + $0x70] sm:$0xff] }
  0x6b   : > { %2513 = vmatprep.subr.mxu0 %v3065_v0 }
  0x6c   : > { %2514 = vmatpush3.msra.mxu0 %v989_v54  ;;  %v1161_v54 = vld [vmem:[%s4007_s7 + $0x68] sm:$0xff] }
  0x6d   : > { %2403 = vmatmul.mubr.f32.gmra.mxu0 %v642_v35  ;;  %2515 = vmatprep.subr.mxu0 %v3065_v0 }
  0x6e   : > { %2405 = vmatprep.mubr.msk.f32.mxu0 %vm3066_vm0, %v3065_v0  ;;  %2516 = vmatpush3.msra.mxu0 %v988_v55  ;;  %v1160_v55 = vld [vmem:[%s4007_s7 + $0x60] sm:$0xff] }
  0x6f   : > { %2517 = vmatprep.subr.mxu0 %v3065_v0 }
  0x70   : > { %2518 = vmatpush3.msra.mxu0 %v987_v56  ;;  %v1159_v56 = vld [vmem:[%s4007_s7 + $0x58] sm:$0xff] }
  0x71   : > { %2406 = vmatmul.mubr.f32.gmra.mxu0 %v643_v36  ;;  %2519 = vmatprep.subr.mxu0 %v3065_v0 }
  0x72   : > { %2408 = vmatprep.mubr.msk.f32.mxu0 %vm3066_vm0, %v3065_v0  ;;  %2520 = vmatpush3.msra.mxu0 %v986_v57  ;;  %v1158_v57 = vld [vmem:[%s4007_s7 + $0x50] sm:$0xff] }
  0x73   : > { %2521 = vmatprep.subr.mxu0 %v3065_v0 }
  0x74   : > { %2522 = vmatpush3.msra.mxu0 %v985_v58  ;;  %v1157_v58 = vld [vmem:[%s4007_s7 + $0x48] sm:$0xff] }
  0x75   : > { %2409 = vmatmul.mubr.f32.gmra.mxu0 %v644_v37  ;;  %2523 = vmatprep.subr.mxu0 %v3065_v0 }
  0x76   : > { %2411 = vmatprep.mubr.msk.f32.mxu0 %vm3066_vm0, %v3065_v0  ;;  %2524 = vmatpush3.msra.mxu0 %v984_v59  ;;  %v1156_v59 = vld [vmem:[%s4007_s7 + $0x40] sm:$0xff] }
  0x77   : > { %2525 = vmatprep.subr.mxu0 %v3065_v0 }
  0x78   : > { %2526 = vmatpush3.msra.mxu0 %v983_v60  ;;  %v1155_v60 = vld [vmem:[%s4007_s7 + $0x38] sm:$0xff] }
  0x79   : > { %2412 = vmatmul.mubr.f32.gmra.mxu0 %v645_v38  ;;  %2527 = vmatprep.subr.mxu0 %v3065_v0 }
  0x7a   : > { %2414 = vmatprep.mubr.msk.f32.mxu0 %vm3066_vm0, %v3065_v0  ;;  %2528 = vmatpush3.msra.mxu0 %v982_v51 }
  0x7b   : > { %2639 = vmatprep.subr.mxu0 %v3065_v0 }
  0x7d   : > { %2415 = vmatmul.mubr.f32.gmra.mxu0 %v646_v39 }
  0x7e   : > { %2417 = vmatprep.mubr.msk.f32.mxu0 %vm3066_vm0, %v3065_v0 }
  0x81   : > { %2418 = vmatmul.mubr.f32.gmra.mxu0 %v647_v40 }
  0x82   : > { %2420 = vmatprep.mubr.msk.f32.mxu0 %vm3066_vm0, %v3065_v0 }
  0x85   : > { %2421 = vmatmul.mubr.f32.gmra.mxu0 %v648_v41 }
  0x86   : > { %2423 = vmatprep.mubr.msk.f32.mxu0 %vm3066_vm0, %v3065_v0 }
  0x89   : > { %2424 = vmatmul.mubr.f32.gmra.mxu0 %v649_v42 }
  0x8a   : > { %2529 = vmatprep.mubr.msk.f32.mxu0 %vm3066_vm0, %v3065_v0 }
 0x119   : > { %v739_v62 = vpop.f32.mrf.mxu0 }
 0x11a   : > { %v740_v63 = vadd.f32 %v3336_v61, %v739_v62  ;;  %v1153_v62 = vld [vmem:[%s4007_s7 + $0x28] sm:$0xff] }
 0x11b   : > { %v2389_v1 = vpop.f32.mrf.mxu0 }
 0x11c   : > { %v803_v2 = vmax.f32 %v740_v63, 0.0  ;;  %v1152_v63 = vld [vmem:[%s4007_s7 + $0x20] sm:$0xff]  ;;  %v1151_v1 = vld [vmem:[%s4007_s7 + $0x18] sm:$0xff] }
 0x11d   : > { %v744_v3 = vpop.f32.mrf.mxu0 }
 0x11e   : > { %v745_v4 = vadd.f32 %v3336_v61, %v744_v3  ;;  %2459 = vmatmul.mubr.f32.vlgmr.msra.gmra.mxu1 %v803_v2  ;;  %v1150_v2 = vld [vmem:[%s4007_s7 + $0x10] sm:$0xff]  ;;  %v1149_v3 = vld [vmem:[%s4007_s7 + $0x8] sm:$0xff] }
 0x11f   : > { %v2392_v5 = vpop.f32.mrf.mxu0  ;;  %2461 = vmatprep.mubr.msk.f32.mxu1 %vm3066_vm0, %v3065_v0  ;;  %2569 = vmatpush3.msra.mxu1 %v1163_v52 }
 0x120   : > { %v804_v6 = vmax.f32 %v745_v4, 0.0  ;;  %2570 = vmatprep.subr.mxu1 %v3065_v0  ;;  %v3441_v4 = vld [vmem:[%s4004_s4] ss:$0 sm:$0xff] }
 0x121   : > { %v749_v7 = vpop.f32.mrf.mxu0  ;;  %2571 = vmatpush3.msra.mxu1 %v1162_v53 }
 0x122   : > { %v750_v8 = vadd.f32 %v3336_v61, %v749_v7  ;;  %2462 = vmatmul.mubr.f32.gmra.mxu1 %v804_v6  ;;  %2572 = vmatprep.subr.mxu1 %v3065_v0 }
 0x123   : > { %v2395_v9 = vpop.f32.mrf.mxu0  ;;  %2464 = vmatprep.mubr.msk.f32.mxu1 %vm3066_vm0, %v3065_v0  ;;  %2573 = vmatpush3.msra.mxu1 %v1161_v54 }
 0x124   : > { %v805_v10 = vmax.f32 %v750_v8, 0.0  ;;  %2574 = vmatprep.subr.mxu1 %v3065_v0 }
 0x125   : > { %v754_v11 = vpop.f32.mrf.mxu0  ;;  %2575 = vmatpush3.msra.mxu1 %v1160_v55 }
 0x126   : > { %v755_v12 = vadd.f32 %v3336_v61, %v754_v11  ;;  %2465 = vmatmul.mubr.f32.gmra.mxu1 %v805_v10  ;;  %2576 = vmatprep.subr.mxu1 %v3065_v0 }
 0x127   : > { %v2398_v13 = vpop.f32.mrf.mxu0  ;;  %2467 = vmatprep.mubr.msk.f32.mxu1 %vm3066_vm0, %v3065_v0  ;;  %2577 = vmatpush3.msra.mxu1 %v1159_v56 }
 0x128   : > { %v806_v14 = vmax.f32 %v755_v12, 0.0  ;;  %2578 = vmatprep.subr.mxu1 %v3065_v0 }
 0x129   : > { %v759_v15 = vpop.f32.mrf.mxu0  ;;  %2579 = vmatpush3.msra.mxu1 %v1158_v57  ;;  %v1148_v57 = vld [vmem:[%s4007_s7] sm:$0xff] }
 0x12a   : > { %v760_v16 = vadd.f32 %v3336_v61, %v759_v15  ;;  %2468 = vmatmul.mubr.f32.gmra.mxu1 %v806_v14  ;;  %2580 = vmatprep.subr.mxu1 %v3065_v0 }
 0x12b   : > { %v2401_v17 = vpop.f32.mrf.mxu0  ;;  %2470 = vmatprep.mubr.msk.f32.mxu1 %vm3066_vm0, %v3065_v0  ;;  %2581 = vmatpush3.msra.mxu1 %v1157_v58  ;;  %v1329_v58 = vld [vmem:[%s4009_s9 + $0x78] sm:$0xff] }
 0x12c   : > { %v807_v18 = vmax.f32 %v760_v16, 0.0  ;;  %2582 = vmatprep.subr.mxu1 %v3065_v0 }
 0x12d   : > { %v764_v19 = vpop.f32.mrf.mxu0  ;;  %2583 = vmatpush3.msra.mxu1 %v1156_v59  ;;  %v1328_v59 = vld [vmem:[%s4009_s9 + $0x70] sm:$0xff] }
 0x12e   : > { %v765_v20 = vadd.f32 %v3336_v61, %v764_v19  ;;  %2471 = vmatmul.mubr.f32.gmra.mxu1 %v807_v18  ;;  %2584 = vmatprep.subr.mxu1 %v3065_v0 }
 0x12f   : > { %v2404_v21 = vpop.f32.mrf.mxu0  ;;  %2473 = vmatprep.mubr.msk.f32.mxu1 %vm3066_vm0, %v3065_v0  ;;  %2585 = vmatpush3.msra.mxu1 %v1155_v60  ;;  %v1327_v60 = vld [vmem:[%s4009_s9 + $0x68] sm:$0xff] }
 0x130   : > { %v808_v22 = vmax.f32 %v765_v20, 0.0  ;;  %2586 = vmatprep.subr.mxu1 %v3065_v0 }
 0x131   : > { %v769_v23 = vpop.f32.mrf.mxu0 }
 0x132   : > { %v770_v24 = vadd.f32 %v3336_v61, %v769_v23  ;;  %2474 = vmatmul.mubr.f32.gmra.mxu1 %v808_v22 }
 0x133   : > { %v2407_v25 = vpop.f32.mrf.mxu0  ;;  %2476 = vmatprep.mubr.msk.f32.mxu1 %vm3066_vm0, %v3065_v0 }
 0x134   : > { %v809_v26 = vmax.f32 %v770_v24, 0.0 }
 0x135   : > { %v774_v27 = vpop.f32.mrf.mxu0 }
 0x136   : > { %v775_v28 = vadd.f32 %v3336_v61, %v774_v27  ;;  %2477 = vmatmul.mubr.f32.gmra.mxu1 %v809_v26 }
 0x137   : > { %v2410_v29 = vpop.f32.mrf.mxu0  ;;  %2479 = vmatprep.mubr.msk.f32.mxu1 %vm3066_vm0, %v3065_v0 }
 0x138   : > { %v810_v30 = vmax.f32 %v775_v28, 0.0 }
 0x139   : > { %v779_v31 = vpop.f32.mrf.mxu0 }
 0x13a   : > { %v780_v32 = vadd.f32 %v3336_v61, %v779_v31  ;;  %2480 = vmatmul.mubr.f32.gmra.mxu1 %v810_v30 }
 0x13b   : > { %v2413_v33 = vpop.f32.mrf.mxu0  ;;  %2482 = vmatprep.mubr.msk.f32.mxu1 %vm3066_vm0, %v3065_v0 }
 0x13c   : > { %v811_v34 = vmax.f32 %v780_v32, 0.0 }
 0x13d   : > { %v784_v35 = vpop.f32.mrf.mxu0 }
 0x13e   : > { %v785_v36 = vadd.f32 %v3336_v61, %v784_v35  ;;  %2483 = vmatmul.mubr.f32.gmra.mxu1 %v811_v34 }
 0x13f   : > { %v2416_v37 = vpop.f32.mrf.mxu0  ;;  %2485 = vmatprep.mubr.msk.f32.mxu1 %vm3066_vm0, %v3065_v0 }
 0x140   : > { %v812_v38 = vmax.f32 %v785_v36, 0.0 }
 0x141   : > { %v789_v39 = vpop.f32.mrf.mxu0 }
 0x142   : > { %v790_v40 = vadd.f32 %v3336_v61, %v789_v39  ;;  %2486 = vmatmul.mubr.f32.gmra.mxu1 %v812_v38 }
 0x143   : > { %v2419_v41 = vpop.f32.mrf.mxu0  ;;  %2488 = vmatprep.mubr.msk.f32.mxu1 %vm3066_vm0, %v3065_v0 }
 0x144   : > { %v813_v42 = vmax.f32 %v790_v40, 0.0 }
 0x145   : > { %v794_v43 = vpop.f32.mrf.mxu0 }
 0x146   : > { %v795_v44 = vadd.f32 %v3336_v61, %v794_v43  ;;  %2489 = vmatmul.mubr.f32.gmra.mxu1 %v813_v42 }
 0x147   : > { %v2422_v45 = vpop.f32.mrf.mxu0  ;;  %2491 = vmatprep.mubr.msk.f32.mxu1 %vm3066_vm0, %v3065_v0 }
 0x148   : > { %v814_v46 = vmax.f32 %v795_v44, 0.0 }
 0x149   : > { %v799_v47 = vpop.f32.mrf.mxu0 }
 0x14a   : > { %v800_v48 = vadd.f32 %v3336_v61, %v799_v47  ;;  %2492 = vmatmul.mubr.f32.gmra.mxu1 %v814_v46  ;;  %v1154_v61 = vld [vmem:[%s4007_s7 + $0x30] sm:$0xff] }
 0x14b   : > { %v2425_v49 = vpop.f32.mrf.mxu0  ;;  %2494 = vmatprep.mubr.msk.f32.mxu1 %vm3066_vm0, %v3065_v0  ;;  %2587 = vmatpush3.msra.mxu1 %v1154_v61  ;;  %v1326_v61 = vld [vmem:[%s4009_s9 + $0x60] sm:$0xff] }
 0x14c   : > { %v815_v50 = vmax.f32 %v800_v48, 0.0  ;;  %2588 = vmatprep.subr.mxu1 %v3065_v0 }
 0x14d   : > { %2589 = vmatpush3.msra.mxu1 %v1153_v62  ;;  %v1325_v62 = vld [vmem:[%s4009_s9 + $0x58] sm:$0xff] }
 0x14e   : > { %2495 = vmatmul.mubr.f32.gmra.mxu1 %v815_v50  ;;  %2590 = vmatprep.subr.mxu1 %v3065_v0 }
 0x14f   : > { %2600 = vmatprep.mubr.msk.f32.mxu1 %vm3066_vm0, %v3065_v0  ;;  %2591 = vmatpush3.msra.mxu1 %v1152_v63  ;;  %v1324_v63 = vld [vmem:[%s4009_s9 + $0x50] sm:$0xff] }
 0x150   : > { %2592 = vmatprep.subr.mxu1 %v3065_v0 }
 0x151   : > { %2593 = vmatpush3.msra.mxu1 %v1151_v1  ;;  %v1323_v1 = vld [vmem:[%s4009_s9 + $0x48] sm:$0xff] }
 0x152   : > { %2594 = vmatprep.subr.mxu1 %v3065_v0 }
 0x153   : > { %2595 = vmatpush3.msra.mxu1 %v1150_v2  ;;  %v1322_v2 = vld [vmem:[%s4009_s9 + $0x40] sm:$0xff] }
 0x154   : > { %2596 = vmatprep.subr.mxu1 %v3065_v0 }
 0x155   : > { %2597 = vmatpush3.msra.mxu1 %v1149_v3  ;;  %v1321_v3 = vld [vmem:[%s4009_s9 + $0x38] sm:$0xff] }
 0x156   : > { %2598 = vmatprep.subr.mxu1 %v3065_v0 }
 0x157   : > { %2599 = vmatpush3.msra.mxu1 %v1148_v57 }
 0x158   : > { %2710 = vmatprep.subr.mxu1 %v3065_v0 }
 0x1de   : > { %v905_v5 = vpop.f32.mrf.mxu1 }
 0x1df   : > { %v906_v6 = vadd.f32 %v3441_v4, %v905_v5  ;;  %v1319_v5 = vld [vmem:[%s4009_s9 + $0x28] sm:$0xff] }
 0x1e0   : > { %v2460_v7 = vpop.f32.mrf.mxu1 }
 0x1e1   : > { %v969_v8 = vmax.f32 %v906_v6, 0.0  ;;  %v1318_v6 = vld [vmem:[%s4009_s9 + $0x20] sm:$0xff]  ;;  %v1317_v7 = vld [vmem:[%s4009_s9 + $0x18] sm:$0xff] }
 0x1e2   : > { %v910_v9 = vpop.f32.mrf.mxu1 }
 0x1e3   : > { %v911_v10 = vadd.f32 %v3441_v4, %v910_v9  ;;  %2530 = vmatmul.mubr.f32.vlgmr.msra.gmra.mxu0 %v969_v8  ;;  %v1316_v8 = vld [vmem:[%s4009_s9 + $0x10] sm:$0xff]  ;;  %v1315_v9 = vld [vmem:[%s4009_s9 + $0x8] sm:$0xff] }
 0x1e4   : > { %v2463_v11 = vpop.f32.mrf.mxu1  ;;  %2532 = vmatprep.mubr.msk.f32.mxu0 %vm3066_vm0, %v3065_v0  ;;  %2640 = vmatpush3.msra.mxu0 %v1329_v58 }
 0x1e5   : > { %v970_v12 = vmax.f32 %v911_v10, 0.0  ;;  %2641 = vmatprep.subr.mxu0 %v3065_v0  ;;  %v3549_v10 = vld [vmem:[%s4006_s6] ss:$0 sm:$0xff] }
 0x1e6   : > { %v915_v13 = vpop.f32.mrf.mxu1  ;;  %2642 = vmatpush3.msra.mxu0 %v1328_v59 }
 0x1e7   : > { %v916_v14 = vadd.f32 %v3441_v4, %v915_v13  ;;  %2533 = vmatmul.mubr.f32.gmra.mxu0 %v970_v12  ;;  %2643 = vmatprep.subr.mxu0 %v3065_v0 }
 0x1e8   : > { %v2466_v15 = vpop.f32.mrf.mxu1  ;;  %2535 = vmatprep.mubr.msk.f32.mxu0 %vm3066_vm0, %v3065_v0  ;;  %2644 = vmatpush3.msra.mxu0 %v1327_v60 }
 0x1e9   : > { %v971_v16 = vmax.f32 %v916_v14, 0.0  ;;  %2645 = vmatprep.subr.mxu0 %v3065_v0 }
 0x1ea   : > { %v920_v17 = vpop.f32.mrf.mxu1  ;;  %2646 = vmatpush3.msra.mxu0 %v1326_v61 }
 0x1eb   : > { %v921_v18 = vadd.f32 %v3441_v4, %v920_v17  ;;  %2536 = vmatmul.mubr.f32.gmra.mxu0 %v971_v16  ;;  %2647 = vmatprep.subr.mxu0 %v3065_v0 }
 0x1ec   : > { %v2469_v19 = vpop.f32.mrf.mxu1  ;;  %2538 = vmatprep.mubr.msk.f32.mxu0 %vm3066_vm0, %v3065_v0  ;;  %2648 = vmatpush3.msra.mxu0 %v1325_v62 }
 0x1ed   : > { %v972_v20 = vmax.f32 %v921_v18, 0.0  ;;  %2649 = vmatprep.subr.mxu0 %v3065_v0 }
 0x1ee   : > { %v925_v21 = vpop.f32.mrf.mxu1  ;;  %2650 = vmatpush3.msra.mxu0 %v1324_v63  ;;  %v1314_v63 = vld [vmem:[%s4009_s9] sm:$0xff] }
 0x1ef   : > { %v926_v22 = vadd.f32 %v3441_v4, %v925_v21  ;;  %2539 = vmatmul.mubr.f32.gmra.mxu0 %v972_v20  ;;  %2651 = vmatprep.subr.mxu0 %v3065_v0 }
 0x1f0   : > { %v2472_v23 = vpop.f32.mrf.mxu1  ;;  %2541 = vmatprep.mubr.msk.f32.mxu0 %vm3066_vm0, %v3065_v0  ;;  %2652 = vmatpush3.msra.mxu0 %v1323_v1  ;;  %v1495_v1 = vld [vmem:[%s4011_s11 + $0x78] sm:$0xff] }
 0x1f1   : > { %v973_v24 = vmax.f32 %v926_v22, 0.0  ;;  %2653 = vmatprep.subr.mxu0 %v3065_v0 }
 0x1f2   : > { %v930_v25 = vpop.f32.mrf.mxu1  ;;  %2654 = vmatpush3.msra.mxu0 %v1322_v2  ;;  %v1494_v2 = vld [vmem:[%s4011_s11 + $0x70] sm:$0xff] }
 0x1f3   : > { %v931_v26 = vadd.f32 %v3441_v4, %v930_v25  ;;  %2542 = vmatmul.mubr.f32.gmra.mxu0 %v973_v24  ;;  %2655 = vmatprep.subr.mxu0 %v3065_v0 }
 0x1f4   : > { %v2475_v27 = vpop.f32.mrf.mxu1  ;;  %2544 = vmatprep.mubr.msk.f32.mxu0 %vm3066_vm0, %v3065_v0  ;;  %2656 = vmatpush3.msra.mxu0 %v1321_v3  ;;  %v1493_v3 = vld [vmem:[%s4011_s11 + $0x68] sm:$0xff] }
 0x1f5   : > { %v974_v28 = vmax.f32 %v931_v26, 0.0  ;;  %2657 = vmatprep.subr.mxu0 %v3065_v0 }
 0x1f6   : > { %v935_v29 = vpop.f32.mrf.mxu1 }
 0x1f7   : > { %v936_v30 = vadd.f32 %v3441_v4, %v935_v29  ;;  %2545 = vmatmul.mubr.f32.gmra.mxu0 %v974_v28 }
 0x1f8   : > { %v2478_v31 = vpop.f32.mrf.mxu1  ;;  %2547 = vmatprep.mubr.msk.f32.mxu0 %vm3066_vm0, %v3065_v0 }
 0x1f9   : > { %v975_v32 = vmax.f32 %v936_v30, 0.0 }
 0x1fa   : > { %v940_v33 = vpop.f32.mrf.mxu1 }
 0x1fb   : > { %v941_v34 = vadd.f32 %v3441_v4, %v940_v33  ;;  %2548 = vmatmul.mubr.f32.gmra.mxu0 %v975_v32 }
 0x1fc   : > { %v2481_v35 = vpop.f32.mrf.mxu1  ;;  %2550 = vmatprep.mubr.msk.f32.mxu0 %vm3066_vm0, %v3065_v0 }
 0x1fd   : > { %v976_v36 = vmax.f32 %v941_v34, 0.0 }
 0x1fe   : > { %v945_v37 = vpop.f32.mrf.mxu1 }
 0x1ff   : > { %v946_v38 = vadd.f32 %v3441_v4, %v945_v37  ;;  %2551 = vmatmul.mubr.f32.gmra.mxu0 %v976_v36 }
 0x200   : > { %v2484_v39 = vpop.f32.mrf.mxu1  ;;  %2553 = vmatprep.mubr.msk.f32.mxu0 %vm3066_vm0, %v3065_v0 }
 0x201   : > { %v977_v40 = vmax.f32 %v946_v38, 0.0 }
 0x202   : > { %v950_v41 = vpop.f32.mrf.mxu1 }
 0x203   : > { %v951_v42 = vadd.f32 %v3441_v4, %v950_v41  ;;  %2554 = vmatmul.mubr.f32.gmra.mxu0 %v977_v40 }
 0x204   : > { %v2487_v43 = vpop.f32.mrf.mxu1  ;;  %2556 = vmatprep.mubr.msk.f32.mxu0 %vm3066_vm0, %v3065_v0 }
 0x205   : > { %v978_v44 = vmax.f32 %v951_v42, 0.0 }
 0x206   : > { %v955_v45 = vpop.f32.mrf.mxu1 }
 0x207   : > { %v956_v46 = vadd.f32 %v3441_v4, %v955_v45  ;;  %2557 = vmatmul.mubr.f32.gmra.mxu0 %v978_v44 }
 0x208   : > { %v2490_v47 = vpop.f32.mrf.mxu1  ;;  %2559 = vmatprep.mubr.msk.f32.mxu0 %vm3066_vm0, %v3065_v0 }
 0x209   : > { %v979_v48 = vmax.f32 %v956_v46, 0.0 }
 0x20a   : > { %v960_v49 = vpop.f32.mrf.mxu1 }
 0x20b   : > { %v961_v50 = vadd.f32 %v3441_v4, %v960_v49  ;;  %2560 = vmatmul.mubr.f32.gmra.mxu0 %v979_v48 }
 0x20c   : > { %v2493_v51 = vpop.f32.mrf.mxu1  ;;  %2562 = vmatprep.mubr.msk.f32.mxu0 %vm3066_vm0, %v3065_v0 }
 0x20d   : > { %v980_v52 = vmax.f32 %v961_v50, 0.0 }
 0x20e   : > { %v965_v53 = vpop.f32.mrf.mxu1 }
 0x20f   : > { %v966_v54 = vadd.f32 %v3441_v4, %v965_v53  ;;  %2563 = vmatmul.mubr.f32.gmra.mxu0 %v980_v52  ;;  %v1320_v4 = vld [vmem:[%s4009_s9 + $0x30] sm:$0xff] }
 0x210   : > { %v2496_v55 = vpop.f32.mrf.mxu1  ;;  %2565 = vmatprep.mubr.msk.f32.mxu0 %vm3066_vm0, %v3065_v0  ;;  %2658 = vmatpush3.msra.mxu0 %v1320_v4  ;;  %v1492_v4 = vld [vmem:[%s4011_s11 + $0x60] sm:$0xff] }
 0x211   : > { %v981_v56 = vmax.f32 %v966_v54, 0.0  ;;  %2659 = vmatprep.subr.mxu0 %v3065_v0 }
 0x212   : > { %2660 = vmatpush3.msra.mxu0 %v1319_v5  ;;  %v1491_v5 = vld [vmem:[%s4011_s11 + $0x58] sm:$0xff] }
 0x213   : > { %2566 = vmatmul.mubr.f32.gmra.mxu0 %v981_v56  ;;  %2661 = vmatprep.subr.mxu0 %v3065_v0 }
 0x214   : > { %2671 = vmatprep.mubr.msk.f32.mxu0 %vm3066_vm0, %v3065_v0  ;;  %2662 = vmatpush3.msra.mxu0 %v1318_v6  ;;  %v1490_v6 = vld [vmem:[%s4011_s11 + $0x50] sm:$0xff] }
 0x215   : > { %2663 = vmatprep.subr.mxu0 %v3065_v0 }
 0x216   : > { %2664 = vmatpush3.msra.mxu0 %v1317_v7  ;;  %v1489_v7 = vld [vmem:[%s4011_s11 + $0x48] sm:$0xff] }
 0x217   : > { %2665 = vmatprep.subr.mxu0 %v3065_v0 }
 0x218   : > { %2666 = vmatpush3.msra.mxu0 %v1316_v8  ;;  %v1488_v8 = vld [vmem:[%s4011_s11 + $0x40] sm:$0xff] }
 0x219   : > { %2667 = vmatprep.subr.mxu0 %v3065_v0 }
 0x21a   : > { %2668 = vmatpush3.msra.mxu0 %v1315_v9  ;;  %v1487_v9 = vld [vmem:[%s4011_s11 + $0x38] sm:$0xff] }
 0x21b   : > { %2669 = vmatprep.subr.mxu0 %v3065_v0 }
 0x21c   : > { %2670 = vmatpush3.msra.mxu0 %v1314_v63  ;;  %v1655_v63 = vld [vmem:[%s4013_s13 + $0x48] sm:$0xff] }
 0x21d   : > { %2781 = vmatprep.subr.mxu0 %v3065_v0 }
 0x2a3   : > { %v1071_v11 = vpop.f32.mrf.mxu0 }
 0x2a4   : > { %v1072_v12 = vadd.f32 %v3549_v10, %v1071_v11  ;;  %v1485_v11 = vld [vmem:[%s4011_s11 + $0x28] sm:$0xff] }
 0x2a5   : > { %v2531_v13 = vpop.f32.mrf.mxu0 }
 0x2a6   : > { %v1135_v14 = vmax.f32 %v1072_v12, 0.0  ;;  %v1484_v12 = vld [vmem:[%s4011_s11 + $0x20] sm:$0xff]  ;;  %v1483_v13 = vld [vmem:[%s4011_s11 + $0x18] sm:$0xff] }
 0x2a7   : > { %v1076_v15 = vpop.f32.mrf.mxu0 }
 0x2a8   : > { %v1077_v16 = vadd.f32 %v3549_v10, %v1076_v15  ;;  %2601 = vmatmul.mubr.f32.vlgmr.msra.gmra.mxu1 %v1135_v14  ;;  %v1482_v14 = vld [vmem:[%s4011_s11 + $0x10] sm:$0xff]  ;;  %v1481_v15 = vld [vmem:[%s4011_s11 + $0x8] sm:$0xff] }
 0x2a9   : > { %v2534_v17 = vpop.f32.mrf.mxu0  ;;  %2603 = vmatprep.mubr.msk.f32.mxu1 %vm3066_vm0, %v3065_v0  ;;  %2711 = vmatpush3.msra.mxu1 %v1495_v1  ;;  %v1654_v1 = vld [vmem:[%s4013_s13 + $0x40] sm:$0xff] }
 0x2aa   : > { %v1136_v18 = vmax.f32 %v1077_v16, 0.0  ;;  %2712 = vmatprep.subr.mxu1 %v3065_v0  ;;  %v3657_v16 = vld [vmem:[%s4008_s8] ss:$0 sm:$0xff] }
 0x2ab   : > { %v1081_v19 = vpop.f32.mrf.mxu0  ;;  %2713 = vmatpush3.msra.mxu1 %v1494_v2  ;;  %v1653_v2 = vld [vmem:[%s4013_s13 + $0x38] sm:$0xff] }
 0x2ac   : > { %v1082_v20 = vadd.f32 %v3549_v10, %v1081_v19  ;;  %2604 = vmatmul.mubr.f32.gmra.mxu1 %v1136_v18  ;;  %2714 = vmatprep.subr.mxu1 %v3065_v0 }
 0x2ad   : > { %v2537_v21 = vpop.f32.mrf.mxu0  ;;  %2606 = vmatprep.mubr.msk.f32.mxu1 %vm3066_vm0, %v3065_v0  ;;  %2715 = vmatpush3.msra.mxu1 %v1493_v3  ;;  %v1652_v3 = vld [vmem:[%s4013_s13 + $0x30] sm:$0xff] }
 0x2ae   : > { %v1137_v22 = vmax.f32 %v1082_v20, 0.0  ;;  %2716 = vmatprep.subr.mxu1 %v3065_v0 }
 0x2af   : > { %v1086_v23 = vpop.f32.mrf.mxu0  ;;  %2717 = vmatpush3.msra.mxu1 %v1492_v4  ;;  %v1651_v4 = vld [vmem:[%s4013_s13 + $0x28] sm:$0xff] }
 0x2b0   : > { %v1087_v24 = vadd.f32 %v3549_v10, %v1086_v23  ;;  %2607 = vmatmul.mubr.f32.gmra.mxu1 %v1137_v22  ;;  %2718 = vmatprep.subr.mxu1 %v3065_v0 }
 0x2b1   : > { %v2540_v25 = vpop.f32.mrf.mxu0  ;;  %2609 = vmatprep.mubr.msk.f32.mxu1 %vm3066_vm0, %v3065_v0  ;;  %2719 = vmatpush3.msra.mxu1 %v1491_v5  ;;  %v1650_v5 = vld [vmem:[%s4013_s13 + $0x20] sm:$0xff] }
 0x2b2   : > { %v1138_v26 = vmax.f32 %v1087_v24, 0.0  ;;  %2720 = vmatprep.subr.mxu1 %v3065_v0 }
 0x2b3   : > { %v1091_v27 = vpop.f32.mrf.mxu0  ;;  %2721 = vmatpush3.msra.mxu1 %v1490_v6  ;;  %v1649_v6 = vld [vmem:[%s4013_s13 + $0x18] sm:$0xff] }
 0x2b4   : > { %v1092_v28 = vadd.f32 %v3549_v10, %v1091_v27  ;;  %2610 = vmatmul.mubr.f32.gmra.mxu1 %v1138_v26  ;;  %2722 = vmatprep.subr.mxu1 %v3065_v0 }
 0x2b5   : > { %v2543_v29 = vpop.f32.mrf.mxu0  ;;  %2612 = vmatprep.mubr.msk.f32.mxu1 %vm3066_vm0, %v3065_v0  ;;  %2723 = vmatpush3.msra.mxu1 %v1489_v7  ;;  %v1648_v7 = vld [vmem:[%s4013_s13 + $0x10] sm:$0xff] }
 0x2b6   : > { %v1139_v30 = vmax.f32 %v1092_v28, 0.0  ;;  %2724 = vmatprep.subr.mxu1 %v3065_v0 }
 0x2b7   : > { %v1096_v31 = vpop.f32.mrf.mxu0  ;;  %2725 = vmatpush3.msra.mxu1 %v1488_v8  ;;  %v1647_v8 = vld [vmem:[%s4013_s13 + $0x8] sm:$0xff] }
 0x2b8   : > { %v1097_v32 = vadd.f32 %v3549_v10, %v1096_v31  ;;  %2613 = vmatmul.mubr.f32.gmra.mxu1 %v1139_v30  ;;  %2726 = vmatprep.subr.mxu1 %v3065_v0 }
 0x2b9   : > { %v2546_v33 = vpop.f32.mrf.mxu0  ;;  %2615 = vmatprep.mubr.msk.f32.mxu1 %vm3066_vm0, %v3065_v0  ;;  %2727 = vmatpush3.msra.mxu1 %v1487_v9  ;;  %v3784_v9 = vld [vmem:[%s4010_s10] ss:$0 sm:$0xff] }
 0x2ba   : > { %v1140_v34 = vmax.f32 %v1097_v32, 0.0  ;;  %2728 = vmatprep.subr.mxu1 %v3065_v0 }
 0x2bb   : > { %v1101_v35 = vpop.f32.mrf.mxu0 }
 0x2bc   : > { %v1102_v36 = vadd.f32 %v3549_v10, %v1101_v35  ;;  %2616 = vmatmul.mubr.f32.gmra.mxu1 %v1140_v34 }
 0x2bd   : > { %v2549_v37 = vpop.f32.mrf.mxu0  ;;  %2618 = vmatprep.mubr.msk.f32.mxu1 %vm3066_vm0, %v3065_v0 }
 0x2be   : > { %v1141_v38 = vmax.f32 %v1102_v36, 0.0 }
 0x2bf   : > { %v1106_v39 = vpop.f32.mrf.mxu0 }
 0x2c0   : > { %v1107_v40 = vadd.f32 %v3549_v10, %v1106_v39  ;;  %2619 = vmatmul.mubr.f32.gmra.mxu1 %v1141_v38 }
 0x2c1   : > { %v2552_v41 = vpop.f32.mrf.mxu0  ;;  %2621 = vmatprep.mubr.msk.f32.mxu1 %vm3066_vm0, %v3065_v0 }
 0x2c2   : > { %v1142_v42 = vmax.f32 %v1107_v40, 0.0 }
 0x2c3   : > { %v1111_v43 = vpop.f32.mrf.mxu0 }
 0x2c4   : > { %v1112_v44 = vadd.f32 %v3549_v10, %v1111_v43  ;;  %2622 = vmatmul.mubr.f32.gmra.mxu1 %v1142_v42 }
 0x2c5   : > { %v2555_v45 = vpop.f32.mrf.mxu0  ;;  %2624 = vmatprep.mubr.msk.f32.mxu1 %vm3066_vm0, %v3065_v0 }
 0x2c6   : > { %v1143_v46 = vmax.f32 %v1112_v44, 0.0 }
 0x2c7   : > { %v1116_v47 = vpop.f32.mrf.mxu0 }
 0x2c8   : > { %v1117_v48 = vadd.f32 %v3549_v10, %v1116_v47  ;;  %2625 = vmatmul.mubr.f32.gmra.mxu1 %v1143_v46 }
 0x2c9   : > { %v2558_v49 = vpop.f32.mrf.mxu0  ;;  %2627 = vmatprep.mubr.msk.f32.mxu1 %vm3066_vm0, %v3065_v0 }
 0x2ca   : > { %v1144_v50 = vmax.f32 %v1117_v48, 0.0 }
 0x2cb   : > { %v1121_v51 = vpop.f32.mrf.mxu0 }
 0x2cc   : > { %v1122_v52 = vadd.f32 %v3549_v10, %v1121_v51  ;;  %2628 = vmatmul.mubr.f32.gmra.mxu1 %v1144_v50 }
 0x2cd   : > { %v2561_v53 = vpop.f32.mrf.mxu0  ;;  %2630 = vmatprep.mubr.msk.f32.mxu1 %vm3066_vm0, %v3065_v0 }
 0x2ce   : > { %v1145_v54 = vmax.f32 %v1122_v52, 0.0 }
 0x2cf   : > { %v1126_v55 = vpop.f32.mrf.mxu0 }
 0x2d0   : > { %v1127_v56 = vadd.f32 %v3549_v10, %v1126_v55  ;;  %2631 = vmatmul.mubr.f32.gmra.mxu1 %v1145_v54 }
 0x2d1   : > { %v2564_v57 = vpop.f32.mrf.mxu0  ;;  %2633 = vmatprep.mubr.msk.f32.mxu1 %vm3066_vm0, %v3065_v0 }
 0x2d2   : > { %v1146_v58 = vmax.f32 %v1127_v56, 0.0  ;;  %v1480_v56 = vld [vmem:[%s4011_s11] sm:$0xff]  ;;  %v1661_v57 = vld [vmem:[%s4013_s13 + $0x78] sm:$0xff] }
 0x2d3   : > { %v1131_v59 = vpop.f32.mrf.mxu0 }
 0x2d4   : > { %v1132_v60 = vadd.f32 %v3549_v10, %v1131_v59  ;;  %2634 = vmatmul.mubr.f32.gmra.mxu1 %v1146_v58  ;;  %v1486_v10 = vld [vmem:[%s4011_s11 + $0x30] sm:$0xff]  ;;  %v1659_v59 = vld [vmem:[%s4013_s13 + $0x68] sm:$0xff] }
 0x2d5   : > { %v2567_v61 = vpop.f32.mrf.mxu0  ;;  %2636 = vmatprep.mubr.msk.f32.mxu1 %vm3066_vm0, %v3065_v0  ;;  %2729 = vmatpush3.msra.mxu1 %v1486_v10  ;;  %v1660_v58 = vld [vmem:[%s4013_s13 + $0x70] sm:$0xff] }
 0x2d6   : > { %v1147_v62 = vmax.f32 %v1132_v60, 0.0  ;;  %2730 = vmatprep.subr.mxu1 %v3065_v0  ;;  %v1658_v60 = vld [vmem:[%s4013_s13 + $0x60] sm:$0xff]  ;;  %v1657_v61 = vld [vmem:[%s4013_s13 + $0x58] sm:$0xff] }
 0x2d7   : > { %2731 = vmatpush3.msra.mxu1 %v1485_v11 }
 0x2d8   : > { %2637 = vmatmul.mubr.f32.gmra.mxu1 %v1147_v62  ;;  %2732 = vmatprep.subr.mxu1 %v3065_v0  ;;  %v1656_v62 = vld [vmem:[%s4013_s13 + $0x50] sm:$0xff] }
 0x2d9   : > { %2742 = vmatprep.mubr.msk.f32.mxu1 %vm3066_vm0, %v3065_v0  ;;  %2733 = vmatpush3.msra.mxu1 %v1484_v12 }
 0x2da   : > { %2734 = vmatprep.subr.mxu1 %v3065_v0 }
 0x2db   : > { %2735 = vmatpush3.msra.mxu1 %v1483_v13 }
 0x2dc   : > { %2736 = vmatprep.subr.mxu1 %v3065_v0 }
 0x2dd   : > { %2737 = vmatpush3.msra.mxu1 %v1482_v14 }
 0x2de   : > { %2738 = vmatprep.subr.mxu1 %v3065_v0 }
 0x2df   : > { %2739 = vmatpush3.msra.mxu1 %v1481_v15 }
 0x2e0   : > { %2740 = vmatprep.subr.mxu1 %v3065_v0 }
 0x2e1   : > { %2741 = vmatpush3.msra.mxu1 %v1480_v56 }
 0x2e2   : > { %2852 = vmatprep.subr.mxu1 %v3065_v0 }
 0x368   : > { %v1237_v17 = vpop.f32.mrf.mxu1 }
 0x369   : > { %v1238_v18 = vadd.f32 %v3657_v16, %v1237_v17 }
 0x36a   : > { %v2602_v19 = vpop.f32.mrf.mxu1 }
 0x36b   : > { %1301 = vst [vmem:[%s3663_s1] sm:$0xff] %v1238_v18  ;;  %2672 = vmatmul.mubr.f32.vlgmr.msra.gmra.mxu0 %v1238_v18 }
 0x36c   : > { %v1242_v20 = vpop.f32.mrf.mxu1  ;;  %2674 = vmatprep.mubr.msk.f32.mxu0 %vm3066_vm0, %v3065_v0  ;;  %2782 = vmatpush3.msra.mxu0 %v1661_v57 }
 0x36d   : > { %v1243_v21 = vadd.f32 %v3657_v16, %v1242_v20  ;;  %2783 = vmatprep.subr.mxu0 %v3065_v0 }
 0x36e   : > { %v2605_v22 = vpop.f32.mrf.mxu1  ;;  %2784 = vmatpush3.msra.mxu0 %v1660_v58 }
 0x36f   : > { %1302 = vst [vmem:[%s3663_s1 + $0x8] sm:$0xff] %v1243_v21  ;;  %2675 = vmatmul.mubr.f32.gmra.mxu0 %v1243_v21  ;;  %2785 = vmatprep.subr.mxu0 %v3065_v0 }
 0x370   : > { %v1247_v23 = vpop.f32.mrf.mxu1  ;;  %2677 = vmatprep.mubr.msk.f32.mxu0 %vm3066_vm0, %v3065_v0  ;;  %2786 = vmatpush3.msra.mxu0 %v1659_v59 }
 0x371   : > { %v1248_v24 = vadd.f32 %v3657_v16, %v1247_v23  ;;  %2787 = vmatprep.subr.mxu0 %v3065_v0 }
 0x372   : > { %v2608_v25 = vpop.f32.mrf.mxu1  ;;  %2788 = vmatpush3.msra.mxu0 %v1658_v60 }
 0x373   : > { %1303 = vst [vmem:[%s3663_s1 + $0x10] sm:$0xff] %v1248_v24  ;;  %2678 = vmatmul.mubr.f32.gmra.mxu0 %v1248_v24  ;;  %2789 = vmatprep.subr.mxu0 %v3065_v0 }
 0x374   : > { %v1252_v26 = vpop.f32.mrf.mxu1  ;;  %2680 = vmatprep.mubr.msk.f32.mxu0 %vm3066_vm0, %v3065_v0  ;;  %2790 = vmatpush3.msra.mxu0 %v1657_v61 }
 0x375   : > { %v1253_v27 = vadd.f32 %v3657_v16, %v1252_v26  ;;  %2791 = vmatprep.subr.mxu0 %v3065_v0 }
 0x376   : > { %v2611_v28 = vpop.f32.mrf.mxu1  ;;  %2792 = vmatpush3.msra.mxu0 %v1656_v62  ;;  %v1646_v62 = vld [vmem:[%s4013_s13] sm:$0xff] }
 0x377   : > { %1304 = vst [vmem:[%s3663_s1 + $0x18] sm:$0xff] %v1253_v27  ;;  %2681 = vmatmul.mubr.f32.gmra.mxu0 %v1253_v27  ;;  %2793 = vmatprep.subr.mxu0 %v3065_v0 }
 0x378   : > { %v1257_v29 = vpop.f32.mrf.mxu1  ;;  %2683 = vmatprep.mubr.msk.f32.mxu0 %vm3066_vm0, %v3065_v0  ;;  %2794 = vmatpush3.msra.mxu0 %v1655_v63  ;;  %v1827_v63 = vld [vmem:[%s4015_s15 + $0x78] sm:$0xff] }
 0x379   : > { %v1258_v30 = vadd.f32 %v3657_v16, %v1257_v29  ;;  %2795 = vmatprep.subr.mxu0 %v3065_v0 }
 0x37a   : > { %v2614_v31 = vpop.f32.mrf.mxu1  ;;  %2796 = vmatpush3.msra.mxu0 %v1654_v1  ;;  %v1826_v1 = vld [vmem:[%s4015_s15 + $0x70] sm:$0xff] }
 0x37b   : > { %1305 = vst [vmem:[%s3663_s1 + $0x20] sm:$0xff] %v1258_v30  ;;  %2684 = vmatmul.mubr.f32.gmra.mxu0 %v1258_v30  ;;  %2797 = vmatprep.subr.mxu0 %v3065_v0 }
 0x37c   : > { %v1262_v32 = vpop.f32.mrf.mxu1  ;;  %2686 = vmatprep.mubr.msk.f32.mxu0 %vm3066_vm0, %v3065_v0  ;;  %2798 = vmatpush3.msra.mxu0 %v1653_v2  ;;  %v1825_v2 = vld [vmem:[%s4015_s15 + $0x68] sm:$0xff] }
 0x37d   : > { %v1263_v33 = vadd.f32 %v3657_v16, %v1262_v32  ;;  %2799 = vmatprep.subr.mxu0 %v3065_v0 }
 0x37e   : > { %v2617_v34 = vpop.f32.mrf.mxu1  ;;  %2800 = vmatpush3.msra.mxu0 %v1652_v3  ;;  %v1824_v3 = vld [vmem:[%s4015_s15 + $0x60] sm:$0xff] }
 0x37f   : > { %1306 = vst [vmem:[%s3663_s1 + $0x28] sm:$0xff] %v1263_v33  ;;  %2687 = vmatmul.mubr.f32.gmra.mxu0 %v1263_v33  ;;  %2801 = vmatprep.subr.mxu0 %v3065_v0 }
 0x380   : > { %v1267_v35 = vpop.f32.mrf.mxu1  ;;  %2689 = vmatprep.mubr.msk.f32.mxu0 %vm3066_vm0, %v3065_v0  ;;  %2802 = vmatpush3.msra.mxu0 %v1651_v4  ;;  %v1823_v4 = vld [vmem:[%s4015_s15 + $0x58] sm:$0xff] }
 0x381   : > { %v1268_v36 = vadd.f32 %v3657_v16, %v1267_v35  ;;  %2803 = vmatprep.subr.mxu0 %v3065_v0 }
 0x382   : > { %v2620_v37 = vpop.f32.mrf.mxu1  ;;  %2804 = vmatpush3.msra.mxu0 %v1650_v5  ;;  %v1822_v5 = vld [vmem:[%s4015_s15 + $0x50] sm:$0xff] }
 0x383   : > { %1307 = vst [vmem:[%s3663_s1 + $0x30] sm:$0xff] %v1268_v36  ;;  %2690 = vmatmul.mubr.f32.gmra.mxu0 %v1268_v36  ;;  %2805 = vmatprep.subr.mxu0 %v3065_v0 }
 0x384   : > { %v1272_v38 = vpop.f32.mrf.mxu1  ;;  %2692 = vmatprep.mubr.msk.f32.mxu0 %vm3066_vm0, %v3065_v0  ;;  %2806 = vmatpush3.msra.mxu0 %v1649_v6  ;;  %v1821_v6 = vld [vmem:[%s4015_s15 + $0x48] sm:$0xff] }
 0x385   : > { %v1273_v39 = vadd.f32 %v3657_v16, %v1272_v38  ;;  %2807 = vmatprep.subr.mxu0 %v3065_v0 }
 0x386   : > { %v2623_v40 = vpop.f32.mrf.mxu1  ;;  %2808 = vmatpush3.msra.mxu0 %v1648_v7  ;;  %v1820_v7 = vld [vmem:[%s4015_s15 + $0x40] sm:$0xff] }
 0x387   : > { %1308 = vst [vmem:[%s3663_s1 + $0x38] sm:$0xff] %v1273_v39  ;;  %2693 = vmatmul.mubr.f32.gmra.mxu0 %v1273_v39  ;;  %2809 = vmatprep.subr.mxu0 %v3065_v0 }
 0x388   : > { %v1277_v41 = vpop.f32.mrf.mxu1  ;;  %2695 = vmatprep.mubr.msk.f32.mxu0 %vm3066_vm0, %v3065_v0  ;;  %2810 = vmatpush3.msra.mxu0 %v1647_v8  ;;  %v1819_v8 = vld [vmem:[%s4015_s15 + $0x38] sm:$0xff] }
 0x389   : > { %v1278_v42 = vadd.f32 %v3657_v16, %v1277_v41  ;;  %2811 = vmatprep.subr.mxu0 %v3065_v0 }
 0x38a   : > { %v2626_v43 = vpop.f32.mrf.mxu1  ;;  %2812 = vmatpush3.msra.mxu0 %v1646_v62 }
 0x38b   : > { %1309 = vst [vmem:[%s3663_s1 + $0x40] sm:$0xff] %v1278_v42  ;;  %2696 = vmatmul.mubr.f32.gmra.mxu0 %v1278_v42 }
 0x38c   : > { %v1282_v44 = vpop.f32.mrf.mxu1  ;;  %2698 = vmatprep.mubr.msk.f32.mxu0 %vm3066_vm0, %v3065_v0 }
 0x38d   : > { %v1283_v45 = vadd.f32 %v3657_v16, %v1282_v44 }
 0x38e   : > { %v2629_v46 = vpop.f32.mrf.mxu1 }
 0x38f   : > { %1310 = vst [vmem:[%s3663_s1 + $0x48] sm:$0xff] %v1283_v45  ;;  %2699 = vmatmul.mubr.f32.gmra.mxu0 %v1283_v45 }
 0x390   : > { %v1287_v47 = vpop.f32.mrf.mxu1  ;;  %2701 = vmatprep.mubr.msk.f32.mxu0 %vm3066_vm0, %v3065_v0 }
 0x391   : > { %v1288_v48 = vadd.f32 %v3657_v16, %v1287_v47 }
 0x392   : > { %v2632_v49 = vpop.f32.mrf.mxu1 }
 0x393   : > { %1311 = vst [vmem:[%s3663_s1 + $0x50] sm:$0xff] %v1288_v48  ;;  %2702 = vmatmul.mubr.f32.gmra.mxu0 %v1288_v48 }
 0x394   : > { %v1292_v50 = vpop.f32.mrf.mxu1  ;;  %2704 = vmatprep.mubr.msk.f32.mxu0 %vm3066_vm0, %v3065_v0 }
 0x395   : > { %v1293_v51 = vadd.f32 %v3657_v16, %v1292_v50 }
 0x396   : > { %v2635_v52 = vpop.f32.mrf.mxu1 }
 0x397   : > { %1312 = vst [vmem:[%s3663_s1 + $0x58] sm:$0xff] %v1293_v51  ;;  %2705 = vmatmul.mubr.f32.gmra.mxu0 %v1293_v51 }
 0x398   : > { %v1297_v53 = vpop.f32.mrf.mxu1  ;;  %2707 = vmatprep.mubr.msk.f32.mxu0 %vm3066_vm0, %v3065_v0 }
 0x399   : > { %v1298_v54 = vadd.f32 %v3657_v16, %v1297_v53 }
 0x39a   : > { %v2638_v55 = vpop.f32.mrf.mxu1 }
 0x39b   : > { %1313 = vst [vmem:[%s3663_s1 + $0x60] sm:$0xff] %v1298_v54  ;;  %2708 = vmatmul.mubr.f32.gmra.mxu0 %v1298_v54 }
 0x39c   : > { %2813 = vmatprep.mubr.msk.f32.mxu0 %vm3066_vm0, %v3065_v0 }
 0x42b   : > { %v1403_v10 = vpop.f32.mrf.mxu0 }
 0x42c   : > { %v1404_v11 = vadd.f32 %v3784_v9, %v1403_v10  ;;  %v1817_v10 = vld [vmem:[%s4015_s15 + $0x28] sm:$0xff] }
 0x42d   : > { %v2673_v12 = vpop.f32.mrf.mxu0 }
 0x42e   : > { %v1467_v13 = vmax.f32 %v1404_v11, 0.0  ;;  %v1816_v11 = vld [vmem:[%s4015_s15 + $0x20] sm:$0xff]  ;;  %v1815_v12 = vld [vmem:[%s4015_s15 + $0x18] sm:$0xff] }
 0x42f   : > { %v1408_v14 = vpop.f32.mrf.mxu0 }
 0x430   : > { %v1409_v15 = vadd.f32 %v3784_v9, %v1408_v14  ;;  %2743 = vmatmul.mubr.f32.vlgmr.msra.gmra.mxu1 %v1467_v13  ;;  %v1814_v13 = vld [vmem:[%s4015_s15 + $0x10] sm:$0xff]  ;;  %v1813_v14 = vld [vmem:[%s4015_s15 + $0x8] sm:$0xff] }
 0x431   : > { %v2676_v16 = vpop.f32.mrf.mxu0  ;;  %2745 = vmatprep.mubr.msk.f32.mxu1 %vm3066_vm0, %v3065_v0  ;;  %2853 = vmatpush3.msra.mxu1 %v1827_v63 }
 0x432   : > { %v1468_v17 = vmax.f32 %v1409_v15, 0.0  ;;  %2854 = vmatprep.subr.mxu1 %v3065_v0  ;;  %v3891_v15 = vld [vmem:[%s4012_s12] ss:$0 sm:$0xff] }
 0x433   : > { %v1413_v18 = vpop.f32.mrf.mxu0  ;;  %2855 = vmatpush3.msra.mxu1 %v1826_v1 }
 0x434   : > { %v1414_v19 = vadd.f32 %v3784_v9, %v1413_v18  ;;  %2746 = vmatmul.mubr.f32.gmra.mxu1 %v1468_v17  ;;  %2856 = vmatprep.subr.mxu1 %v3065_v0 }
 0x435   : > { %v2679_v20 = vpop.f32.mrf.mxu0  ;;  %2748 = vmatprep.mubr.msk.f32.mxu1 %vm3066_vm0, %v3065_v0  ;;  %2857 = vmatpush3.msra.mxu1 %v1825_v2 }
 0x436   : > { %v1469_v21 = vmax.f32 %v1414_v19, 0.0  ;;  %2858 = vmatprep.subr.mxu1 %v3065_v0 }
 0x437   : > { %v1418_v22 = vpop.f32.mrf.mxu0  ;;  %2859 = vmatpush3.msra.mxu1 %v1824_v3 }
 0x438   : > { %v1419_v23 = vadd.f32 %v3784_v9, %v1418_v22  ;;  %2749 = vmatmul.mubr.f32.gmra.mxu1 %v1469_v21  ;;  %2860 = vmatprep.subr.mxu1 %v3065_v0 }
 0x439   : > { %v2682_v24 = vpop.f32.mrf.mxu0  ;;  %2751 = vmatprep.mubr.msk.f32.mxu1 %vm3066_vm0, %v3065_v0  ;;  %2861 = vmatpush3.msra.mxu1 %v1823_v4 }
 0x43a   : > { %v1470_v25 = vmax.f32 %v1419_v23, 0.0  ;;  %2862 = vmatprep.subr.mxu1 %v3065_v0 }
 0x43b   : > { %v1423_v26 = vpop.f32.mrf.mxu0  ;;  %2863 = vmatpush3.msra.mxu1 %v1822_v5  ;;  %v1812_v5 = vld [vmem:[%s4015_s15] sm:$0xff] }
 0x43c   : > { %v1424_v27 = vadd.f32 %v3784_v9, %v1423_v26  ;;  %2752 = vmatmul.mubr.f32.gmra.mxu1 %v1470_v25  ;;  %2864 = vmatprep.subr.mxu1 %v3065_v0 }
 0x43d   : > { %v2685_v28 = vpop.f32.mrf.mxu0  ;;  %2754 = vmatprep.mubr.msk.f32.mxu1 %vm3066_vm0, %v3065_v0  ;;  %2865 = vmatpush3.msra.mxu1 %v1821_v6  ;;  %v3936_v6 = vld [vmem:[%s4014_s14] ss:$0 sm:$0xff] }
 0x43e   : > { %v1471_v29 = vmax.f32 %v1424_v27, 0.0  ;;  %2866 = vmatprep.subr.mxu1 %v3065_v0 }
 0x43f   : > { %v1428_v30 = vpop.f32.mrf.mxu0  ;;  %2867 = vmatpush3.msra.mxu1 %v1820_v7 }
 0x440   : > { %v1429_v31 = vadd.f32 %v3784_v9, %v1428_v30  ;;  %2755 = vmatmul.mubr.f32.gmra.mxu1 %v1471_v29  ;;  %2868 = vmatprep.subr.mxu1 %v3065_v0 }
 0x441   : > { %v2688_v32 = vpop.f32.mrf.mxu0  ;;  %2757 = vmatprep.mubr.msk.f32.mxu1 %vm3066_vm0, %v3065_v0  ;;  %2869 = vmatpush3.msra.mxu1 %v1819_v8 }
 0x442   : > { %v1472_v33 = vmax.f32 %v1429_v31, 0.0  ;;  %2870 = vmatprep.subr.mxu1 %v3065_v0 }
 0x443   : > { %v1433_v34 = vpop.f32.mrf.mxu0 }
 0x444   : > { %v1434_v35 = vadd.f32 %v3784_v9, %v1433_v34  ;;  %2758 = vmatmul.mubr.f32.gmra.mxu1 %v1472_v33 }
 0x445   : > { %v2691_v36 = vpop.f32.mrf.mxu0  ;;  %2760 = vmatprep.mubr.msk.f32.mxu1 %vm3066_vm0, %v3065_v0 }
 0x446   : > { %v1473_v37 = vmax.f32 %v1434_v35, 0.0 }
 0x447   : > { %v1438_v38 = vpop.f32.mrf.mxu0 }
 0x448   : > { %v1439_v39 = vadd.f32 %v3784_v9, %v1438_v38  ;;  %2761 = vmatmul.mubr.f32.gmra.mxu1 %v1473_v37 }
 0x449   : > { %v2694_v40 = vpop.f32.mrf.mxu0  ;;  %2763 = vmatprep.mubr.msk.f32.mxu1 %vm3066_vm0, %v3065_v0 }
 0x44a   : > { %v1474_v41 = vmax.f32 %v1439_v39, 0.0 }
 0x44b   : > { %v1443_v42 = vpop.f32.mrf.mxu0 }
 0x44c   : > { %v1444_v43 = vadd.f32 %v3784_v9, %v1443_v42  ;;  %2764 = vmatmul.mubr.f32.gmra.mxu1 %v1474_v41 }
 0x44d   : > { %v2697_v44 = vpop.f32.mrf.mxu0  ;;  %2766 = vmatprep.mubr.msk.f32.mxu1 %vm3066_vm0, %v3065_v0 }
 0x44e   : > { %v1475_v45 = vmax.f32 %v1444_v43, 0.0 }
 0x44f   : > { %v1448_v46 = vpop.f32.mrf.mxu0 }
 0x450   : > { %v1449_v47 = vadd.f32 %v3784_v9, %v1448_v46  ;;  %2767 = vmatmul.mubr.f32.gmra.mxu1 %v1475_v45 }
 0x451   : > { %v2700_v48 = vpop.f32.mrf.mxu0  ;;  %2769 = vmatprep.mubr.msk.f32.mxu1 %vm3066_vm0, %v3065_v0 }
 0x452   : > { %v1476_v49 = vmax.f32 %v1449_v47, 0.0 }
 0x453   : > { %v1453_v50 = vpop.f32.mrf.mxu0 }
 0x454   : > { %v1454_v51 = vadd.f32 %v3784_v9, %v1453_v50  ;;  %2770 = vmatmul.mubr.f32.gmra.mxu1 %v1476_v49 }
 0x455   : > { %v2703_v52 = vpop.f32.mrf.mxu0  ;;  %2772 = vmatprep.mubr.msk.f32.mxu1 %vm3066_vm0, %v3065_v0 }
 0x456   : > { %v1477_v53 = vmax.f32 %v1454_v51, 0.0 }
 0x457   : > { %v1458_v54 = vpop.f32.mrf.mxu0 }
 0x458   : > { %v1459_v55 = vadd.f32 %v3784_v9, %v1458_v54  ;;  %2773 = vmatmul.mubr.f32.gmra.mxu1 %v1477_v53 }
 0x459   : > { %v2706_v56 = vpop.f32.mrf.mxu0  ;;  %2775 = vmatprep.mubr.msk.f32.mxu1 %vm3066_vm0, %v3065_v0 }
 0x45a   : > { %v1478_v57 = vmax.f32 %v1459_v55, 0.0 }
 0x45b   : > { %v1463_v58 = vpop.f32.mrf.mxu0 }
 0x45c   : > { %v1464_v59 = vadd.f32 %v3784_v9, %v1463_v58  ;;  %2776 = vmatmul.mubr.f32.gmra.mxu1 %v1478_v57  ;;  %v1818_v9 = vld [vmem:[%s4015_s15 + $0x30] sm:$0xff] }
 0x45d   : > { %v2709_v60 = vpop.f32.mrf.mxu0  ;;  %2778 = vmatprep.mubr.msk.f32.mxu1 %vm3066_vm0, %v3065_v0  ;;  %2871 = vmatpush3.msra.mxu1 %v1818_v9 }
 0x45e   : > { %v1479_v61 = vmax.f32 %v1464_v59, 0.0  ;;  %2872 = vmatprep.subr.mxu1 %v3065_v0 }
 0x45f   : > { %2873 = vmatpush3.msra.mxu1 %v1817_v10 }
 0x460   : > { %2779 = vmatmul.mubr.f32.gmra.mxu1 %v1479_v61  ;;  %2874 = vmatprep.subr.mxu1 %v3065_v0 }
 0x461   : > { %2884 = vmatprep.mubr.msk.f32.mxu1 %vm3066_vm0, %v3065_v0  ;;  %2875 = vmatpush3.msra.mxu1 %v1816_v11 }
 0x462   : > { %2876 = vmatprep.subr.mxu1 %v3065_v0 }
 0x463   : > { %2877 = vmatpush3.msra.mxu1 %v1815_v12 }
 0x464   : > { %2878 = vmatprep.subr.mxu1 %v3065_v0 }
 0x465   : > { %2879 = vmatpush3.msra.mxu1 %v1814_v13 }
 0x466   : > { %2880 = vmatprep.subr.mxu1 %v3065_v0 }
 0x467   : > { %2881 = vmatpush3.msra.mxu1 %v1813_v14 }
 0x468   : > { %2882 = vmatprep.subr.mxu1 %v3065_v0 }
 0x469   : > { %2883 = vmatpush3.msra.mxu1 %v1812_v5 }
 0x4f0   : > { %v1569_v16 = vpop.f32.mrf.mxu1 }
 0x4f1   : > { %v1570_v17 = vadd.f32 %v3891_v15, %v1569_v16 }
 0x4f2   : > { %v2744_v18 = vpop.f32.mrf.mxu1 }
 0x4f3   : > { %v1633_v19 = vmax.f32 %v1570_v17, 0.0 }
 0x4f4   : > { %v1574_v20 = vpop.f32.mrf.mxu1 }
 0x4f5   : > { %v1575_v21 = vadd.f32 %v3891_v15, %v1574_v20  ;;  %2814 = vmatmul.mubr.f32.vlgmr.msra.gmra.mxu0 %v1633_v19 }
 0x4f6   : > { %v2747_v22 = vpop.f32.mrf.mxu1  ;;  %2816 = vmatprep.mubr.msk.f32.mxu0 %vm3066_vm0, %v3065_v0 }
 0x4f7   : > { %v1634_v23 = vmax.f32 %v1575_v21, 0.0 }
 0x4f8   : > { %v1579_v24 = vpop.f32.mrf.mxu1 }
 0x4f9   : > { %v1580_v25 = vadd.f32 %v3891_v15, %v1579_v24  ;;  %2817 = vmatmul.mubr.f32.gmra.mxu0 %v1634_v23 }
 0x4fa   : > { %v2750_v26 = vpop.f32.mrf.mxu1  ;;  %2819 = vmatprep.mubr.msk.f32.mxu0 %vm3066_vm0, %v3065_v0 }
 0x4fb   : > { %v1635_v27 = vmax.f32 %v1580_v25, 0.0 }
 0x4fc   : > { %v1584_v28 = vpop.f32.mrf.mxu1 }
 0x4fd   : > { %v1585_v29 = vadd.f32 %v3891_v15, %v1584_v28  ;;  %2820 = vmatmul.mubr.f32.gmra.mxu0 %v1635_v27 }
 0x4fe   : > { %v2753_v30 = vpop.f32.mrf.mxu1  ;;  %2822 = vmatprep.mubr.msk.f32.mxu0 %vm3066_vm0, %v3065_v0 }
 0x4ff   : > { %v1636_v31 = vmax.f32 %v1585_v29, 0.0 }
 0x500   : > { %v1589_v32 = vpop.f32.mrf.mxu1 }
 0x501   : > { %v1590_v33 = vadd.f32 %v3891_v15, %v1589_v32  ;;  %2823 = vmatmul.mubr.f32.gmra.mxu0 %v1636_v31 }
 0x502   : > { %v2756_v34 = vpop.f32.mrf.mxu1  ;;  %2825 = vmatprep.mubr.msk.f32.mxu0 %vm3066_vm0, %v3065_v0 }
 0x503   : > { %v1637_v35 = vmax.f32 %v1590_v33, 0.0 }
 0x504   : > { %v1594_v36 = vpop.f32.mrf.mxu1 }
 0x505   : > { %v1595_v37 = vadd.f32 %v3891_v15, %v1594_v36  ;;  %2826 = vmatmul.mubr.f32.gmra.mxu0 %v1637_v35 }
 0x506   : > { %v2759_v38 = vpop.f32.mrf.mxu1  ;;  %2828 = vmatprep.mubr.msk.f32.mxu0 %vm3066_vm0, %v3065_v0 }
 0x507   : > { %v1638_v39 = vmax.f32 %v1595_v37, 0.0 }
 0x508   : > { %v1599_v40 = vpop.f32.mrf.mxu1 }
 0x509   : > { %v1600_v41 = vadd.f32 %v3891_v15, %v1599_v40  ;;  %2829 = vmatmul.mubr.f32.gmra.mxu0 %v1638_v39 }
 0x50a   : > { %v2762_v42 = vpop.f32.mrf.mxu1  ;;  %2831 = vmatprep.mubr.msk.f32.mxu0 %vm3066_vm0, %v3065_v0 }
 0x50b   : > { %v1639_v43 = vmax.f32 %v1600_v41, 0.0 }
 0x50c   : > { %v1604_v44 = vpop.f32.mrf.mxu1 }
 0x50d   : > { %v1605_v45 = vadd.f32 %v3891_v15, %v1604_v44  ;;  %2832 = vmatmul.mubr.f32.gmra.mxu0 %v1639_v43 }
 0x50e   : > { %v2765_v46 = vpop.f32.mrf.mxu1  ;;  %2834 = vmatprep.mubr.msk.f32.mxu0 %vm3066_vm0, %v3065_v0 }
 0x50f   : > { %v1640_v47 = vmax.f32 %v1605_v45, 0.0 }
 0x510   : > { %v1609_v48 = vpop.f32.mrf.mxu1 }
 0x511   : > { %v1610_v49 = vadd.f32 %v3891_v15, %v1609_v48  ;;  %2835 = vmatmul.mubr.f32.gmra.mxu0 %v1640_v47 }
 0x512   : > { %v2768_v50 = vpop.f32.mrf.mxu1  ;;  %2837 = vmatprep.mubr.msk.f32.mxu0 %vm3066_vm0, %v3065_v0 }
 0x513   : > { %v1641_v51 = vmax.f32 %v1610_v49, 0.0 }
 0x514   : > { %v1614_v52 = vpop.f32.mrf.mxu1 }
 0x515   : > { %v1615_v53 = vadd.f32 %v3891_v15, %v1614_v52  ;;  %2838 = vmatmul.mubr.f32.gmra.mxu0 %v1641_v51 }
 0x516   : > { %v2771_v54 = vpop.f32.mrf.mxu1  ;;  %2840 = vmatprep.mubr.msk.f32.mxu0 %vm3066_vm0, %v3065_v0 }
 0x517   : > { %v1642_v55 = vmax.f32 %v1615_v53, 0.0 }
 0x518   : > { %v1619_v56 = vpop.f32.mrf.mxu1 }
 0x519   : > { %v1620_v57 = vadd.f32 %v3891_v15, %v1619_v56  ;;  %2841 = vmatmul.mubr.f32.gmra.mxu0 %v1642_v55 }
 0x51a   : > { %v2774_v58 = vpop.f32.mrf.mxu1  ;;  %2843 = vmatprep.mubr.msk.f32.mxu0 %vm3066_vm0, %v3065_v0 }
 0x51b   : > { %v1643_v59 = vmax.f32 %v1620_v57, 0.0 }
 0x51c   : > { %v1624_v60 = vpop.f32.mrf.mxu1 }
 0x51d   : > { %v1625_v61 = vadd.f32 %v3891_v15, %v1624_v60  ;;  %2844 = vmatmul.mubr.f32.gmra.mxu0 %v1643_v59  ;;  %v2120_v59 = vld [vmem:[%s4016_s16] ss:$0 sm:$0xff] }
 0x51e   : > { %v2777_v62 = vpop.f32.mrf.mxu1  ;;  %2846 = vmatprep.mubr.msk.f32.mxu0 %vm3066_vm0, %v3065_v0 }
 0x51f   : > { %v1644_v63 = vmax.f32 %v1625_v61, 0.0 }
 0x520   : > { %v1629_v1 = vpop.f32.mrf.mxu1 }
 0x521   : > { %v1630_v2 = vadd.f32 %v3891_v15, %v1629_v1  ;;  %2847 = vmatmul.mubr.f32.gmra.mxu0 %v1644_v63 }
 0x522   : > { %v2780_v3 = vpop.f32.mrf.mxu1  ;;  %2849 = vmatprep.mubr.msk.f32.mxu0 %vm3066_vm0, %v3065_v0 }
 0x523   : > { %v1645_v4 = vmax.f32 %v1630_v2, 0.0 }
 0x525   : > { %2850 = vmatmul.mubr.f32.gmra.mxu0 %v1645_v4 }
 0x5b5   : > { %v1735_v7 = vpop.f32.mrf.mxu0 }
 0x5b6   : > { %v1736_v8 = vadd.f32 %v3936_v6, %v1735_v7 }
 0x5b7   : > { %v2815_v9 = vpop.f32.mrf.mxu0 }
 0x5b8   : > { %v1799_v10 = vmax.f32 %v1736_v8, 0.0 }
 0x5b9   : > { %v1740_v11 = vpop.f32.mrf.mxu0 }
 0x5ba   : > { %v1741_v12 = vadd.f32 %v3936_v6, %v1740_v11  ;;  %2885 = vmatmul.mubr.f32.vlgmr.msra.gmra.mxu1 %v1799_v10 }
 0x5bb   : > { %v2818_v13 = vpop.f32.mrf.mxu0  ;;  %2887 = vmatprep.mubr.msk.f32.mxu1 %vm3066_vm0, %v3065_v0 }
 0x5bc   : > { %v1800_v14 = vmax.f32 %v1741_v12, 0.0 }
 0x5bd   : > { %v1745_v15 = vpop.f32.mrf.mxu0 }
 0x5be   : > { %v1746_v16 = vadd.f32 %v3936_v6, %v1745_v15  ;;  %2888 = vmatmul.mubr.f32.gmra.mxu1 %v1800_v14 }
 0x5bf   : > { %v2821_v17 = vpop.f32.mrf.mxu0  ;;  %2890 = vmatprep.mubr.msk.f32.mxu1 %vm3066_vm0, %v3065_v0 }
 0x5c0   : > { %v1801_v18 = vmax.f32 %v1746_v16, 0.0 }
 0x5c1   : > { %v1750_v19 = vpop.f32.mrf.mxu0 }
 0x5c2   : > { %v1751_v20 = vadd.f32 %v3936_v6, %v1750_v19  ;;  %2891 = vmatmul.mubr.f32.gmra.mxu1 %v1801_v18 }
 0x5c3   : > { %v2824_v21 = vpop.f32.mrf.mxu0  ;;  %2893 = vmatprep.mubr.msk.f32.mxu1 %vm3066_vm0, %v3065_v0 }
 0x5c4   : > { %v1802_v22 = vmax.f32 %v1751_v20, 0.0 }
 0x5c5   : > { %v1755_v23 = vpop.f32.mrf.mxu0 }
 0x5c6   : > { %v1756_v24 = vadd.f32 %v3936_v6, %v1755_v23  ;;  %2894 = vmatmul.mubr.f32.gmra.mxu1 %v1802_v22 }
 0x5c7   : > { %v2827_v25 = vpop.f32.mrf.mxu0  ;;  %2896 = vmatprep.mubr.msk.f32.mxu1 %vm3066_vm0, %v3065_v0 }
 0x5c8   : > { %v1803_v26 = vmax.f32 %v1756_v24, 0.0 }
 0x5c9   : > { %v1760_v27 = vpop.f32.mrf.mxu0 }
 0x5ca   : > { %v1761_v28 = vadd.f32 %v3936_v6, %v1760_v27  ;;  %2897 = vmatmul.mubr.f32.gmra.mxu1 %v1803_v26 }
 0x5cb   : > { %v2830_v29 = vpop.f32.mrf.mxu0  ;;  %2899 = vmatprep.mubr.msk.f32.mxu1 %vm3066_vm0, %v3065_v0 }
 0x5cc   : > { %v1804_v30 = vmax.f32 %v1761_v28, 0.0 }
 0x5cd   : > { %v1765_v31 = vpop.f32.mrf.mxu0 }
 0x5ce   : > { %v1766_v32 = vadd.f32 %v3936_v6, %v1765_v31  ;;  %2900 = vmatmul.mubr.f32.gmra.mxu1 %v1804_v30 }
 0x5cf   : > { %v2833_v33 = vpop.f32.mrf.mxu0  ;;  %2902 = vmatprep.mubr.msk.f32.mxu1 %vm3066_vm0, %v3065_v0 }
 0x5d0   : > { %v1805_v34 = vmax.f32 %v1766_v32, 0.0 }
 0x5d1   : > { %v1770_v35 = vpop.f32.mrf.mxu0 }
 0x5d2   : > { %v1771_v36 = vadd.f32 %v3936_v6, %v1770_v35  ;;  %2903 = vmatmul.mubr.f32.gmra.mxu1 %v1805_v34 }
 0x5d3   : > { %v2836_v37 = vpop.f32.mrf.mxu0  ;;  %2905 = vmatprep.mubr.msk.f32.mxu1 %vm3066_vm0, %v3065_v0 }
 0x5d4   : > { %v1806_v38 = vmax.f32 %v1771_v36, 0.0 }
 0x5d5   : > { %v1775_v39 = vpop.f32.mrf.mxu0 }
 0x5d6   : > { %v1776_v40 = vadd.f32 %v3936_v6, %v1775_v39  ;;  %2906 = vmatmul.mubr.f32.gmra.mxu1 %v1806_v38 }
 0x5d7   : > { %v2839_v41 = vpop.f32.mrf.mxu0  ;;  %2908 = vmatprep.mubr.msk.f32.mxu1 %vm3066_vm0, %v3065_v0 }
 0x5d8   : > { %v1807_v42 = vmax.f32 %v1776_v40, 0.0 }
 0x5d9   : > { %v1780_v43 = vpop.f32.mrf.mxu0 }
 0x5da   : > { %v1781_v44 = vadd.f32 %v3936_v6, %v1780_v43  ;;  %2909 = vmatmul.mubr.f32.gmra.mxu1 %v1807_v42 }
 0x5db   : > { %v2842_v45 = vpop.f32.mrf.mxu0  ;;  %2911 = vmatprep.mubr.msk.f32.mxu1 %vm3066_vm0, %v3065_v0 }
 0x5dc   : > { %v1808_v46 = vmax.f32 %v1781_v44, 0.0 }
 0x5dd   : > { %v1785_v47 = vpop.f32.mrf.mxu0 }
 0x5de   : > { %v1786_v48 = vadd.f32 %v3936_v6, %v1785_v47  ;;  %2912 = vmatmul.mubr.f32.gmra.mxu1 %v1808_v46 }
 0x5df   : > { %v2845_v49 = vpop.f32.mrf.mxu0  ;;  %2914 = vmatprep.mubr.msk.f32.mxu1 %vm3066_vm0, %v3065_v0 }
 0x5e0   : > { %v1809_v50 = vmax.f32 %v1786_v48, 0.0 }
 0x5e1   : > { %v1790_v51 = vpop.f32.mrf.mxu0 }
 0x5e2   : > { %v1791_v52 = vadd.f32 %v3936_v6, %v1790_v51  ;;  %2915 = vmatmul.mubr.f32.gmra.mxu1 %v1809_v50 }
 0x5e3   : > { %v2848_v53 = vpop.f32.mrf.mxu0  ;;  %2917 = vmatprep.mubr.msk.f32.mxu1 %vm3066_vm0, %v3065_v0 }
 0x5e4   : > { %v1810_v54 = vmax.f32 %v1791_v52, 0.0 }
 0x5e5   : > { %v1795_v55 = vpop.f32.mrf.mxu0 }
 0x5e6   : > { %v1796_v56 = vadd.f32 %v3936_v6, %v1795_v55  ;;  %2918 = vmatmul.mubr.f32.gmra.mxu1 %v1810_v54 }
 0x5e7   : > { %v2851_v57 = vpop.f32.mrf.mxu0  ;;  %2920 = vmatprep.mubr.msk.f32.mxu1 %vm3066_vm0, %v3065_v0 }
 0x5e8   : > { %v1811_v58 = vmax.f32 %v1796_v56, 0.0 }
 0x5ea   : > { %2921 = vmatmul.mubr.f32.gmra.mxu1 %v1811_v58 }
 0x67a   : > { %v1901_v60 = vpop.f32.mrf.mxu1 }
 0x67b   : > { %v1902_v61 = vadd.f32 %v2120_v59, %v1901_v60 }
 0x67c   : > { %v2886_v62 = vpop.f32.mrf.mxu1 }
 0x67d   : > { %1965 = vst [vmem:[%s3982_s25] sm:$0xff] %v1902_v61 }
 0x67e   : > { %v1906_v0 = vpop.f32.mrf.mxu1 }
 0x67f   : > { %v1907_v63 = vadd.f32 %v2120_v59, %v1906_v0 }
 0x680   : > { %v2889_v1 = vpop.f32.mrf.mxu1 }
 0x681   : > { %1966 = vst [vmem:[%s3982_s25 + $0x8] sm:$0xff] %v1907_v63 }
 0x682   : > { %v1911_v2 = vpop.f32.mrf.mxu1 }
 0x683   : > { %v1912_v3 = vadd.f32 %v2120_v59, %v1911_v2 }
 0x684   : > { %v2892_v4 = vpop.f32.mrf.mxu1 }
 0x685   : > { %1967 = vst [vmem:[%s3982_s25 + $0x10] sm:$0xff] %v1912_v3 }
 0x686   : > { %v1916_v5 = vpop.f32.mrf.mxu1 }
 0x687   : > { %v1917_v6 = vadd.f32 %v2120_v59, %v1916_v5 }
 0x688   : > { %v2895_v7 = vpop.f32.mrf.mxu1 }
 0x689   : > { %1968 = vst [vmem:[%s3982_s25 + $0x18] sm:$0xff] %v1917_v6 }
 0x68a   : > { %v1921_v8 = vpop.f32.mrf.mxu1 }
 0x68b   : > { %v1922_v9 = vadd.f32 %v2120_v59, %v1921_v8 }
 0x68c   : > { %v2898_v10 = vpop.f32.mrf.mxu1 }
 0x68d   : > { %1969 = vst [vmem:[%s3982_s25 + $0x20] sm:$0xff] %v1922_v9 }
 0x68e   : > { %v1926_v11 = vpop.f32.mrf.mxu1 }
 0x68f   : > { %v1927_v12 = vadd.f32 %v2120_v59, %v1926_v11 }
 0x690   : > { %v2901_v13 = vpop.f32.mrf.mxu1 }
 0x691   : > { %1970 = vst [vmem:[%s3982_s25 + $0x28] sm:$0xff] %v1927_v12 }
 0x692   : > { %v1931_v14 = vpop.f32.mrf.mxu1 }
 0x693   : > { %v1932_v15 = vadd.f32 %v2120_v59, %v1931_v14 }
 0x694   : > { %v2904_v16 = vpop.f32.mrf.mxu1 }
 0x695   : > { %1971 = vst [vmem:[%s3982_s25 + $0x30] sm:$0xff] %v1932_v15 }
 0x696   : > { %v1936_v17 = vpop.f32.mrf.mxu1 }
 0x697   : > { %v1937_v18 = vadd.f32 %v2120_v59, %v1936_v17 }
 0x698   : > { %v2907_v19 = vpop.f32.mrf.mxu1 }
 0x699   : > { %1972 = vst [vmem:[%s3982_s25 + $0x38] sm:$0xff] %v1937_v18 }
 0x69a   : > { %v1941_v20 = vpop.f32.mrf.mxu1 }
 0x69b   : > { %v1942_v21 = vadd.f32 %v2120_v59, %v1941_v20 }
 0x69c   : > { %v2910_v22 = vpop.f32.mrf.mxu1 }
 0x69d   : > { %1973 = vst [vmem:[%s3982_s25 + $0x40] sm:$0xff] %v1942_v21 }
 0x69e   : > { %v1946_v23 = vpop.f32.mrf.mxu1 }
 0x69f   : > { %v1947_v24 = vadd.f32 %v2120_v59, %v1946_v23 }
 0x6a0   : > { %v2913_v25 = vpop.f32.mrf.mxu1 }
 0x6a1   : > { %1974 = vst [vmem:[%s3982_s25 + $0x48] sm:$0xff] %v1947_v24 }
 0x6a2   : > { %v1951_v26 = vpop.f32.mrf.mxu1 }
 0x6a3   : > { %v1952_v27 = vadd.f32 %v2120_v59, %v1951_v26 }
 0x6a4   : > { %v2916_v28 = vpop.f32.mrf.mxu1 }
 0x6a5   : > { %1975 = vst [vmem:[%s3982_s25 + $0x50] sm:$0xff] %v1952_v27 }
 0x6a6   : > { %v1956_v29 = vpop.f32.mrf.mxu1 }
 0x6a7   : > { %v1957_v30 = vadd.f32 %v2120_v59, %v1956_v29 }
 0x6a8   : > { %v2919_v31 = vpop.f32.mrf.mxu1 }
 0x6a9   : > { %1976 = vst [vmem:[%s3982_s25 + $0x58] sm:$0xff] %v1957_v30 }
 0x6aa   : > { %v1961_v32 = vpop.f32.mrf.mxu1 }
 0x6ab   : > { %v1962_v33 = vadd.f32 %v2120_v59, %v1961_v32 }
 0x6ac   : > { %v2922_v34 = vpop.f32.mrf.mxu1 }
 0x6ad   : > { %1977 = vst [vmem:[%s3982_s25 + $0x60] sm:$0xff] %v1962_v33 }
 0x6ae PF: > { %s31_s27 = sadd.s32 1, %s3058_s27  }
 0x6af   : > { %p28_p3 = scmp.ge.s32.totalorder %s31_s27, 4  }
 0x6b1   :  { %30 = sbr.rel (!%p28_p3) target bundleno = 6 (0x6), region = 143 }
 0x6b6   :  { %2017 = vsyncpa [#allocation3], 1 }
 0x6b7   :  { %2019 = vsyncpa [#allocation3 + $0x1], 1 }
 0x6b8   :  { %2020 = vsyncpa [#allocation5], 1 }

</bundles_post_ra>
